<compile_context>
chip_gen: v6e
topology: v6e:2x2x1
jax: 0.10.0
libtpu: 0.0.40
codegen_flags: <defaults>
</compile_context>

<pallas_src>
import jax
import jax.numpy as jnp
from jax.experimental import pallas as pl
from jax.experimental.pallas import tpu as pltpu

EPS = 1e-5
MXU_DTYPE = jnp.bfloat16      # MXU operand dtype; accumulation & BN math stay f32
LANE = 128


def _round_up(x, m):
    return (x + m - 1) // m * m


def _vmem_limit_bytes():
    cap = 128 * 1024 * 1024
    try:
        info = pltpu.get_tpu_info()
        cap = int(getattr(info, "vmem_capacity_bytes", cap) or cap)
    except Exception:
        pass
    # leave headroom for compiler-internal scratch / semaphores / double buffers
    return int(cap * 0.75)


def _pick_row_tile(H, W, cin_p, cout_p, act_bytes, vmem_limit):
    """Largest row tile whose per-grid-step VMEM footprint fits ~half the limit."""
    budget = vmem_limit // 2

    def need(ht):
        rows = ht * W
        in_blk = (rows + 2 * W) * cin_p * act_bytes            # main + two halo rows
        out_blk = rows * cout_p * act_bytes + 2 * cout_p * 4   # y tile + moments
        win = (rows + 2 * W + 16) * cin_p * 2                  # bf16 flat window
        tap = rows * cin_p * 2                                 # one live tap slice
        acc = rows * cout_p * 4                                # f32 accumulator
        wts = 9 * cin_p * cout_p * 2                           # bf16 weights
        return 2 * (in_blk + out_blk) + win + tap + acc + 2 * wts

    cands = [ht for ht in range(8, H + 1, 8) if H % ht == 0 and need(ht) <= budget]
    if not cands:
        return 8
    multi = [ht for ht in cands if H // ht >= 2]   # keep >=2 tiles when possible
    return max(multi) if multi else max(cands)


def _make_conv_tile_kernel(HT, W, Cin_p, Cout_p, n_h_tiles, apply_affine):
    """(optional BN-affine+ReLU on input) -> 3x3 'SAME' conv + bias -> per-tile moments.

    Activation layout is (flat pixel rows, channels); one grid tile is HT image rows
    (= HT*W pixel rows).  One extra image row above/below arrives through two small
    halo BlockSpecs on the same array; image borders are handled with masks so no
    spatially padded copies ever hit HBM or VMEM.
    """
    rows = HT * W

    def kernel(*refs):
        if apply_affine:
            (prev_ref, main_ref, next_ref, w_ref, b_ref,
             sc_ref, sh_ref, y_ref, st_ref) = refs
        else:
            (prev_ref, main_ref, next_ref, w_ref, b_ref, y_ref, st_ref) = refs
            sc_ref = sh_ref = None

        h = pl.program_id(1)
        zero = jnp.zeros((), MXU_DTYPE)

        def act(v):
            if apply_affine:   # previous stage's BN affine + ReLU, computed in f32
                v = jnp.maximum(v.astype(jnp.float32) * sc_ref[0] + sh_ref[0], 0.0)
            return v.astype(MXU_DTYPE)

        a_prev = act(prev_ref[0])                   # (W, Cin_p)    image row h*HT - 1
        a_main = act(main_ref[0])                   # (rows, Cin_p) rows [h*HT, h*HT+HT)
        a_next = act(next_ref[0])                   # (W, Cin_p)    image row h*HT + HT
        # rows outside the image are zero padding (zeroed AFTER the affine)
        a_prev = jnp.where(h == 0, zero, a_prev)
        a_next = jnp.where(h == n_h_tiles - 1, zero, a_next)

        # flat bf16 window: 8 spare zero rows top/bottom keep every tap slice in range
        zrow = jnp.zeros((8, Cin_p), MXU_DTYPE)
        win = jnp.concatenate([zrow, a_prev, a_main, a_next, zrow], axis=0)

        # column index of every output pixel; left/right border handled by masking
        col = jax.lax.broadcasted_iota(jnp.int32, (rows, 1), 0) % W
        at_left = col == 0
        at_right = col == W - 1

        # 9 accumulating K=Cin_p MXU dots over static sublane-offset bf16 tap slices;
        # no (rows, 9*Cin_p) im2col patch is ever materialized.
        acc = jnp.zeros((rows, Cout_p), jnp.float32)
        for ky in range(3):
            for kx in range(3):
                off = 7 + ky * W + kx
                tap = win[off:off + rows, :]
                if kx == 0:                          # tap looks one pixel left
                    tap = jnp.where(at_left, zero, tap)
                elif kx == 2:                        # one pixel right
                    tap = jnp.where(at_right, zero, tap)
                acc = acc + jnp.dot(tap, w_ref[ky * 3 + kx],
                                    preferred_element_type=jnp.float32)

        y = acc + b_ref[0]                           # conv bias, f32
        y_ref[0] = y.astype(y_ref.dtype)             # lane-dense bf16 store
        # per-tile first/second moments (f32), folded per-channel outside the kernel
        s1 = jnp.sum(y, axis=0, keepdims=True)
        s2 = jnp.sum(y * y, axis=0, keepdims=True)
        st_ref[0, 0] = jnp.concatenate([s1, s2], axis=0)    # (2, Cout_p)

    return kernel


def _bn_scale_shift(tile_moments, gamma_p, beta_p, count):
    """Fold per-tile moments into per-channel BN scale/shift (training-mode stats)."""
    # TODO(synk): single-pass E[x^2]-mean^2 in f32 can lose precision for huge images;
    # the reference uses the two-pass form.  Fine at current tolerances.
    s = jnp.sum(tile_moments, axis=(0, 1))                   # (2, Cp)
    mean = s[0] / count
    var = jnp.maximum(s[1] / count - mean * mean, 0.0)       # biased variance
    scale = gamma_p * jax.lax.rsqrt(var + EPS)
    shift = beta_p - mean * scale
    cp = scale.shape[0]
    return scale.reshape(1, cp), shift.reshape(1, cp)


def double_conv(x_nchw, params):
    """PyTorch-semantics DoubleConv forward. x_nchw: (N, Cin, H, W) float32."""
    # TODO(synk): PyTorch training-mode BatchNorm2d also updates running_mean/var
    # buffers; this forward reproduces the normalization math only.
    w1, b1, g1, be1, w2, b2, g2, be2 = params
    N, Cin, H, W = x_nchw.shape
    Cout = w1.shape[-1]
    assert H % 8 == 0 and W % 8 == 0, "spatial dims must be multiples of 8"
    # TODO(synk): fully general H/W needs extra row/col masking of ragged last tiles.

    # bf16 intermediates require (16,128) block tiles -> sublane dims (W, HT*W) % 16
    act_dtype = jnp.bfloat16 if W % 16 == 0 else jnp.float32
    act_bytes = 2 if act_dtype == jnp.bfloat16 else 4

    Cpi = _round_up(Cin, 8)        # input channels: cheap sublane-friendly K padding
    Cpo = _round_up(Cout, LANE)    # output channels: lane-dense stores & VPU ops
    # TODO(synk): for Cout << 128 this inflates padded HBM/MXU width; pack batch into
    # the lane dim (or accept masked stores) for such small-channel layers.

    vmem_limit = _vmem_limit_bytes()
    HT = _pick_row_tile(H, W, max(Cpi, Cpo), Cpo, act_bytes, vmem_limit)
    nH = H // HT

    # ---- one-time layout prep (single fused XLA pass; no spatial padding copies) ----
    x = jnp.transpose(x_nchw, (0, 2, 3, 1)).reshape(N, H * W, Cin)
    x = jnp.pad(x, ((0, 0), (0, 0), (0, Cpi - Cin))).astype(act_dtype)

    wm1 = jnp.pad(w1, ((0, 0), (0, 0), (0, Cpi - Cin), (0, Cpo - Cout)))
    wm1 = wm1.reshape(9, Cpi, Cpo).astype(MXU_DTYPE)
    wm2 = jnp.pad(w2, ((0, 0), (0, 0), (0, Cpo - Cout), (0, Cpo - Cout)))
    wm2 = wm2.reshape(9, Cpo, Cpo).astype(MXU_DTYPE)

    padc = lambda v: jnp.pad(v, (0, Cpo - Cout))
    b1p, g1p, be1p = padc(b1), padc(g1), padc(be1)
    b2p, g2p, be2p = padc(b2), padc(g2), padc(be2)

    grid = (N, nH)
    cparams = pltpu.CompilerParams(
        dimension_semantics=("parallel", "parallel"),   # megacore-shardable on v7x
        vmem_limit_bytes=vmem_limit,
    )

    def conv_specs(cin_p):
        prev = pl.BlockSpec((1, W, cin_p),
                            lambda n, h: (n, jnp.maximum(h * HT - 1, 0), 0))
        main = pl.BlockSpec((1, HT * W, cin_p), lambda n, h: (n, h, 0))
        nxt = pl.BlockSpec((1, W, cin_p),
                           lambda n, h: (n, jnp.minimum(h * HT + HT, H - 1), 0))
        return prev, main, nxt

    def const_spec(shape):
        return pl.BlockSpec(shape, lambda n, h: (0,) * len(shape))

    y_spec = pl.BlockSpec((1, HT * W, Cpo), lambda n, h: (n, h, 0))
    st_spec = pl.BlockSpec((1, 1, 2, Cpo), lambda n, h: (n, h, 0, 0))
    y_shape = jax.ShapeDtypeStruct((N, H * W, Cpo), act_dtype)
    st_shape = jax.ShapeDtypeStruct((N, nH, 2, Cpo), jnp.float32)
    count = float(N * H * W)

    # ---- pass 1: conv1 + bias, per-tile moments ----
    p1, m1, n1 = conv_specs(Cpi)
    y1, st1 = pl.pallas_call(
        _make_conv_tile_kernel(HT, W, Cpi, Cpo, nH, apply_affine=False),
        grid=grid,
        in_specs=[p1, m1, n1, const_spec((9, Cpi, Cpo)), const_spec((1, Cpo))],
        out_specs=[y_spec, st_spec],
        out_shape=[y_shape, st_shape],
        compiler_params=cparams,
    )(x, x, x, wm1, b1p.reshape(1, Cpo))

    # ---- pass 2: bn1-affine + relu -> conv2 + bias, per-tile moments ----
    sc1, sh1 = _bn_scale_shift(st1, g1p, be1p, count)
    p2, m2, n2 = conv_specs(Cpo)
    y2, st2 = pl.pallas_call(
        _make_conv_tile_kernel(HT, W, Cpo, Cpo, nH, apply_affine=True),
        grid=grid,
        in_specs=[p2, m2, n2, const_spec((9, Cpo, Cpo)), const_spec((1, Cpo)),
                  const_spec((1, Cpo)), const_spec((1, Cpo))],
        out_specs=[y_spec, st_spec],
        out_shape=[y_shape, st_shape],
        compiler_params=cparams,
    )(y1, y1, y1, wm2, b2p.reshape(1, Cpo), sc1, sh1)

    # ---- pass 3 (one XLA fusion): bn2-affine + relu + channel slice + NHWC->NCHW ----
    sc2, sh2 = _bn_scale_shift(st2, g2p, be2p, count)
    y2f = y2.reshape(N, H, W, Cpo)[..., :Cout].astype(jnp.float32)
    out = jnp.maximum(y2f * sc2[0, :Cout] + sh2[0, :Cout], 0.0)
    return jnp.transpose(out, (0, 3, 1, 2))                  # NHWC -> NCHW boundary


def ref_double_conv(x_nchw, params):
    """Plain-JAX f32 reference (correctness check only)."""
    w1, b1, g1, be1, w2, b2, g2, be2 = params
    x = jnp.transpose(x_nchw, (0, 2, 3, 1))

    def stage(x, w, b, g, be):
        y = jax.lax.conv_general_dilated(
            x, w, window_strides=(1, 1), padding='SAME',
            dimension_numbers=('NHWC', 'HWIO', 'NHWC')) + b
        mean = jnp.mean(y, axis=(0, 1, 2), keepdims=True)
        var = jnp.mean(jnp.square(y - mean), axis=(0, 1, 2), keepdims=True)
        return jnp.maximum((y - mean) * jax.lax.rsqrt(var + EPS) * g + be, 0.0)

    y = stage(x, w1, b1, g1, be1)
    y = stage(y, w2, b2, g2, be2)
    return jnp.transpose(y, (0, 3, 1, 2))


def init_params(key, in_channels, out_channels):
    ks = jax.random.split(key, 8)
    # conv weights as HWIO (3, 3, Cin, Cout)
    w1 = jax.random.normal(ks[0], (3, 3, in_channels, out_channels), jnp.float32) * 0.2
    b1 = jax.random.normal(ks[1], (out_channels,), jnp.float32) * 0.1
    g1 = 1.0 + 0.1 * jax.random.normal(ks[2], (out_channels,), jnp.float32)
    be1 = 0.1 * jax.random.normal(ks[3], (out_channels,), jnp.float32)
    w2 = jax.random.normal(ks[4], (3, 3, out_channels, out_channels), jnp.float32) * 0.2
    b2 = jax.random.normal(ks[5], (out_channels,), jnp.float32) * 0.1
    g2 = 1.0 + 0.1 * jax.random.normal(ks[6], (out_channels,), jnp.float32)
    be2 = 0.1 * jax.random.normal(ks[7], (out_channels,), jnp.float32)
    return (w1, b1, g1, be1, w2, b2, g2, be2)


if __name__ == "__main__":
    key = jax.random.PRNGKey(0)
    k_x, k_p = jax.random.split(key)

    N, Cin, Cout, H, W = 2, 4, 8, 16, 16
    x = jax.random.normal(k_x, (N, Cin, H, W), jnp.float32)
    params = init_params(k_p, Cin, Cout)

    fwd = jax.jit(double_conv)
    out = jax.block_until_ready(fwd(x, params))

    ref = ref_double_conv(x, params)
    assert out.shape == (N, Cout, H, W)
    # bf16 MXU operands + bf16 inter-pass activations -> relaxed tolerance vs f32 ref.
    assert jnp.allclose(out, ref, rtol=5e-2, atol=1e-1), "mismatch vs JAX reference"

    print("KERNEL_OK")
</pallas_src>

<mosaic_0001>
module attributes {stable_mosaic.version = 11 : i64} {
  func.func @kernel(%arg0: i32, %arg1: i32, %arg2: memref<1x16x8xbf16, #tpu.memory_space<vmem>>, %arg3: memref<1x128x8xbf16, #tpu.memory_space<vmem>>, %arg4: memref<1x16x8xbf16, #tpu.memory_space<vmem>>, %arg5: memref<9x8x128xbf16, #tpu.memory_space<vmem>>, %arg6: memref<1x128xf32, #tpu.memory_space<vmem>>, %arg7: memref<1x128x128xbf16, #tpu.memory_space<vmem>>, %arg8: memref<1x1x2x128xf32, #tpu.memory_space<vmem>>) attributes {dimension_semantics = [#tpu.dimension_semantics<parallel>, #tpu.dimension_semantics<parallel>], iteration_bounds = array<i64: 2, 2>, scalar_prefetch = 0 : i64, scratch_operands = 0 : i64, tpu.core_type = #tpu.core_type<tc>, window_params = [{transform_indices = @transform_0, window_bounds = array<i64: 1, 16, 8>}, {transform_indices = @transform_1, window_bounds = array<i64: 1, 128, 8>}, {transform_indices = @transform_2, window_bounds = array<i64: 1, 16, 8>}, {pipeline_mode = #tpu.pipeline_mode<synchronous>, transform_indices = @transform_3, window_bounds = array<i64: 9, 8, 128>}, {pipeline_mode = #tpu.pipeline_mode<synchronous>, transform_indices = @transform_4, window_bounds = array<i64: 1, 128>}, {transform_indices = @transform_5, window_bounds = array<i64: 1, 128, 128>}, {transform_indices = @transform_6, window_bounds = array<i64: 1, 1, 2, 128>}]} {
    %c0 = arith.constant 0 : index
    %c0_0 = arith.constant 0 : index
    %c0_1 = arith.constant 0 : index
    %0 = vector.load %arg2[%c0, %c0_0, %c0_1] : memref<1x16x8xbf16, #tpu.memory_space<vmem>>, vector<1x16x8xbf16>
    %1 = vector.shape_cast %0 : vector<1x16x8xbf16> to vector<16x8xbf16>
    %c0_2 = arith.constant 0 : index
    %c0_3 = arith.constant 0 : index
    %c0_4 = arith.constant 0 : index
    %2 = vector.load %arg3[%c0_2, %c0_3, %c0_4] : memref<1x128x8xbf16, #tpu.memory_space<vmem>>, vector<1x128x8xbf16>
    %3 = vector.shape_cast %2 : vector<1x128x8xbf16> to vector<128x8xbf16>
    %c0_5 = arith.constant 0 : index
    %c0_6 = arith.constant 0 : index
    %c0_7 = arith.constant 0 : index
    %4 = vector.load %arg4[%c0_5, %c0_6, %c0_7] : memref<1x16x8xbf16, #tpu.memory_space<vmem>>, vector<1x16x8xbf16>
    %5 = vector.shape_cast %4 : vector<1x16x8xbf16> to vector<16x8xbf16>
    %c0_i32 = arith.constant 0 : i32
    %6 = arith.cmpi eq, %arg1, %c0_i32 : i32
    %cst = arith.constant 0.000000e+00 : bf16
    %7 = vector.broadcast %cst : bf16 to vector<16x8xbf16>
    %8 = arith.select %6, %7, %1 : vector<16x8xbf16>
    %c1_i32 = arith.constant 1 : i32
    %9 = arith.cmpi eq, %arg1, %c1_i32 : i32
    %cst_8 = arith.constant 0.000000e+00 : bf16
    %10 = vector.broadcast %cst_8 : bf16 to vector<16x8xbf16>
    %11 = arith.select %9, %10, %5 : vector<16x8xbf16>
    %cst_9 = arith.constant 0.000000e+00 : bf16
    %12 = vector.broadcast %cst_9 : bf16 to vector<8x8xbf16>
    %13 = tpu.concatenate %12, %8, %3, %11, %12 in 0 : vector<8x8xbf16>, vector<16x8xbf16>, vector<128x8xbf16>, vector<16x8xbf16>, vector<8x8xbf16> -> vector<176x8xbf16>
    %14 = tpu.iota {dimensions = array<i32: 0>} : vector<128x1xi32>
    %c16_i32 = arith.constant 16 : i32
    %c0_i32_10 = arith.constant 0 : i32
    %15 = arith.cmpi eq, %c16_i32, %c0_i32_10 : i32
    %c1_i32_11 = arith.constant 1 : i32
    %16 = arith.select %15, %c1_i32_11, %c16_i32 : i32
    %17 = vector.broadcast %16 : i32 to vector<128x1xi32>
    %18 = arith.remsi %14, %17 : vector<128x1xi32>
    %c0_i32_12 = arith.constant 0 : i32
    %19 = vector.broadcast %c0_i32_12 : i32 to vector<128x1xi32>
    %20 = arith.cmpi ne, %18, %19 : vector<128x1xi32>
    %c0_i32_13 = arith.constant 0 : i32
    %21 = vector.broadcast %c0_i32_13 : i32 to vector<128x1xi32>
    %22 = arith.cmpi slt, %18, %21 : vector<128x1xi32>
    %c0_i32_14 = arith.constant 0 : i32
    %23 = arith.cmpi slt, %16, %c0_i32_14 : i32
    %24 = vector.broadcast %23 : i1 to vector<128x1xi1>
    %25 = vector.broadcast %24 : vector<128x1xi1> to vector<128x1xi1>
    %26 = arith.xori %22, %25 : vector<128x1xi1>
    %27 = arith.andi %26, %20 : vector<128x1xi1>
    %28 = vector.broadcast %16 : i32 to vector<128x1xi32>
    %29 = arith.addi %18, %28 : vector<128x1xi32>
    %30 = arith.select %27, %29, %18 : vector<128x1xi1>, vector<128x1xi32>
    %c0_i32_15 = arith.constant 0 : i32
    %31 = vector.broadcast %c0_i32_15 : i32 to vector<128x1xi32>
    %32 = arith.cmpi eq, %30, %31 : vector<128x1xi32>
    %c15_i32 = arith.constant 15 : i32
    %33 = vector.broadcast %c15_i32 : i32 to vector<128x1xi32>
    %34 = arith.cmpi eq, %30, %33 : vector<128x1xi32>
    %cst_16 = arith.constant 0.000000e+00 : f32
    %35 = vector.broadcast %cst_16 : f32 to vector<128x128xf32>
    %36 = vector.extract_strided_slice %13 {offsets = [7, 0], sizes = [128, 8], strides = [1, 1]} : vector<176x8xbf16> to vector<128x8xbf16>
    %cst_17 = arith.constant 0.000000e+00 : bf16
    %37 = vector.shape_cast %32 : vector<128x1xi1> to vector<128x1xi1>
    %38 = vector.broadcast %37 : vector<128x1xi1> to vector<128x8xi1>
    %39 = vector.broadcast %cst_17 : bf16 to vector<128x8xbf16>
    %40 = arith.select %38, %39, %36 : vector<128x8xi1>, vector<128x8xbf16>
    %c0_18 = arith.constant 0 : index
    %c0_19 = arith.constant 0 : index
    %c0_20 = arith.constant 0 : index
    %41 = vector.load %arg5[%c0_18, %c0_19, %c0_20] : memref<9x8x128xbf16, #tpu.memory_space<vmem>>, vector<1x8x128xbf16>
    %42 = vector.shape_cast %41 : vector<1x8x128xbf16> to vector<8x128xbf16>
    %cst_21 = arith.constant dense<0.000000e+00> : vector<128x128xf32>
    %43 = tpu.matmul %40, %42, %cst_21 {dimension_numbers = #tpu.dot_dimension_numbers<[1], [0], [0], [1], [0, 0, 1, 1], [], []>} : vector<128x8xbf16>, vector<8x128xbf16>, vector<128x128xf32> -> vector<128x128xf32>
    %44 = arith.addf %35, %43 : vector<128x128xf32>
    %45 = vector.extract_strided_slice %13 {offsets = [8, 0], sizes = [128, 8], strides = [1, 1]} : vector<176x8xbf16> to vector<128x8xbf16>
    %c1 = arith.constant 1 : index
    %c0_22 = arith.constant 0 : index
    %c0_23 = arith.constant 0 : index
    %46 = vector.load %arg5[%c1, %c0_22, %c0_23] : memref<9x8x128xbf16, #tpu.memory_space<vmem>>, vector<1x8x128xbf16>
    %47 = vector.shape_cast %46 : vector<1x8x128xbf16> to vector<8x128xbf16>
    %cst_24 = arith.constant dense<0.000000e+00> : vector<128x128xf32>
    %48 = tpu.matmul %45, %47, %cst_24 {dimension_numbers = #tpu.dot_dimension_numbers<[1], [0], [0], [1], [0, 0, 1, 1], [], []>} : vector<128x8xbf16>, vector<8x128xbf16>, vector<128x128xf32> -> vector<128x128xf32>
    %49 = arith.addf %44, %48 : vector<128x128xf32>
    %50 = vector.extract_strided_slice %13 {offsets = [9, 0], sizes = [128, 8], strides = [1, 1]} : vector<176x8xbf16> to vector<128x8xbf16>
    %cst_25 = arith.constant 0.000000e+00 : bf16
    %51 = vector.shape_cast %34 : vector<128x1xi1> to vector<128x1xi1>
    %52 = vector.broadcast %51 : vector<128x1xi1> to vector<128x8xi1>
    %53 = vector.broadcast %cst_25 : bf16 to vector<128x8xbf16>
    %54 = arith.select %52, %53, %50 : vector<128x8xi1>, vector<128x8xbf16>
    %c2 = arith.constant 2 : index
    %c0_26 = arith.constant 0 : index
    %c0_27 = arith.constant 0 : index
    %55 = vector.load %arg5[%c2, %c0_26, %c0_27] : memref<9x8x128xbf16, #tpu.memory_space<vmem>>, vector<1x8x128xbf16>
    %56 = vector.shape_cast %55 : vector<1x8x128xbf16> to vector<8x128xbf16>
    %cst_28 = arith.constant dense<0.000000e+00> : vector<128x128xf32>
    %57 = tpu.matmul %54, %56, %cst_28 {dimension_numbers = #tpu.dot_dimension_numbers<[1], [0], [0], [1], [0, 0, 1, 1], [], []>} : vector<128x8xbf16>, vector<8x128xbf16>, vector<128x128xf32> -> vector<128x128xf32>
    %58 = arith.addf %49, %57 : vector<128x128xf32>
    %59 = vector.extract_strided_slice %13 {offsets = [23, 0], sizes = [128, 8], strides = [1, 1]} : vector<176x8xbf16> to vector<128x8xbf16>
    %cst_29 = arith.constant 0.000000e+00 : bf16
    %60 = vector.shape_cast %32 : vector<128x1xi1> to vector<128x1xi1>
    %61 = vector.broadcast %60 : vector<128x1xi1> to vector<128x8xi1>
    %62 = vector.broadcast %cst_29 : bf16 to vector<128x8xbf16>
    %63 = arith.select %61, %62, %59 : vector<128x8xi1>, vector<128x8xbf16>
    %c3 = arith.constant 3 : index
    %c0_30 = arith.constant 0 : index
    %c0_31 = arith.constant 0 : index
    %64 = vector.load %arg5[%c3, %c0_30, %c0_31] : memref<9x8x128xbf16, #tpu.memory_space<vmem>>, vector<1x8x128xbf16>
    %65 = vector.shape_cast %64 : vector<1x8x128xbf16> to vector<8x128xbf16>
    %cst_32 = arith.constant dense<0.000000e+00> : vector<128x128xf32>
    %66 = tpu.matmul %63, %65, %cst_32 {dimension_numbers = #tpu.dot_dimension_numbers<[1], [0], [0], [1], [0, 0, 1, 1], [], []>} : vector<128x8xbf16>, vector<8x128xbf16>, vector<128x128xf32> -> vector<128x128xf32>
    %67 = arith.addf %58, %66 : vector<128x128xf32>
    %68 = vector.extract_strided_slice %13 {offsets = [24, 0], sizes = [128, 8], strides = [1, 1]} : vector<176x8xbf16> to vector<128x8xbf16>
    %c4 = arith.constant 4 : index
    %c0_33 = arith.constant 0 : index
    %c0_34 = arith.constant 0 : index
    %69 = vector.load %arg5[%c4, %c0_33, %c0_34] : memref<9x8x128xbf16, #tpu.memory_space<vmem>>, vector<1x8x128xbf16>
    %70 = vector.shape_cast %69 : vector<1x8x128xbf16> to vector<8x128xbf16>
    %cst_35 = arith.constant dense<0.000000e+00> : vector<128x128xf32>
    %71 = tpu.matmul %68, %70, %cst_35 {dimension_numbers = #tpu.dot_dimension_numbers<[1], [0], [0], [1], [0, 0, 1, 1], [], []>} : vector<128x8xbf16>, vector<8x128xbf16>, vector<128x128xf32> -> vector<128x128xf32>
    %72 = arith.addf %67, %71 : vector<128x128xf32>
    %73 = vector.extract_strided_slice %13 {offsets = [25, 0], sizes = [128, 8], strides = [1, 1]} : vector<176x8xbf16> to vector<128x8xbf16>
    %cst_36 = arith.constant 0.000000e+00 : bf16
    %74 = vector.shape_cast %34 : vector<128x1xi1> to vector<128x1xi1>
    %75 = vector.broadcast %74 : vector<128x1xi1> to vector<128x8xi1>
    %76 = vector.broadcast %cst_36 : bf16 to vector<128x8xbf16>
    %77 = arith.select %75, %76, %73 : vector<128x8xi1>, vector<128x8xbf16>
    %c5 = arith.constant 5 : index
    %c0_37 = arith.constant 0 : index
    %c0_38 = arith.constant 0 : index
    %78 = vector.load %arg5[%c5, %c0_37, %c0_38] : memref<9x8x128xbf16, #tpu.memory_space<vmem>>, vector<1x8x128xbf16>
    %79 = vector.shape_cast %78 : vector<1x8x128xbf16> to vector<8x128xbf16>
    %cst_39 = arith.constant dense<0.000000e+00> : vector<128x128xf32>
    %80 = tpu.matmul %77, %79, %cst_39 {dimension_numbers = #tpu.dot_dimension_numbers<[1], [0], [0], [1], [0, 0, 1, 1], [], []>} : vector<128x8xbf16>, vector<8x128xbf16>, vector<128x128xf32> -> vector<128x128xf32>
    %81 = arith.addf %72, %80 : vector<128x128xf32>
    %82 = vector.extract_strided_slice %13 {offsets = [39, 0], sizes = [128, 8], strides = [1, 1]} : vector<176x8xbf16> to vector<128x8xbf16>
    %cst_40 = arith.constant 0.000000e+00 : bf16
    %83 = vector.shape_cast %32 : vector<128x1xi1> to vector<128x1xi1>
    %84 = vector.broadcast %83 : vector<128x1xi1> to vector<128x8xi1>
    %85 = vector.broadcast %cst_40 : bf16 to vector<128x8xbf16>
    %86 = arith.select %84, %85, %82 : vector<128x8xi1>, vector<128x8xbf16>
    %c6 = arith.constant 6 : index
    %c0_41 = arith.constant 0 : index
    %c0_42 = arith.constant 0 : index
    %87 = vector.load %arg5[%c6, %c0_41, %c0_42] : memref<9x8x128xbf16, #tpu.memory_space<vmem>>, vector<1x8x128xbf16>
    %88 = vector.shape_cast %87 : vector<1x8x128xbf16> to vector<8x128xbf16>
    %cst_43 = arith.constant dense<0.000000e+00> : vector<128x128xf32>
    %89 = tpu.matmul %86, %88, %cst_43 {dimension_numbers = #tpu.dot_dimension_numbers<[1], [0], [0], [1], [0, 0, 1, 1], [], []>} : vector<128x8xbf16>, vector<8x128xbf16>, vector<128x128xf32> -> vector<128x128xf32>
    %90 = arith.addf %81, %89 : vector<128x128xf32>
    %91 = vector.extract_strided_slice %13 {offsets = [40, 0], sizes = [128, 8], strides = [1, 1]} : vector<176x8xbf16> to vector<128x8xbf16>
    %c7 = arith.constant 7 : index
    %c0_44 = arith.constant 0 : index
    %c0_45 = arith.constant 0 : index
    %92 = vector.load %arg5[%c7, %c0_44, %c0_45] : memref<9x8x128xbf16, #tpu.memory_space<vmem>>, vector<1x8x128xbf16>
    %93 = vector.shape_cast %92 : vector<1x8x128xbf16> to vector<8x128xbf16>
    %cst_46 = arith.constant dense<0.000000e+00> : vector<128x128xf32>
    %94 = tpu.matmul %91, %93, %cst_46 {dimension_numbers = #tpu.dot_dimension_numbers<[1], [0], [0], [1], [0, 0, 1, 1], [], []>} : vector<128x8xbf16>, vector<8x128xbf16>, vector<128x128xf32> -> vector<128x128xf32>
    %95 = arith.addf %90, %94 : vector<128x128xf32>
    %96 = vector.extract_strided_slice %13 {offsets = [41, 0], sizes = [128, 8], strides = [1, 1]} : vector<176x8xbf16> to vector<128x8xbf16>
    %cst_47 = arith.constant 0.000000e+00 : bf16
    %97 = vector.shape_cast %34 : vector<128x1xi1> to vector<128x1xi1>
    %98 = vector.broadcast %97 : vector<128x1xi1> to vector<128x8xi1>
    %99 = vector.broadcast %cst_47 : bf16 to vector<128x8xbf16>
    %100 = arith.select %98, %99, %96 : vector<128x8xi1>, vector<128x8xbf16>
    %c8 = arith.constant 8 : index
    %c0_48 = arith.constant 0 : index
    %c0_49 = arith.constant 0 : index
    %101 = vector.load %arg5[%c8, %c0_48, %c0_49] : memref<9x8x128xbf16, #tpu.memory_space<vmem>>, vector<1x8x128xbf16>
    %102 = vector.shape_cast %101 : vector<1x8x128xbf16> to vector<8x128xbf16>
    %cst_50 = arith.constant dense<0.000000e+00> : vector<128x128xf32>
    %103 = tpu.matmul %100, %102, %cst_50 {dimension_numbers = #tpu.dot_dimension_numbers<[1], [0], [0], [1], [0, 0, 1, 1], [], []>} : vector<128x8xbf16>, vector<8x128xbf16>, vector<128x128xf32> -> vector<128x128xf32>
    %104 = arith.addf %95, %103 : vector<128x128xf32>
    %c0_51 = arith.constant 0 : index
    %c0_52 = arith.constant 0 : index
    %105 = vector.load %arg6[%c0_51, %c0_52] : memref<1x128xf32, #tpu.memory_space<vmem>>, vector<1x128xf32>
    %106 = vector.shape_cast %105 : vector<1x128xf32> to vector<128xf32>
    %107 = vector.shape_cast %106 : vector<128xf32> to vector<1x128xf32>
    %108 = vector.broadcast %107 : vector<1x128xf32> to vector<128x128xf32>
    %109 = arith.addf %104, %108 : vector<128x128xf32>
    %110 = arith.truncf %109 : vector<128x128xf32> to vector<128x128xbf16>
    %c0_53 = arith.constant 0 : index
    %c0_54 = arith.constant 0 : index
    %c0_55 = arith.constant 0 : index
    %111 = vector.load %arg7[%c0_53, %c0_54, %c0_55] : memref<1x128x128xbf16, #tpu.memory_space<vmem>>, vector<1x128x128xbf16>
    %112 = vector.shape_cast %111 : vector<1x128x128xbf16> to vector<128x128xbf16>
    %113 = vector.shape_cast %110 : vector<128x128xbf16> to vector<1x128x128xbf16>
    tpu.vector_store %arg7[%c0_53, %c0_54, %c0_55], %113 {strides = array<i32>} : memref<1x128x128xbf16, #tpu.memory_space<vmem>>, vector<1x128x128xbf16>,
    %cst_56 = arith.constant dense<0.000000e+00> : vector<128xf32>
    %114 = vector.multi_reduction <add>, %109, %cst_56 [0] : vector<128x128xf32> to vector<128xf32>
    %115 = vector.shape_cast %114 : vector<128xf32> to vector<1x128xf32>
    %116 = arith.mulf %109, %109 : vector<128x128xf32>
    %cst_57 = arith.constant dense<0.000000e+00> : vector<128xf32>
    %117 = vector.multi_reduction <add>, %116, %cst_57 [0] : vector<128x128xf32> to vector<128xf32>
    %118 = vector.shape_cast %117 : vector<128xf32> to vector<1x128xf32>
    %119 = tpu.concatenate %115, %118 in 0 : vector<1x128xf32>, vector<1x128xf32> -> vector<2x128xf32>
    %c0_58 = arith.constant 0 : index
    %c0_59 = arith.constant 0 : index
    %c0_60 = arith.constant 0 : index
    %c0_61 = arith.constant 0 : index
    %120 = vector.load %arg8[%c0_58, %c0_59, %c0_60, %c0_61] : memref<1x1x2x128xf32, #tpu.memory_space<vmem>>, vector<1x1x2x128xf32>
    %121 = vector.shape_cast %120 : vector<1x1x2x128xf32> to vector<2x128xf32>
    %122 = vector.shape_cast %119 : vector<2x128xf32> to vector<1x1x2x128xf32>
    tpu.vector_store %arg8[%c0_58, %c0_59, %c0_60, %c0_61], %122 {strides = array<i32>} : memref<1x1x2x128xf32, #tpu.memory_space<vmem>>, vector<1x1x2x128xf32>,
    return
  }
  func.func @transform_0(%arg0: i32, %arg1: i32) -> (i32, i32, i32) {
    %c8_i32 = arith.constant 8 : i32
    %0 = arith.muli %arg1, %c8_i32 : i32
    %c1_i32 = arith.constant 1 : i32
    %1 = arith.subi %0, %c1_i32 : i32
    %c0_i32 = arith.constant 0 : i32
    %2 = arith.maxsi %1, %c0_i32 : i32
    %c0_i32_0 = arith.constant 0 : i32
    %c0_i32_1 = arith.constant 0 : i32
    return %arg0, %2, %c0_i32_0 : i32, i32, i32
  }
  func.func @transform_1(%arg0: i32, %arg1: i32) -> (i32, i32, i32) {
    %c0_i32 = arith.constant 0 : i32
    %c0_i32_0 = arith.constant 0 : i32
    return %arg0, %arg1, %c0_i32 : i32, i32, i32
  }
  func.func @transform_2(%arg0: i32, %arg1: i32) -> (i32, i32, i32) {
    %c8_i32 = arith.constant 8 : i32
    %0 = arith.muli %arg1, %c8_i32 : i32
    %c8_i32_0 = arith.constant 8 : i32
    %1 = arith.addi %0, %c8_i32_0 : i32
    %c15_i32 = arith.constant 15 : i32
    %2 = arith.minsi %1, %c15_i32 : i32
    %c0_i32 = arith.constant 0 : i32
    %c0_i32_1 = arith.constant 0 : i32
    return %arg0, %2, %c0_i32 : i32, i32, i32
  }
  func.func @transform_3(%arg0: i32, %arg1: i32) -> (i32, i32, i32) {
    %c0_i32 = arith.constant 0 : i32
    %c0_i32_0 = arith.constant 0 : i32
    %c0_i32_1 = arith.constant 0 : i32
    %c0_i32_2 = arith.constant 0 : i32
    return %c0_i32, %c0_i32_0, %c0_i32_1 : i32, i32, i32
  }
  func.func @transform_4(%arg0: i32, %arg1: i32) -> (i32, i32) {
    %c0_i32 = arith.constant 0 : i32
    %c0_i32_0 = arith.constant 0 : i32
    %c0_i32_1 = arith.constant 0 : i32
    return %c0_i32, %c0_i32_0 : i32, i32
  }
  func.func @transform_5(%arg0: i32, %arg1: i32) -> (i32, i32, i32) {
    %c0_i32 = arith.constant 0 : i32
    %c0_i32_0 = arith.constant 0 : i32
    return %arg0, %arg1, %c0_i32 : i32, i32, i32
  }
  func.func @transform_6(%arg0: i32, %arg1: i32) -> (i32, i32, i32, i32) {
    %c0_i32 = arith.constant 0 : i32
    %c0_i32_0 = arith.constant 0 : i32
    %c0_i32_1 = arith.constant 0 : i32
    return %arg0, %arg1, %c0_i32, %c0_i32_0 : i32, i32, i32, i32
  }
}

module attributes {stable_mosaic.version = 11 : i64} {
  func.func @kernel(%arg0: i32, %arg1: i32, %arg2: memref<1x16x128xbf16, #tpu.memory_space<vmem>>, %arg3: memref<1x128x128xbf16, #tpu.memory_space<vmem>>, %arg4: memref<1x16x128xbf16, #tpu.memory_space<vmem>>, %arg5: memref<9x128x128xbf16, #tpu.memory_space<vmem>>, %arg6: memref<1x128xf32, #tpu.memory_space<vmem>>, %arg7: memref<1x128xf32, #tpu.memory_space<vmem>>, %arg8: memref<1x128xf32, #tpu.memory_space<vmem>>, %arg9: memref<1x128x128xbf16, #tpu.memory_space<vmem>>, %arg10: memref<1x1x2x128xf32, #tpu.memory_space<vmem>>) attributes {dimension_semantics = [#tpu.dimension_semantics<parallel>, #tpu.dimension_semantics<parallel>], iteration_bounds = array<i64: 2, 2>, scalar_prefetch = 0 : i64, scratch_operands = 0 : i64, tpu.core_type = #tpu.core_type<tc>, window_params = [{transform_indices = @transform_0, window_bounds = array<i64: 1, 16, 128>}, {transform_indices = @transform_1, window_bounds = array<i64: 1, 128, 128>}, {transform_indices = @transform_2, window_bounds = array<i64: 1, 16, 128>}, {pipeline_mode = #tpu.pipeline_mode<synchronous>, transform_indices = @transform_3, window_bounds = array<i64: 9, 128, 128>}, {pipeline_mode = #tpu.pipeline_mode<synchronous>, transform_indices = @transform_4, window_bounds = array<i64: 1, 128>}, {pipeline_mode = #tpu.pipeline_mode<synchronous>, transform_indices = @transform_5, window_bounds = array<i64: 1, 128>}, {pipeline_mode = #tpu.pipeline_mode<synchronous>, transform_indices = @transform_6, window_bounds = array<i64: 1, 128>}, {transform_indices = @transform_7, window_bounds = array<i64: 1, 128, 128>}, {transform_indices = @transform_8, window_bounds = array<i64: 1, 1, 2, 128>}]} {
    %c0 = arith.constant 0 : index
    %c0_0 = arith.constant 0 : index
    %c0_1 = arith.constant 0 : index
    %0 = vector.load %arg2[%c0, %c0_0, %c0_1] : memref<1x16x128xbf16, #tpu.memory_space<vmem>>, vector<1x16x128xbf16>
    %1 = vector.shape_cast %0 : vector<1x16x128xbf16> to vector<16x128xbf16>
    %2 = arith.extf %1 : vector<16x128xbf16> to vector<16x128xf32>
    %c0_2 = arith.constant 0 : index
    %c0_3 = arith.constant 0 : index
    %3 = vector.load %arg7[%c0_2, %c0_3] : memref<1x128xf32, #tpu.memory_space<vmem>>, vector<1x128xf32>
    %4 = vector.shape_cast %3 : vector<1x128xf32> to vector<128xf32>
    %5 = vector.shape_cast %4 : vector<128xf32> to vector<1x128xf32>
    %6 = vector.broadcast %5 : vector<1x128xf32> to vector<16x128xf32>
    %7 = arith.mulf %2, %6 : vector<16x128xf32>
    %c0_4 = arith.constant 0 : index
    %c0_5 = arith.constant 0 : index
    %8 = vector.load %arg8[%c0_4, %c0_5] : memref<1x128xf32, #tpu.memory_space<vmem>>, vector<1x128xf32>
    %9 = vector.shape_cast %8 : vector<1x128xf32> to vector<128xf32>
    %10 = vector.shape_cast %9 : vector<128xf32> to vector<1x128xf32>
    %11 = vector.broadcast %10 : vector<1x128xf32> to vector<16x128xf32>
    %12 = arith.addf %7, %11 : vector<16x128xf32>
    %cst = arith.constant 0.000000e+00 : f32
    %13 = vector.broadcast %cst : f32 to vector<16x128xf32>
    %14 = arith.maximumf %12, %13 : vector<16x128xf32>
    %15 = arith.truncf %14 : vector<16x128xf32> to vector<16x128xbf16>
    %c0_6 = arith.constant 0 : index
    %c0_7 = arith.constant 0 : index
    %c0_8 = arith.constant 0 : index
    %16 = vector.load %arg3[%c0_6, %c0_7, %c0_8] : memref<1x128x128xbf16, #tpu.memory_space<vmem>>, vector<1x128x128xbf16>
    %17 = vector.shape_cast %16 : vector<1x128x128xbf16> to vector<128x128xbf16>
    %18 = arith.extf %17 : vector<128x128xbf16> to vector<128x128xf32>
    %c0_9 = arith.constant 0 : index
    %c0_10 = arith.constant 0 : index
    %19 = vector.load %arg7[%c0_9, %c0_10] : memref<1x128xf32, #tpu.memory_space<vmem>>, vector<1x128xf32>
    %20 = vector.shape_cast %19 : vector<1x128xf32> to vector<128xf32>
    %21 = vector.shape_cast %20 : vector<128xf32> to vector<1x128xf32>
    %22 = vector.broadcast %21 : vector<1x128xf32> to vector<128x128xf32>
    %23 = arith.mulf %18, %22 : vector<128x128xf32>
    %c0_11 = arith.constant 0 : index
    %c0_12 = arith.constant 0 : index
    %24 = vector.load %arg8[%c0_11, %c0_12] : memref<1x128xf32, #tpu.memory_space<vmem>>, vector<1x128xf32>
    %25 = vector.shape_cast %24 : vector<1x128xf32> to vector<128xf32>
    %26 = vector.shape_cast %25 : vector<128xf32> to vector<1x128xf32>
    %27 = vector.broadcast %26 : vector<1x128xf32> to vector<128x128xf32>
    %28 = arith.addf %23, %27 : vector<128x128xf32>
    %cst_13 = arith.constant 0.000000e+00 : f32
    %29 = vector.broadcast %cst_13 : f32 to vector<128x128xf32>
    %30 = arith.maximumf %28, %29 : vector<128x128xf32>
    %31 = arith.truncf %30 : vector<128x128xf32> to vector<128x128xbf16>
    %c0_14 = arith.constant 0 : index
    %c0_15 = arith.constant 0 : index
    %c0_16 = arith.constant 0 : index
    %32 = vector.load %arg4[%c0_14, %c0_15, %c0_16] : memref<1x16x128xbf16, #tpu.memory_space<vmem>>, vector<1x16x128xbf16>
    %33 = vector.shape_cast %32 : vector<1x16x128xbf16> to vector<16x128xbf16>
    %34 = arith.extf %33 : vector<16x128xbf16> to vector<16x128xf32>
    %c0_17 = arith.constant 0 : index
    %c0_18 = arith.constant 0 : index
    %35 = vector.load %arg7[%c0_17, %c0_18] : memref<1x128xf32, #tpu.memory_space<vmem>>, vector<1x128xf32>
    %36 = vector.shape_cast %35 : vector<1x128xf32> to vector<128xf32>
    %37 = vector.shape_cast %36 : vector<128xf32> to vector<1x128xf32>
    %38 = vector.broadcast %37 : vector<1x128xf32> to vector<16x128xf32>
    %39 = arith.mulf %34, %38 : vector<16x128xf32>
    %c0_19 = arith.constant 0 : index
    %c0_20 = arith.constant 0 : index
    %40 = vector.load %arg8[%c0_19, %c0_20] : memref<1x128xf32, #tpu.memory_space<vmem>>, vector<1x128xf32>
    %41 = vector.shape_cast %40 : vector<1x128xf32> to vector<128xf32>
    %42 = vector.shape_cast %41 : vector<128xf32> to vector<1x128xf32>
    %43 = vector.broadcast %42 : vector<1x128xf32> to vector<16x128xf32>
    %44 = arith.addf %39, %43 : vector<16x128xf32>
    %cst_21 = arith.constant 0.000000e+00 : f32
    %45 = vector.broadcast %cst_21 : f32 to vector<16x128xf32>
    %46 = arith.maximumf %44, %45 : vector<16x128xf32>
    %47 = arith.truncf %46 : vector<16x128xf32> to vector<16x128xbf16>
    %c0_i32 = arith.constant 0 : i32
    %48 = arith.cmpi eq, %arg1, %c0_i32 : i32
    %cst_22 = arith.constant 0.000000e+00 : bf16
    %49 = vector.broadcast %cst_22 : bf16 to vector<16x128xbf16>
    %50 = arith.select %48, %49, %15 : vector<16x128xbf16>
    %c1_i32 = arith.constant 1 : i32
    %51 = arith.cmpi eq, %arg1, %c1_i32 : i32
    %cst_23 = arith.constant 0.000000e+00 : bf16
    %52 = vector.broadcast %cst_23 : bf16 to vector<16x128xbf16>
    %53 = arith.select %51, %52, %47 : vector<16x128xbf16>
    %cst_24 = arith.constant 0.000000e+00 : bf16
    %54 = vector.broadcast %cst_24 : bf16 to vector<8x128xbf16>
    %55 = tpu.concatenate %54, %50, %31, %53, %54 in 0 : vector<8x128xbf16>, vector<16x128xbf16>, vector<128x128xbf16>, vector<16x128xbf16>, vector<8x128xbf16> -> vector<176x128xbf16>
    %56 = tpu.iota {dimensions = array<i32: 0>} : vector<128x1xi32>
    %c16_i32 = arith.constant 16 : i32
    %c0_i32_25 = arith.constant 0 : i32
    %57 = arith.cmpi eq, %c16_i32, %c0_i32_25 : i32
    %c1_i32_26 = arith.constant 1 : i32
    %58 = arith.select %57, %c1_i32_26, %c16_i32 : i32
    %59 = vector.broadcast %58 : i32 to vector<128x1xi32>
    %60 = arith.remsi %56, %59 : vector<128x1xi32>
    %c0_i32_27 = arith.constant 0 : i32
    %61 = vector.broadcast %c0_i32_27 : i32 to vector<128x1xi32>
    %62 = arith.cmpi ne, %60, %61 : vector<128x1xi32>
    %c0_i32_28 = arith.constant 0 : i32
    %63 = vector.broadcast %c0_i32_28 : i32 to vector<128x1xi32>
    %64 = arith.cmpi slt, %60, %63 : vector<128x1xi32>
    %c0_i32_29 = arith.constant 0 : i32
    %65 = arith.cmpi slt, %58, %c0_i32_29 : i32
    %66 = vector.broadcast %65 : i1 to vector<128x1xi1>
    %67 = vector.broadcast %66 : vector<128x1xi1> to vector<128x1xi1>
    %68 = arith.xori %64, %67 : vector<128x1xi1>
    %69 = arith.andi %68, %62 : vector<128x1xi1>
    %70 = vector.broadcast %58 : i32 to vector<128x1xi32>
    %71 = arith.addi %60, %70 : vector<128x1xi32>
    %72 = arith.select %69, %71, %60 : vector<128x1xi1>, vector<128x1xi32>
    %c0_i32_30 = arith.constant 0 : i32
    %73 = vector.broadcast %c0_i32_30 : i32 to vector<128x1xi32>
    %74 = arith.cmpi eq, %72, %73 : vector<128x1xi32>
    %c15_i32 = arith.constant 15 : i32
    %75 = vector.broadcast %c15_i32 : i32 to vector<128x1xi32>
    %76 = arith.cmpi eq, %72, %75 : vector<128x1xi32>
    %cst_31 = arith.constant 0.000000e+00 : f32
    %77 = vector.broadcast %cst_31 : f32 to vector<128x128xf32>
    %78 = vector.extract_strided_slice %55 {offsets = [7, 0], sizes = [128, 128], strides = [1, 1]} : vector<176x128xbf16> to vector<128x128xbf16>
    %cst_32 = arith.constant 0.000000e+00 : bf16
    %79 = vector.shape_cast %74 : vector<128x1xi1> to vector<128x1xi1>
    %80 = vector.broadcast %79 : vector<128x1xi1> to vector<128x128xi1>
    %81 = vector.broadcast %cst_32 : bf16 to vector<128x128xbf16>
    %82 = arith.select %80, %81, %78 : vector<128x128xi1>, vector<128x128xbf16>
    %c0_33 = arith.constant 0 : index
    %c0_34 = arith.constant 0 : index
    %c0_35 = arith.constant 0 : index
    %83 = vector.load %arg5[%c0_33, %c0_34, %c0_35] : memref<9x128x128xbf16, #tpu.memory_space<vmem>>, vector<1x128x128xbf16>
    %84 = vector.shape_cast %83 : vector<1x128x128xbf16> to vector<128x128xbf16>
    %cst_36 = arith.constant dense<0.000000e+00> : vector<128x128xf32>
    %85 = tpu.matmul %82, %84, %cst_36 {dimension_numbers = #tpu.dot_dimension_numbers<[1], [0], [0], [1], [0, 0, 1, 1], [], []>} : vector<128x128xbf16>, vector<128x128xbf16>, vector<128x128xf32> -> vector<128x128xf32>
    %86 = arith.addf %77, %85 : vector<128x128xf32>
    %87 = vector.extract_strided_slice %55 {offsets = [8, 0], sizes = [128, 128], strides = [1, 1]} : vector<176x128xbf16> to vector<128x128xbf16>
    %c1 = arith.constant 1 : index
    %c0_37 = arith.constant 0 : index
    %c0_38 = arith.constant 0 : index
    %88 = vector.load %arg5[%c1, %c0_37, %c0_38] : memref<9x128x128xbf16, #tpu.memory_space<vmem>>, vector<1x128x128xbf16>
    %89 = vector.shape_cast %88 : vector<1x128x128xbf16> to vector<128x128xbf16>
    %cst_39 = arith.constant dense<0.000000e+00> : vector<128x128xf32>
    %90 = tpu.matmul %87, %89, %cst_39 {dimension_numbers = #tpu.dot_dimension_numbers<[1], [0], [0], [1], [0, 0, 1, 1], [], []>} : vector<128x128xbf16>, vector<128x128xbf16>, vector<128x128xf32> -> vector<128x128xf32>
    %91 = arith.addf %86, %90 : vector<128x128xf32>
    %92 = vector.extract_strided_slice %55 {offsets = [9, 0], sizes = [128, 128], strides = [1, 1]} : vector<176x128xbf16> to vector<128x128xbf16>
    %cst_40 = arith.constant 0.000000e+00 : bf16
    %93 = vector.shape_cast %76 : vector<128x1xi1> to vector<128x1xi1>
    %94 = vector.broadcast %93 : vector<128x1xi1> to vector<128x128xi1>
    %95 = vector.broadcast %cst_40 : bf16 to vector<128x128xbf16>
    %96 = arith.select %94, %95, %92 : vector<128x128xi1>, vector<128x128xbf16>
    %c2 = arith.constant 2 : index
    %c0_41 = arith.constant 0 : index
    %c0_42 = arith.constant 0 : index
    %97 = vector.load %arg5[%c2, %c0_41, %c0_42] : memref<9x128x128xbf16, #tpu.memory_space<vmem>>, vector<1x128x128xbf16>
    %98 = vector.shape_cast %97 : vector<1x128x128xbf16> to vector<128x128xbf16>
    %cst_43 = arith.constant dense<0.000000e+00> : vector<128x128xf32>
    %99 = tpu.matmul %96, %98, %cst_43 {dimension_numbers = #tpu.dot_dimension_numbers<[1], [0], [0], [1], [0, 0, 1, 1], [], []>} : vector<128x128xbf16>, vector<128x128xbf16>, vector<128x128xf32> -> vector<128x128xf32>
    %100 = arith.addf %91, %99 : vector<128x128xf32>
    %101 = vector.extract_strided_slice %55 {offsets = [23, 0], sizes = [128, 128], strides = [1, 1]} : vector<176x128xbf16> to vector<128x128xbf16>
    %cst_44 = arith.constant 0.000000e+00 : bf16
    %102 = vector.shape_cast %74 : vector<128x1xi1> to vector<128x1xi1>
    %103 = vector.broadcast %102 : vector<128x1xi1> to vector<128x128xi1>
    %104 = vector.broadcast %cst_44 : bf16 to vector<128x128xbf16>
    %105 = arith.select %103, %104, %101 : vector<128x128xi1>, vector<128x128xbf16>
    %c3 = arith.constant 3 : index
    %c0_45 = arith.constant 0 : index
    %c0_46 = arith.constant 0 : index
    %106 = vector.load %arg5[%c3, %c0_45, %c0_46] : memref<9x128x128xbf16, #tpu.memory_space<vmem>>, vector<1x128x128xbf16>
    %107 = vector.shape_cast %106 : vector<1x128x128xbf16> to vector<128x128xbf16>
    %cst_47 = arith.constant dense<0.000000e+00> : vector<128x128xf32>
    %108 = tpu.matmul %105, %107, %cst_47 {dimension_numbers = #tpu.dot_dimension_numbers<[1], [0], [0], [1], [0, 0, 1, 1], [], []>} : vector<128x128xbf16>, vector<128x128xbf16>, vector<128x128xf32> -> vector<128x128xf32>
    %109 = arith.addf %100, %108 : vector<128x128xf32>
    %110 = vector.extract_strided_slice %55 {offsets = [24, 0], sizes = [128, 128], strides = [1, 1]} : vector<176x128xbf16> to vector<128x128xbf16>
    %c4 = arith.constant 4 : index
    %c0_48 = arith.constant 0 : index
    %c0_49 = arith.constant 0 : index
    %111 = vector.load %arg5[%c4, %c0_48, %c0_49] : memref<9x128x128xbf16, #tpu.memory_space<vmem>>, vector<1x128x128xbf16>
    %112 = vector.shape_cast %111 : vector<1x128x128xbf16> to vector<128x128xbf16>
    %cst_50 = arith.constant dense<0.000000e+00> : vector<128x128xf32>
    %113 = tpu.matmul %110, %112, %cst_50 {dimension_numbers = #tpu.dot_dimension_numbers<[1], [0], [0], [1], [0, 0, 1, 1], [], []>} : vector<128x128xbf16>, vector<128x128xbf16>, vector<128x128xf32> -> vector<128x128xf32>
    %114 = arith.addf %109, %113 : vector<128x128xf32>
    %115 = vector.extract_strided_slice %55 {offsets = [25, 0], sizes = [128, 128], strides = [1, 1]} : vector<176x128xbf16> to vector<128x128xbf16>
    %cst_51 = arith.constant 0.000000e+00 : bf16
    %116 = vector.shape_cast %76 : vector<128x1xi1> to vector<128x1xi1>
    %117 = vector.broadcast %116 : vector<128x1xi1> to vector<128x128xi1>
    %118 = vector.broadcast %cst_51 : bf16 to vector<128x128xbf16>
    %119 = arith.select %117, %118, %115 : vector<128x128xi1>, vector<128x128xbf16>
    %c5 = arith.constant 5 : index
    %c0_52 = arith.constant 0 : index
    %c0_53 = arith.constant 0 : index
    %120 = vector.load %arg5[%c5, %c0_52, %c0_53] : memref<9x128x128xbf16, #tpu.memory_space<vmem>>, vector<1x128x128xbf16>
    %121 = vector.shape_cast %120 : vector<1x128x128xbf16> to vector<128x128xbf16>
    %cst_54 = arith.constant dense<0.000000e+00> : vector<128x128xf32>
    %122 = tpu.matmul %119, %121, %cst_54 {dimension_numbers = #tpu.dot_dimension_numbers<[1], [0], [0], [1], [0, 0, 1, 1], [], []>} : vector<128x128xbf16>, vector<128x128xbf16>, vector<128x128xf32> -> vector<128x128xf32>
    %123 = arith.addf %114, %122 : vector<128x128xf32>
    %124 = vector.extract_strided_slice %55 {offsets = [39, 0], sizes = [128, 128], strides = [1, 1]} : vector<176x128xbf16> to vector<128x128xbf16>
    %cst_55 = arith.constant 0.000000e+00 : bf16
    %125 = vector.shape_cast %74 : vector<128x1xi1> to vector<128x1xi1>
    %126 = vector.broadcast %125 : vector<128x1xi1> to vector<128x128xi1>
    %127 = vector.broadcast %cst_55 : bf16 to vector<128x128xbf16>
    %128 = arith.select %126, %127, %124 : vector<128x128xi1>, vector<128x128xbf16>
    %c6 = arith.constant 6 : index
    %c0_56 = arith.constant 0 : index
    %c0_57 = arith.constant 0 : index
    %129 = vector.load %arg5[%c6, %c0_56, %c0_57] : memref<9x128x128xbf16, #tpu.memory_space<vmem>>, vector<1x128x128xbf16>
    %130 = vector.shape_cast %129 : vector<1x128x128xbf16> to vector<128x128xbf16>
    %cst_58 = arith.constant dense<0.000000e+00> : vector<128x128xf32>
    %131 = tpu.matmul %128, %130, %cst_58 {dimension_numbers = #tpu.dot_dimension_numbers<[1], [0], [0], [1], [0, 0, 1, 1], [], []>} : vector<128x128xbf16>, vector<128x128xbf16>, vector<128x128xf32> -> vector<128x128xf32>
    %132 = arith.addf %123, %131 : vector<128x128xf32>
    %133 = vector.extract_strided_slice %55 {offsets = [40, 0], sizes = [128, 128], strides = [1, 1]} : vector<176x128xbf16> to vector<128x128xbf16>
    %c7 = arith.constant 7 : index
    %c0_59 = arith.constant 0 : index
    %c0_60 = arith.constant 0 : index
    %134 = vector.load %arg5[%c7, %c0_59, %c0_60] : memref<9x128x128xbf16, #tpu.memory_space<vmem>>, vector<1x128x128xbf16>
    %135 = vector.shape_cast %134 : vector<1x128x128xbf16> to vector<128x128xbf16>
    %cst_61 = arith.constant dense<0.000000e+00> : vector<128x128xf32>
    %136 = tpu.matmul %133, %135, %cst_61 {dimension_numbers = #tpu.dot_dimension_numbers<[1], [0], [0], [1], [0, 0, 1, 1], [], []>} : vector<128x128xbf16>, vector<128x128xbf16>, vector<128x128xf32> -> vector<128x128xf32>
    %137 = arith.addf %132, %136 : vector<128x128xf32>
    %138 = vector.extract_strided_slice %55 {offsets = [41, 0], sizes = [128, 128], strides = [1, 1]} : vector<176x128xbf16> to vector<128x128xbf16>
    %cst_62 = arith.constant 0.000000e+00 : bf16
    %139 = vector.shape_cast %76 : vector<128x1xi1> to vector<128x1xi1>
    %140 = vector.broadcast %139 : vector<128x1xi1> to vector<128x128xi1>
    %141 = vector.broadcast %cst_62 : bf16 to vector<128x128xbf16>
    %142 = arith.select %140, %141, %138 : vector<128x128xi1>, vector<128x128xbf16>
    %c8 = arith.constant 8 : index
    %c0_63 = arith.constant 0 : index
    %c0_64 = arith.constant 0 : index
    %143 = vector.load %arg5[%c8, %c0_63, %c0_64] : memref<9x128x128xbf16, #tpu.memory_space<vmem>>, vector<1x128x128xbf16>
    %144 = vector.shape_cast %143 : vector<1x128x128xbf16> to vector<128x128xbf16>
    %cst_65 = arith.constant dense<0.000000e+00> : vector<128x128xf32>
    %145 = tpu.matmul %142, %144, %cst_65 {dimension_numbers = #tpu.dot_dimension_numbers<[1], [0], [0], [1], [0, 0, 1, 1], [], []>} : vector<128x128xbf16>, vector<128x128xbf16>, vector<128x128xf32> -> vector<128x128xf32>
    %146 = arith.addf %137, %145 : vector<128x128xf32>
    %c0_66 = arith.constant 0 : index
    %c0_67 = arith.constant 0 : index
    %147 = vector.load %arg6[%c0_66, %c0_67] : memref<1x128xf32, #tpu.memory_space<vmem>>, vector<1x128xf32>
    %148 = vector.shape_cast %147 : vector<1x128xf32> to vector<128xf32>
    %149 = vector.shape_cast %148 : vector<128xf32> to vector<1x128xf32>
    %150 = vector.broadcast %149 : vector<1x128xf32> to vector<128x128xf32>
    %151 = arith.addf %146, %150 : vector<128x128xf32>
    %152 = arith.truncf %151 : vector<128x128xf32> to vector<128x128xbf16>
    %c0_68 = arith.constant 0 : index
    %c0_69 = arith.constant 0 : index
    %c0_70 = arith.constant 0 : index
    %153 = vector.load %arg9[%c0_68, %c0_69, %c0_70] : memref<1x128x128xbf16, #tpu.memory_space<vmem>>, vector<1x128x128xbf16>
    %154 = vector.shape_cast %153 : vector<1x128x128xbf16> to vector<128x128xbf16>
    %155 = vector.shape_cast %152 : vector<128x128xbf16> to vector<1x128x128xbf16>
    tpu.vector_store %arg9[%c0_68, %c0_69, %c0_70], %155 {strides = array<i32>} : memref<1x128x128xbf16, #tpu.memory_space<vmem>>, vector<1x128x128xbf16>,
    %cst_71 = arith.constant dense<0.000000e+00> : vector<128xf32>
    %156 = vector.multi_reduction <add>, %151, %cst_71 [0] : vector<128x128xf32> to vector<128xf32>
    %157 = vector.shape_cast %156 : vector<128xf32> to vector<1x128xf32>
    %158 = arith.mulf %151, %151 : vector<128x128xf32>
    %cst_72 = arith.constant dense<0.000000e+00> : vector<128xf32>
    %159 = vector.multi_reduction <add>, %158, %cst_72 [0] : vector<128x128xf32> to vector<128xf32>
    %160 = vector.shape_cast %159 : vector<128xf32> to vector<1x128xf32>
    %161 = tpu.concatenate %157, %160 in 0 : vector<1x128xf32>, vector<1x128xf32> -> vector<2x128xf32>
    %c0_73 = arith.constant 0 : index
    %c0_74 = arith.constant 0 : index
    %c0_75 = arith.constant 0 : index
    %c0_76 = arith.constant 0 : index
    %162 = vector.load %arg10[%c0_73, %c0_74, %c0_75, %c0_76] : memref<1x1x2x128xf32, #tpu.memory_space<vmem>>, vector<1x1x2x128xf32>
    %163 = vector.shape_cast %162 : vector<1x1x2x128xf32> to vector<2x128xf32>
    %164 = vector.shape_cast %161 : vector<2x128xf32> to vector<1x1x2x128xf32>
    tpu.vector_store %arg10[%c0_73, %c0_74, %c0_75, %c0_76], %164 {strides = array<i32>} : memref<1x1x2x128xf32, #tpu.memory_space<vmem>>, vector<1x1x2x128xf32>,
    return
  }
  func.func @transform_0(%arg0: i32, %arg1: i32) -> (i32, i32, i32) {
    %c8_i32 = arith.constant 8 : i32
    %0 = arith.muli %arg1, %c8_i32 : i32
    %c1_i32 = arith.constant 1 : i32
    %1 = arith.subi %0, %c1_i32 : i32
    %c0_i32 = arith.constant 0 : i32
    %2 = arith.maxsi %1, %c0_i32 : i32
    %c0_i32_0 = arith.constant 0 : i32
    %c0_i32_1 = arith.constant 0 : i32
    return %arg0, %2, %c0_i32_0 : i32, i32, i32
  }
  func.func @transform_1(%arg0: i32, %arg1: i32) -> (i32, i32, i32) {
    %c0_i32 = arith.constant 0 : i32
    %c0_i32_0 = arith.constant 0 : i32
    return %arg0, %arg1, %c0_i32 : i32, i32, i32
  }
  func.func @transform_2(%arg0: i32, %arg1: i32) -> (i32, i32, i32) {
    %c8_i32 = arith.constant 8 : i32
    %0 = arith.muli %arg1, %c8_i32 : i32
    %c8_i32_0 = arith.constant 8 : i32
    %1 = arith.addi %0, %c8_i32_0 : i32
    %c15_i32 = arith.constant 15 : i32
    %2 = arith.minsi %1, %c15_i32 : i32
    %c0_i32 = arith.constant 0 : i32
    %c0_i32_1 = arith.constant 0 : i32
    return %arg0, %2, %c0_i32 : i32, i32, i32
  }
  func.func @transform_3(%arg0: i32, %arg1: i32) -> (i32, i32, i32) {
    %c0_i32 = arith.constant 0 : i32
    %c0_i32_0 = arith.constant 0 : i32
    %c0_i32_1 = arith.constant 0 : i32
    %c0_i32_2 = arith.constant 0 : i32
    return %c0_i32, %c0_i32_0, %c0_i32_1 : i32, i32, i32
  }
  func.func @transform_4(%arg0: i32, %arg1: i32) -> (i32, i32) {
    %c0_i32 = arith.constant 0 : i32
    %c0_i32_0 = arith.constant 0 : i32
    %c0_i32_1 = arith.constant 0 : i32
    return %c0_i32, %c0_i32_0 : i32, i32
  }
  func.func @transform_5(%arg0: i32, %arg1: i32) -> (i32, i32) {
    %c0_i32 = arith.constant 0 : i32
    %c0_i32_0 = arith.constant 0 : i32
    %c0_i32_1 = arith.constant 0 : i32
    return %c0_i32, %c0_i32_0 : i32, i32
  }
  func.func @transform_6(%arg0: i32, %arg1: i32) -> (i32, i32) {
    %c0_i32 = arith.constant 0 : i32
    %c0_i32_0 = arith.constant 0 : i32
    %c0_i32_1 = arith.constant 0 : i32
    return %c0_i32, %c0_i32_0 : i32, i32
  }
  func.func @transform_7(%arg0: i32, %arg1: i32) -> (i32, i32, i32) {
    %c0_i32 = arith.constant 0 : i32
    %c0_i32_0 = arith.constant 0 : i32
    return %arg0, %arg1, %c0_i32 : i32, i32, i32
  }
  func.func @transform_8(%arg0: i32, %arg1: i32) -> (i32, i32, i32, i32) {
    %c0_i32 = arith.constant 0 : i32
    %c0_i32_0 = arith.constant 0 : i32
    %c0_i32_1 = arith.constant 0 : i32
    return %arg0, %arg1, %c0_i32, %c0_i32_0 : i32, i32, i32, i32
  }
}

</mosaic_0001>

<bundles_post_ra>
// kernel: double_conv.2
= control target key start
LH: loop header
LB: loop body
LE: loop exit
PB: predicated region body
PF: predicated region fallthrough
CT: control target
= control target key end

     0   :  { %s3840_s21 = smov 0   ;;  %s3842_s22 = smov 0   ;;  %s4937_s0 = inlined_call_operand.vmem [shape: bf16[2,256,8], index: 0, kind: input, shape index: {}, may-alias: {0,1,2}]   ;;  %s4938_s1 = inlined_call_operand.vmem [shape: bf16[2,256,8], index: 1, kind: input, shape index: {}, may-alias: {0,1,2}]   ;;  %s4939_s2 = inlined_call_operand.vmem [shape: bf16[2,256,8], index: 2, kind: input, shape index: {}, may-alias: {0,1,2}]   ;;  %s4940_s3 = inlined_call_operand.vmem [shape: bf16[9,8,128], index: 3, kind: input, shape index: {}]   ;;  %s4941_s4 = inlined_call_operand.vmem [shape: f32[1,128], index: 4, kind: input, shape index: {}]   ;;  %s4942_s5 = inlined_call_operand.vmem [shape: bf16[2,256,128], index: 5, kind: output, shape index: {0}]   ;;  %s4943_s6 = inlined_call_operand.vmem [shape: f32[2,2,2,128], index: 6, kind: output, shape index: {1}]  }
   0x1   :  { %s3844_s23 = smov 0   ;;  %s3846_s24 = smov 0  }
   0x2   :  { %s3848_s25 = smov 0  }
   0x3 LB: > { %s26_s26 = sadd.s32 1, %s3793_s23  ;;  %s29_s27 = sadd.s32 1, %s3797_s24  ;;  %s3801_s25 = sphi %s3848_s25, %s17_s25   ;;  %s3797_s24 = sphi %s3846_s24, %s5037_s24   ;;  %s3793_s23 = sphi %s3844_s23, %s5036_s23   ;;  %s3789_s22 = sphi %s3842_s22, %s5035_s22   ;;  %s3785_s21 = sphi %s3840_s21, %s5034_s21  }
   0x4   : > { %p27_p0 = scmp.ge.s32.totalorder %s26_s26, 2  ;;  %p3241_p1 = scmp.ge.s32.totalorder %s3801_s25, 1 }
   0x5   : > { %p304_p2 = scmp.lt.s32.totalorder %s3801_s25, 5 }
   0x6   : > { %s5039_s26 = smov (%p27_p0, %s26_s26), 0  ;;  %s5041_s27 = smov (!%p27_p0, %s29_s27), %s3797_s24 }
   0x7   : > { %p305_p3 = pnand %p3241_p1, %p304_p2  ;;  %p31_p4 = scmp.ge.s32.totalorder %s5041_s27, 2 }
   0x9   : > { %s5043_s27 = smov (%p31_p4, %s5041_s27), 0  ;;  %308 = sbr.rel (%p305_p3) target bundleno = 439 (0x1b7), region = 40 }
   0xe   : > { %vm535_vm0 = vcmask 1043456   ;;  %v3280_v0 = vld [vmem:[%s4940_s3 + $0x4] sm:$0xf]  ;;  %p381_p5 = scmp.lt.s32.totalorder %s3789_s22, 1  ;;  %s3247_s30 = sshll.u32 %s3785_s21, 4  ;;  %v551_v1 = vlaneseq  ;;  %vm3803_vm1 = vmmov 0  }
   0xf   : > { %3696 = vmatprep.subr.msk.bf16.mxu1 %vm535_vm0, %v3280_v0  ;;  %v1019_v2 = vsel %vm535_vm0, %v3280_v0, 0  ;;  %p397_p6 = scmp.lt.s32.totalorder %s3247_s30, 31  ;;  %3695 = vmatprep.subr.msk.bf16.mxu0 %vm535_vm0, %v3280_v0  ;;  %v970_v3 = vld [vmem:[%s4940_s3] sm:$0xf]  ;;  %s3242_s9 = sshll.u32 %s3785_s21, 3  ;;  %vm3891_vm2 = vmpackc.low %vm3803_vm1, %vm3803_vm1  ;;  %vm993_vm3 = vcmask 64512  }
  0x10   : > { %3694 = vmatpush3.bf16.msra.mxu1 %v1019_v2  ;;  %s5045_s22 = smov (!%p381_p5, %s3789_s22), 1  ;;  %3532 = vmatpush3.bf16.msra.mxu0 %v1019_v2  ;;  %v3885_v4 = vshrl.u32 %v551_v1, 7  ;;  %v3305_v5 = vld [vmem:[%s4940_s3 + $0x8] sm:$0xf]  ;;  %s3243_s13 = sadd.s32 4294967295, %s3242_s9  ;;  %v1224_v10 = vsel %vm535_vm0, %v970_v3, 0 }
  0x11   : > { %s5047_s30 = smov (!%p397_p6, %s3247_s30), 31  ;;  %3697 = vmatprep.subr.msk.bf16.mxu1 %vm535_vm0, %v970_v3  ;;  %3698 = vmatprep.subr.msk.bf16.mxu0 %vm535_vm0, %v3305_v5  ;;  %s3897_s12 = sshll.u32 %s5045_s22, 5  ;;  %v3804_v13 = vmov 0   ;;  %v3927_v15 = vsel %vm535_vm0, %v3305_v5, 0  ;;  %v3314_v28 = vld [vmem:[%s4940_s3 + $0xc] sm:$0xf] }
  0x12   : > { %v553_v7 = vadd.s32 8, %v3885_v4  ;;  %v572_v8 = vand.u32 15, %v3885_v4  ;;  %v3902_v9 = vadd.s32 16, %v3885_v4  ;;  %s400_s14 = sadd.s32 %s3897_s12, %s5047_s30  ;;  %p378_p7 = scmp.gt.s32.totalorder %s3243_s13, 0  ;;  %v3915_v14 = vsel %vm3891_vm2, 65537, %v3804_v13 }
  0x13   : > { %s3905_s15 = sshll.u32 %s400_s14, 2  ;;  %s405_s16 = sadd.s32 8, %s3242_s9  ;;  %v3931_v17 = vadd.s32 32, %v3885_v4  ;;  %v3934_v18 = vadd.s32 48, %v3885_v4  ;;  %v555_v45 = vadd.s32 24, %v3885_v4  ;;  %v4016_v53 = vsel %vm535_vm0, %v3314_v28, 0 }
  0x14   : > { %v579_v11 = vand.u32 15, %v553_v7  ;;  %vm3908_vm4 = vcmp.eq.s32.totalorder %v572_v8, 0  ;;  %s3921_s19 = scalar_lea.vmem %s4938_s1, %s3905_s15  ;;  %p406_p8 = scmp.lt.s32.totalorder %s405_s16, 15  ;;  %v586_v16 = vand.u32 15, %v3902_v9  ;;  %vm880_vm10 = vsmask.f32 3328 }
  0x15   : > { %vm824_vm5 = vmpackc.low %vm3908_vm4, %vm3908_vm4  ;;  %v3937_v19 = vld [vmem:[%s3921_s19 + $0x14] sm:$0xff]   ;;  %v3940_v20 = vld [vmem:[%s3921_s19 + $0x1c] sm:$0xff]   ;;  %s5049_s13 = smov (!%p378_p7, %s3243_s13), 0  ;;  %p463_p9 = scmp.eq.s32.totalorder %s3785_s21, 0  ;;  %v600_v27 = vand.u32 15, %v3931_v17  ;;  %v614_v29 = vand.u32 15, %v3934_v18 }
  0x16   : > { %vm3943_vm6 = vcmp.eq.s32.totalorder %v579_v11, 15  ;;  %v3948_v22 = vld [vmem:[%s3921_s19 + $0x24] sm:$0xff]   ;;  %s5051_s16 = smov (!%p406_p8, %s405_s16), 15  ;;  %v983_v23 = vrot.slane %v3937_v19, 4  ;;  %v985_v24 = vrot.slane %v3940_v20, 4  ;;  %s3244_s20 = sshll.u32 %s5049_s13, 1 }
  0x17   : > { %vm1356_vm7 = vmpackc.low %vm3943_vm6, %vm3943_vm6  ;;  %v987_v25 = vrot.slane %v3948_v22, 4  ;;  %p383_p10 = scmp.lt.s32.totalorder %s3244_s20, 31  ;;  %s3251_s28 = sshll.u32 %s5051_s16, 1  ;;  %v840_v26 = vsel %vm824_vm5, 65537, %v3804_v13  ;;  %v3982_v35 = vld [vmem:[%s3921_s19 + $0x2c] sm:$0xff]   ;;  %v3989_v38 = vld [vmem:[%s3921_s19 + $0x4] sm:$0xff]  }
  0x18   : > { %v3971_v30 = vsel %vm535_vm0, %v983_v23, %v985_v24  ;;  %p411_p11 = scmp.lt.s32.totalorder %s3251_s28, 31  ;;  %v3272_v31 = vcombine.low %v840_v26, %v3915_v14  ;;  %v1372_v32 = vsel %vm1356_vm7, 65537, %v3804_v13  ;;  %v989_v41 = vrot.slane %v3982_v35, 4  ;;  %v3994_v42 = vld [vmem:[%s3921_s19 + $0x34] sm:$0xff]   ;;  %v4013_v52 = vld [vmem:[%s3921_s19 + $0xc] sm:$0xff]   ;;  %p469_p12 = scmp.eq.s32.totalorder %s3785_s21, 1 }
  0x19   : > { %3541 = vmatprep.mubr.msk.bf16.mxu1 %vm993_vm3, %v3971_v30  ;;  %v3978_v33 = vsel %vm535_vm0, %v985_v24, %v987_v25  ;;  %s5053_s20 = smov (!%p383_p10, %s3244_s20), 31  ;;  %v3297_v34 = vcombine.low %v3915_v14, %v1372_v32  ;;  %v991_v49 = vrot.slane %v3994_v42, 4  ;;  %v979_v51 = vrot.slane %v3989_v38, 4  ;;  %v3750_v1 = vld [vmem:[%s3921_s19] ss:$0 sps:$4 sm:$0xff]   ;;  %p434_p13 = scmp.lt.s32.totalorder %s3785_s21, 1 }
  0x1a   : > { %3542 = vmatmul.mubr.msk.bf16.vlgmr.msra.gmra.mxu1 %vm993_vm3, %v3978_v33  ;;  %s5055_s28 = smov (!%p411_p11, %s3251_s28), 31  ;;  %v882_v36 = vshrl.u32 %v3272_v31, 16  ;;  %v885_v37 = vshll.u32 %v3272_v31, 16  ;;  %s386_s7 = sadd.s32 %s3897_s12, %s5053_s20  ;;  %v4004_v48 = vsel %vm535_vm0, %v987_v25, %v989_v41  ;;  %vm762_vm8 = vcmp.eq.s32.totalorder %v586_v16, 0 }
  0x1b   : > { %3550 = vmatpush3.bf16.msra.mxu1 %v1224_v10  ;;  %v1412_v39 = vshrl.u32 %v3297_v34, 16  ;;  %v1415_v40 = vshll.u32 %v3297_v34, 16  ;;  %s3246_s8 = sshll.u32 %s386_s7, 2  ;;  %s414_s9 = sadd.s32 %s3897_s12, %s5055_s28  ;;  %3545 = vmatprep.mubr.msk.bf16.mxu1 %vm993_vm3, %v4004_v48  ;;  %v4025_v56 = vsel %vm535_vm0, %v989_v41, %v991_v49  ;;  %vm826_vm9 = vmpackc.low %vm762_vm8, %vm762_vm8  ;;  %vm764_vm11 = vcmp.eq.s32.totalorder %v600_v27, 0 }
  0x1c   : > { %v884_v43 = vrot.slane %v882_v36, 4  ;;  %v887_v44 = vrot.slane %v885_v37, 5  ;;  %3699 = vmatprep.subr.msk.bf16.mxu1 %vm535_vm0, %v3314_v28  ;;  %s388_s13 = scalar_lea.vmem %s4937_s0, %s3246_s8  ;;  %vm4027_vm12 = vcmp.eq.s32.totalorder %v614_v29, 0  ;;  %v981_v59 = vrot.slane %v4013_v52, 4  ;;  %vm828_vm14 = vmpackc.low %vm764_vm11, %vm764_vm11  ;;  %s3253_s7 = sshll.u32 %s414_s9, 2 }
  0x1d   : > { %v1414_v46 = vrot.slane %v1412_v39, 3  ;;  %v1417_v47 = vrot.slane %v1415_v40, 4  ;;  %v443_v54 = vld [vmem:[%s388_s13] sm:$0xf]  ;;  %s464_s14 = scalar_select %p463_p9, 1, 0  ;;  %vm830_vm2 = vmpackc.low %vm4027_vm12, %vm4027_vm12 }
  0x1e   : > { %v4007_v50 = vor.u32 %v887_v44, %v884_v43  ;;  %v444_v58 = vld [vmem:[%s388_s13 + $0x4] sm:$0xf]  ;;  %v842_v60 = vsel %vm826_vm9, 65537, %v3804_v13  ;;  %v593_v61 = vand.u32 15, %v555_v45  ;;  %v844_v0 = vsel %vm828_vm14, 65537, %v3804_v13  ;;  %s4379_s8 = scalar_lea.vmem %s4939_s2, %s3253_s7  ;;  %s4873_s20 = scalar_lea.vmem %s4942_s5, %s3905_s15 }
  0x1f   : > { %v4020_v55 = vor.u32 %v1417_v47, %v1414_v46  ;;  %v465_v62 = vstv %s464_s14  ;;  %v3273_v63 = vcombine.low %v842_v60, %v3915_v14  ;;  %v4041_v2 = vsel %vm535_vm0, %v979_v51, %v981_v59  ;;  %s470_s11 = scalar_select %p469_p12, 1, 0 }
  0x20   : > { %vm4946_vm13 = vcmp.ne.s16.totalorder %v4007_v50, 0  ;;  %vm466_vm1 = vcmp.eq.s32.totalorder %v465_v62, 1  ;;  %v4046_v3 = vsel %vm535_vm0, %v981_v59, %v983_v23  ;;  %v3274_v5 = vcombine.low %v844_v0, %v3915_v14  ;;  %s5057_s21 = smov (!%p434_p13, %s3785_s21), 1  ;;  %s3257_s15 = sshll.u32 %s5045_s22, 1 }
  0x21   : > { %vm4952_vm15 = vcmp.ne.s16.totalorder %v4020_v55, 0  ;;  %v467_v6 = vsel %vm466_vm1, 0, %v443_v54  ;;  %v468_v7 = vsel %vm466_vm1, 0, %v444_v58  ;;  %v890_v8 = vshrl.u32 %v3273_v63, 16  ;;  %s437_s29 = sadd.s32 %s3257_s15, %s5057_s21 }
  0x22   : > { %3546 = vmatmul.mubr.msk.bf16.gmra.mxu1 %vm993_vm3, %v4025_v56  ;;  %v893_v9 = vshll.u32 %v3273_v63, 16  ;;  %v3259_v10 = vcombine.low %v467_v6, %v467_v6  ;;  %v3260_v11 = vcombine.low %v468_v7, %v468_v7  ;;  %v899_v12 = vshrl.u32 %v3274_v5, 16  ;;  %s3258_s30 = sshll.u32 %s437_s29, 1 }
  0x23   : > { %v902_v16 = vshll.u32 %v3274_v5, 16  ;;  %v892_v17 = vrot.slane %v890_v8, 4  ;;  %v846_v21 = vsel %vm830_vm2, 65537, %v3804_v13  ;;  %vm4053_vm4 = vcmp.eq.s32.totalorder %v593_v61, 15  ;;  %s439_s28 = scalar_lea.vmem %s4943_s6, %s3258_s30 }
  0x24   : > { %v895_v18 = vrot.slane %v893_v9, 5  ;;  %v538_v24 = vsel %vm535_vm0, 0, %v3259_v10  ;;  %v4059_v25 = vsel %vm535_vm0, %v3260_v11, %v3750_v1  ;;  %v901_v26 = vrot.slane %v899_v12, 4  ;;  %vm1358_vm5 = vmpackc.low %vm4053_vm4, %vm4053_vm4 }
  0x25   : > { %v904_v27 = vrot.slane %v902_v16, 5  ;;  %v961_v28 = vsel %vm4946_vm13, 0, %v538_v24  ;;  %v976_v29 = vrot.slane %v538_v24, 4  ;;  %v977_v31 = vrot.slane %v4059_v25, 4 }
  0x26   : > { %v1491_v32 = vsel %vm4952_vm15, 0, %v538_v24  ;;  %v896_v34 = vor.u32 %v895_v18, %v892_v17  ;;  %vm1118_vm6 = vsmask.f32 4352  ;;  %v1120_v36 = vshrl.u32 %v961_v28, 16 }
  0x27   : > { %v1123_v37 = vshll.u32 %v961_v28, 16  ;;  %v905_v39 = vor.u32 %v904_v27, %v901_v26  ;;  %v978_v40 = vsel %vm535_vm0, %v976_v29, %v977_v31  ;;  %v4071_v41 = vsel %vm535_vm0, %v977_v31, %v979_v51  ;;  %v3323_v51 = vld [vmem:[%s4940_s3 + $0x10] sm:$0xf] }
  0x28   : > { %v3275_v43 = vcombine.low %v846_v21, %v3915_v14  ;;  %v1374_v44 = vsel %vm1358_vm5, 65537, %v3804_v13  ;;  %3533 = vmatprep.mubr.msk.bf16.mxu0 %vm993_vm3, %v978_v40  ;;  %v4078_v45 = vsel %vm880_vm10, %v4007_v50, %v896_v34  ;;  %v1122_v46 = vrot.slane %v1120_v36, 3 }
  0x29   : > { %v1125_v47 = vrot.slane %v1123_v37, 4  ;;  %v4081_v54 = vsel %vm880_vm10, %v896_v34, %v905_v39  ;;  %3534 = vmatmul.mubr.msk.bf16.vlgmr.msra.gmra.mxu0 %vm993_vm3, %v4071_v41  ;;  %vm953_vm7 = vcmp.ne.s16.totalorder %v4078_v45, 0  ;;  %v3298_v62 = vcombine.low %v3915_v14, %v1374_v44 }
  0x2a   : > { %vm954_vm8 = vcmp.ne.s16.totalorder %v4081_v54, 0  ;;  %v908_v57 = vshrl.u32 %v3275_v43, 16  ;;  %v911_v58 = vshll.u32 %v3275_v43, 16  ;;  %3568 = vmatpush3.bf16.msra.mxu0 %v3927_v15  ;;  %3537 = vmatprep.mubr.msk.bf16.mxu0 %vm993_vm3, %v4041_v2  ;;  %v962_v59 = vsel %vm953_vm7, 0, %v4059_v25 }
  0x2b   : > { %v1126_v60 = vor.u32 %v1125_v47, %v1122_v46  ;;  %v963_v61 = vsel %vm954_vm8, 0, %v3989_v38  ;;  %v1128_v63 = vshrl.u32 %v962_v59, 16  ;;  %v1131_v0 = vshll.u32 %v962_v59, 16  ;;  %3700 = vmatprep.subr.msk.bf16.mxu0 %vm535_vm0, %v3323_v51  ;;  %v4128_v46 = vld [vmem:[%s4940_s3 + $0x14] sm:$0xf] }
  0x2c   : > { %v1137_v1 = vshrl.u32 %v963_v61, 16  ;;  %v1140_v5 = vshll.u32 %v963_v61, 16  ;;  %v910_v15 = vrot.slane %v908_v57, 4  ;;  %v913_v6 = vrot.slane %v911_v58, 5 }
  0x2d   : > { %v1420_v7 = vshrl.u32 %v3298_v62, 16  ;;  %v1423_v8 = vshll.u32 %v3298_v62, 16  ;;  %v1130_v9 = vrot.slane %v1128_v63, 3  ;;  %v1133_v10 = vrot.slane %v1131_v0, 4 }
  0x2e   : > { %v1139_v11 = vrot.slane %v1137_v1, 3  ;;  %v1142_v12 = vrot.slane %v1140_v5, 4  ;;  %v4101_v16 = vor.u32 %v913_v6, %v910_v15  ;;  %v1503_v21 = vshrl.u32 %v1491_v32, 16 }
  0x2f   : > { %v1422_v17 = vrot.slane %v1420_v7, 3  ;;  %v1425_v18 = vrot.slane %v1423_v8, 4  ;;  %v1134_v23 = vor.u32 %v1133_v10, %v1130_v9  ;;  %v1506_v26 = vshll.u32 %v1491_v32, 16 }
  0x30   : > { %v1143_v24 = vor.u32 %v1142_v12, %v1139_v11  ;;  %v560_v27 = vadd.s32 64, %v3885_v4  ;;  %v4106_v28 = vsel %vm880_vm10, %v905_v39, %v4101_v16  ;;  %v1505_v31 = vrot.slane %v1503_v21, 4 }
  0x31   : > { %v4108_v29 = vor.u32 %v1425_v18, %v1422_v17  ;;  %v557_v34 = vadd.s32 40, %v3885_v4  ;;  %v1135_v36 = vsel %vm1118_vm6, %v1126_v60, %v1134_v23  ;;  %3538 = vmatmul.mubr.msk.bf16.gmra.mxu0 %vm993_vm3, %v4046_v3  ;;  %vm955_vm9 = vcmp.ne.s16.totalorder %v4106_v28, 0 }
  0x32   : > { %v1144_v37 = vsel %vm1118_vm6, %v1134_v23, %v1143_v24  ;;  %v1508_v32 = vrot.slane %v1506_v26, 5  ;;  %3551 = vmatprep.mubr.msk.bf16.mxu1 %vm993_vm3, %v1135_v36  ;;  %v964_v39 = vsel %vm955_vm9, 0, %v4013_v52  ;;  %v628_v43 = vand.u32 15, %v560_v27 }
  0x33   : > { %v4123_v40 = vsel %vm1118_vm6, %v4020_v55, %v4108_v29  ;;  %v607_v44 = vand.u32 15, %v557_v34  ;;  %3552 = vmatmul.mubr.msk.bf16.vlgmr.msra.gmra.mxu1 %vm993_vm3, %v1144_v37  ;;  %v1146_v47 = vshrl.u32 %v964_v39, 16  ;;  %v1149_v57 = vshll.u32 %v964_v39, 16 }
  0x34   : > { %vm4947_vm11 = vcmp.ne.s16.totalorder %v4123_v40, 0  ;;  %v1509_v58 = vor.u32 %v1508_v32, %v1505_v31  ;;  %3586 = vmatpush3.bf16.msra.mxu1 %v4016_v53  ;;  %vm768_vm12 = vcmp.eq.s32.totalorder %v628_v43, 0  ;;  %v4141_v61 = vsel %vm535_vm0, %v3323_v51, 0 }
  0x35   : > { %v1492_v59 = vsel %vm4947_vm11, 0, %v4059_v25  ;;  %vm4136_vm14 = vcmp.eq.s32.totalorder %v607_v44, 15  ;;  %v1148_v62 = vrot.slane %v1146_v47, 3  ;;  %v1151_v63 = vrot.slane %v1149_v57, 4  ;;  %vm832_vm1 = vmpackc.low %vm768_vm12, %vm768_vm12  ;;  %3701 = vmatprep.subr.msk.bf16.mxu1 %vm535_vm0, %v4128_v46 }
  0x36   : > { %v1511_v0 = vshrl.u32 %v1492_v59, 16  ;;  %v1514_v1 = vshll.u32 %v1492_v59, 16  ;;  %v848_v53 = vsel %vm832_vm1, 65537, %v3804_v13  ;;  %vm1360_vm2 = vmpackc.low %vm4136_vm14, %vm4136_vm14  ;;  %v562_v5 = vadd.s32 80, %v3885_v4 }
  0x37   : > { %v559_v15 = vadd.s32 56, %v3885_v4  ;;  %v564_v51 = vadd.s32 96, %v3885_v4  ;;  %v4152_v6 = vor.u32 %v1151_v63, %v1148_v62  ;;  %v3276_v9 = vcombine.low %v848_v53, %v3915_v14 }
  0x38   : > { %v1513_v7 = vrot.slane %v1511_v0, 4  ;;  %v1516_v8 = vrot.slane %v1514_v1, 5  ;;  %v1376_v10 = vsel %vm1360_vm2, 65537, %v3804_v13  ;;  %v642_v11 = vand.u32 15, %v562_v5 }
  0x39   : > { %v621_v12 = vand.u32 15, %v559_v15  ;;  %v656_v17 = vand.u32 15, %v564_v51  ;;  %v1153_v18 = vsel %vm1118_vm6, %v1143_v24, %v4152_v6  ;;  %v917_v23 = vshrl.u32 %v3276_v9, 16 }
  0x3a   : > { %v4158_v21 = vor.u32 %v1516_v8, %v1513_v7  ;;  %v920_v26 = vshll.u32 %v3276_v9, 16  ;;  %3555 = vmatprep.mubr.msk.bf16.mxu1 %vm993_vm3, %v1153_v18  ;;  %v3299_v27 = vcombine.low %v3915_v14, %v1376_v10  ;;  %vm770_vm4 = vcmp.eq.s32.totalorder %v642_v11, 0 }
  0x3b   : > { %vm4162_vm5 = vcmp.eq.s32.totalorder %v621_v12, 15  ;;  %vm4166_vm12 = vcmp.eq.s32.totalorder %v656_v17, 0  ;;  %v919_v36 = vrot.slane %v917_v23, 4  ;;  %vm834_vm14 = vmpackc.low %vm770_vm4, %vm770_vm4  ;;  %v561_v32 = vadd.s32 72, %v3885_v4 }
  0x3c   : > { %v1518_v24 = vsel %vm880_vm10, %v1509_v58, %v4158_v21  ;;  %v922_v37 = vrot.slane %v920_v26, 5  ;;  %v1429_v39 = vshrl.u32 %v3299_v27, 16  ;;  %v1432_v43 = vshll.u32 %v3299_v27, 16  ;;  %vm1362_vm1 = vmpackc.low %vm4162_vm5, %vm4162_vm5 }
  0x3d   : > { %3569 = vmatprep.mubr.msk.bf16.mxu0 %vm993_vm3, %v1518_v24  ;;  %v850_v44 = vsel %vm834_vm14, 65537, %v3804_v13  ;;  %v4179_v47 = vadd.s32 112, %v3885_v4  ;;  %v1378_v59 = vsel %vm1362_vm1, 65537, %v3804_v13  ;;  %vm836_vm2 = vmpackc.low %vm4166_vm12, %vm4166_vm12  ;;  %v635_v60 = vand.u32 15, %v561_v32 }
  0x3e   : > { %v923_v57 = vor.u32 %v922_v37, %v919_v36  ;;  %v3277_v58 = vcombine.low %v850_v44, %v3915_v14  ;;  %v1431_v62 = vrot.slane %v1429_v39, 3  ;;  %v1434_v63 = vrot.slane %v1432_v43, 4 }
  0x3f   : > { %v3300_v0 = vcombine.low %v3915_v14, %v1378_v59  ;;  %v852_v1 = vsel %vm836_vm2, 65537, %v3804_v13  ;;  %vm785_vm14 = vcmp.eq.s32.totalorder %v635_v60, 15 }
  0x40   : > { %v4190_v53 = vsel %vm880_vm10, %v4101_v16, %v923_v57  ;;  %v926_v5 = vshrl.u32 %v3277_v58, 16  ;;  %v929_v15 = vshll.u32 %v3277_v58, 16  ;;  %v3278_v51 = vcombine.low %v852_v1, %v3915_v14  ;;  %vm1364_vm1 = vmpackc.low %vm785_vm14, %vm785_vm14 }
  0x41   : > { %vm956_vm4 = vcmp.ne.s16.totalorder %v4190_v53, 0  ;;  %v1435_v7 = vor.u32 %v1434_v63, %v1431_v62  ;;  %v1438_v8 = vshrl.u32 %v3300_v0, 16  ;;  %v1441_v9 = vshll.u32 %v3300_v0, 16 }
  0x42   : > { %v965_v10 = vsel %vm956_vm4, 0, %v3937_v19  ;;  %v928_v11 = vrot.slane %v926_v5, 4  ;;  %v931_v12 = vrot.slane %v929_v15, 5  ;;  %v935_v17 = vshrl.u32 %v3278_v51, 16 }
  0x43   : > { %v1155_v18 = vshrl.u32 %v965_v10, 16  ;;  %v1158_v23 = vshll.u32 %v965_v10, 16  ;;  %v4199_v16 = vsel %vm1118_vm6, %v4108_v29, %v1435_v7  ;;  %v1440_v26 = vrot.slane %v1438_v8, 3 }
  0x44   : > { %vm4945_vm5 = vcmp.ne.s16.totalorder %v4199_v16, 0  ;;  %v932_v27 = vor.u32 %v931_v12, %v928_v11  ;;  %v1443_v31 = vrot.slane %v1441_v9, 4  ;;  %v937_v34 = vrot.slane %v935_v17, 4 }
  0x45   : > { %v1157_v24 = vrot.slane %v1155_v18, 3  ;;  %v1160_v36 = vrot.slane %v1158_v23, 4  ;;  %v1493_v37 = vsel %vm4945_vm5, 0, %v3989_v38  ;;  %v938_v32 = vshll.u32 %v3278_v51, 16 }
  0x46   : > { %v1520_v39 = vshrl.u32 %v1493_v37, 16  ;;  %v1523_v43 = vshll.u32 %v1493_v37, 16  ;;  %v4206_v44 = vsel %vm880_vm10, %v923_v57, %v932_v27  ;;  %v4208_v29 = vor.u32 %v1443_v31, %v1440_v26  ;;  %v4239_v26 = vld [vmem:[%s4940_s3 + $0x18] sm:$0xf] }
  0x47   : > { %v1161_v58 = vor.u32 %v1160_v36, %v1157_v24  ;;  %vm957_vm12 = vcmp.ne.s16.totalorder %v4206_v44, 0  ;;  %v940_v59 = vrot.slane %v938_v32, 5  ;;  %v670_v23 = vand.u32 15, %v4179_v47 }
  0x48   : > { %v1522_v62 = vrot.slane %v1520_v39, 4  ;;  %v1525_v63 = vrot.slane %v1523_v43, 5  ;;  %v966_v0 = vsel %vm957_vm12, 0, %v3940_v20  ;;  %v4216_v1 = vsel %vm1118_vm6, %v1435_v7, %v4208_v29 }
  0x49   : > { %v1162_v57 = vsel %vm1118_vm6, %v4152_v6, %v1161_v58  ;;  %v1164_v5 = vshrl.u32 %v966_v0, 16  ;;  %v1167_v15 = vshll.u32 %v966_v0, 16  ;;  %vm4944_vm2 = vcmp.ne.s16.totalorder %v4216_v1, 0 }
  0x4a   : > { %3556 = vmatmul.mubr.msk.bf16.gmra.mxu1 %vm993_vm3, %v1162_v57  ;;  %v1526_v60 = vor.u32 %v1525_v63, %v1522_v62  ;;  %v1494_v51 = vsel %vm4944_vm2, 0, %v4013_v52  ;;  %v4225_v8 = vor.u32 %v940_v59, %v937_v34  ;;  %v1380_v7 = vsel %vm1364_vm1, 65537, %v3804_v13 }
  0x4b   : > { %v1166_v9 = vrot.slane %v1164_v5, 3  ;;  %v1169_v10 = vrot.slane %v1167_v15, 4  ;;  %v1529_v11 = vshrl.u32 %v1494_v51, 16  ;;  %v1532_v12 = vshll.u32 %v1494_v51, 16 }
  0x4c   : > { %v1527_v6 = vsel %vm880_vm10, %v4158_v21, %v1526_v60  ;;  %v4232_v17 = vsel %vm880_vm10, %v932_v27, %v4225_v8  ;;  %v3301_v18 = vcombine.low %v3915_v14, %v1380_v7  ;;  %vm774_vm1 = vcmp.eq.s32.totalorder %v670_v23, 0 }
  0x4d   : > { %3570 = vmatmul.mubr.msk.bf16.vlgmr.msra.gmra.mxu0 %vm993_vm3, %v1527_v6  ;;  %v1170_v31 = vor.u32 %v1169_v10, %v1166_v9  ;;  %v1531_v34 = vrot.slane %v1529_v11, 4  ;;  %v1534_v24 = vrot.slane %v1532_v12, 5  ;;  %vm4950_vm14 = vcmp.ne.s16.totalorder %v4232_v17, 0  ;;  %vm838_vm2 = vmpackc.low %vm774_vm1, %vm774_vm1 }
  0x4e   : > { %3604 = vmatpush3.bf16.msra.mxu0 %v4141_v61  ;;  %v967_v21 = vsel %vm4950_vm14, 0, %v3948_v22  ;;  %v1447_v27 = vshrl.u32 %v3301_v18, 16  ;;  %v1450_v47 = vshll.u32 %v3301_v18, 16  ;;  %v854_v59 = vsel %vm838_vm2, 65537, %v3804_v13 }
  0x4f   : > { %v1171_v36 = vsel %vm1118_vm6, %v1161_v58, %v1170_v31  ;;  %v4248_v37 = vor.u32 %v1534_v24, %v1531_v34  ;;  %v1173_v32 = vshrl.u32 %v967_v21, 16  ;;  %v1176_v39 = vshll.u32 %v967_v21, 16  ;;  %3702 = vmatprep.subr.msk.bf16.mxu0 %vm535_vm0, %v4239_v26 }
  0x50   : > { %3559 = vmatprep.mubr.msk.bf16.mxu1 %vm993_vm3, %v1171_v36  ;;  %v1449_v61 = vrot.slane %v1447_v27, 3  ;;  %v1452_v43 = vrot.slane %v1450_v47, 4  ;;  %v563_v62 = vadd.s32 88, %v3885_v4  ;;  %v3279_v57 = vcombine.low %v854_v59, %v3915_v14 }
  0x51   : > { %v1536_v63 = vsel %vm880_vm10, %v1526_v60, %v4248_v37  ;;  %v1175_v58 = vrot.slane %v1173_v32, 3  ;;  %v1178_v0 = vrot.slane %v1176_v39, 4  ;;  %v565_v51 = vadd.s32 104, %v3885_v4 }
  0x52   : > { %3573 = vmatprep.mubr.msk.bf16.mxu0 %vm993_vm3, %v1536_v63  ;;  %v4259_v5 = vor.u32 %v1452_v43, %v1449_v61  ;;  %v649_v15 = vand.u32 15, %v563_v62  ;;  %v567_v7 = vadd.s32 120, %v3885_v4  ;;  %v944_v10 = vshrl.u32 %v3279_v57, 16 }
  0x53   : > { %v4263_v9 = vor.u32 %v1178_v0, %v1175_v58  ;;  %v947_v11 = vshll.u32 %v3279_v57, 16  ;;  %v1722_v60 = vsel %vm4946_vm13, 0, %v4059_v25  ;;  %v663_v6 = vand.u32 15, %v565_v51 }
  0x54   : > { %v4271_v12 = vsel %vm1118_vm6, %v4208_v29, %v4259_v5  ;;  %vm787_vm2 = vcmp.eq.s32.totalorder %v649_v15, 15  ;;  %v677_v18 = vand.u32 15, %v567_v7  ;;  %v946_v4 = vrot.slane %v944_v10, 4 }
  0x55   : > { %v1180_v23 = vsel %vm1118_vm6, %v1170_v31, %v4263_v9  ;;  %vm1486_vm1 = vcmp.ne.s16.totalorder %v4271_v12, 0  ;;  %v949_v34 = vrot.slane %v947_v11, 5  ;;  %vm1366_vm5 = vmpackc.low %vm787_vm2, %vm787_vm2  ;;  %vm789_vm13 = vcmp.eq.s32.totalorder %v663_v6, 15 }
  0x56   : > { %3560 = vmatmul.mubr.msk.bf16.gmra.mxu1 %vm993_vm3, %v1180_v23  ;;  %v1495_v24 = vsel %vm1486_vm1, 0, %v3937_v19  ;;  %v1382_v29 = vsel %vm1366_vm5, 65537, %v3804_v13  ;;  %vm4281_vm11 = vcmp.eq.s32.totalorder %v677_v18, 15  ;;  %vm1368_vm2 = vmpackc.low %vm789_vm13, %vm789_vm13  ;;  %v4292_v39 = vsel %vm953_vm7, 0, %v3989_v38 }
  0x57   : > { %v1538_v27 = vshrl.u32 %v1495_v24, 16  ;;  %v1541_v31 = vshll.u32 %v1495_v24, 16  ;;  %v4285_v47 = vor.u32 %v949_v34, %v946_v4  ;;  %v3302_v36 = vcombine.low %v3915_v14, %v1382_v29 }
  0x58   : > { %v1384_v32 = vsel %vm1368_vm2, 65537, %v3804_v13  ;;  %v1734_v61 = vshrl.u32 %v1722_v60, 16  ;;  %v1737_v43 = vshll.u32 %v1722_v60, 16  ;;  %vm1370_vm2 = vmpackc.low %vm4281_vm11, %vm4281_vm11 }
  0x59   : > { %v1540_v59 = vrot.slane %v1538_v27, 4  ;;  %v1543_v62 = vrot.slane %v1541_v31, 5  ;;  %v4297_v63 = vsel %vm880_vm10, %v4225_v8, %v4285_v47  ;;  %v1456_v58 = vshrl.u32 %v3302_v36, 16 }
  0x5a   : > { %vm4951_vm5 = vcmp.ne.s16.totalorder %v4297_v63, 0  ;;  %v1459_v0 = vshll.u32 %v3302_v36, 16  ;;  %vm4953_vm13 = vcmp.ne.s16.totalorder %v4285_v47, 0  ;;  %v3303_v57 = vcombine.low %v3915_v14, %v1384_v32 }
  0x5b   : > { %v1544_v15 = vor.u32 %v1543_v62, %v1540_v59  ;;  %v968_v51 = vsel %vm4951_vm5, 0, %v3982_v35  ;;  %v1458_v7 = vrot.slane %v1456_v58, 3  ;;  %v969_v10 = vsel %vm4953_vm13, 0, %v3994_v42 }
  0x5c   : > { %v1182_v8 = vshrl.u32 %v968_v51, 16  ;;  %v1185_v11 = vshll.u32 %v968_v51, 16  ;;  %v1461_v60 = vrot.slane %v1459_v0, 4  ;;  %v1191_v6 = vshrl.u32 %v969_v10, 16 }
  0x5d   : > { %v1545_v18 = vsel %vm880_vm10, %v4248_v37, %v1544_v15  ;;  %v1194_v23 = vshll.u32 %v969_v10, 16  ;;  %v1465_v4 = vshrl.u32 %v3303_v57, 16  ;;  %v1468_v34 = vshll.u32 %v3303_v57, 16 }
  0x5e   : > { %3574 = vmatmul.mubr.msk.bf16.gmra.mxu0 %vm993_vm3, %v1545_v18  ;;  %v1184_v24 = vrot.slane %v1182_v8, 3  ;;  %v1187_v29 = vrot.slane %v1185_v11, 4  ;;  %v1462_v27 = vor.u32 %v1461_v60, %v1458_v7  ;;  %v1193_v31 = vrot.slane %v1191_v6, 3 }
  0x5f   : > { %v1196_v36 = vrot.slane %v1194_v23, 4  ;;  %v1467_v32 = vrot.slane %v1465_v4, 3  ;;  %v1470_v59 = vrot.slane %v1468_v34, 4  ;;  %v1386_v62 = vsel %vm1370_vm2, 65537, %v3804_v13 }
  0x60   : > { %v1188_v21 = vor.u32 %v1187_v29, %v1184_v24  ;;  %v4317_v58 = vsel %vm1118_vm6, %v4259_v5, %v1462_v27  ;;  %v3304_v37 = vcombine.low %v3915_v14, %v1386_v62  ;;  %v1736_v0 = vrot.slane %v1734_v61, 3 }
  0x61   : > { %vm4949_vm11 = vcmp.ne.s16.totalorder %v4317_v58, 0  ;;  %v1197_v57 = vor.u32 %v1196_v36, %v1193_v31  ;;  %v1471_v51 = vor.u32 %v1470_v59, %v1467_v32  ;;  %v1739_v10 = vrot.slane %v1737_v43, 4 }
  0x62   : > { %v1189_v7 = vsel %vm1118_vm6, %v4263_v9, %v1188_v21  ;;  %v1496_v13 = vsel %vm4949_vm11, 0, %v3940_v20  ;;  %v1474_v8 = vshrl.u32 %v3304_v37, 16  ;;  %v1477_v11 = vshll.u32 %v3304_v37, 16 }
  0x63   : > { %3563 = vmatprep.mubr.msk.bf16.mxu1 %vm993_vm3, %v1189_v7  ;;  %v1547_v5 = vshrl.u32 %v1496_v13, 16  ;;  %v1550_v60 = vshll.u32 %v1496_v13, 16  ;;  %v1198_v14 = vsel %vm1118_vm6, %v1188_v21, %v1197_v57  ;;  %v4329_v61 = vsel %vm1118_vm6, %v1462_v27, %v1471_v51 }
  0x64   : > { %3564 = vmatmul.mubr.msk.bf16.gmra.mxu1 %vm993_vm3, %v1198_v14  ;;  %vm4948_vm2 = vcmp.ne.s16.totalorder %v4329_v61, 0  ;;  %v1476_v9 = vrot.slane %v1474_v8, 3  ;;  %v1479_v43 = vrot.slane %v1477_v11, 4  ;;  %v1742_v4 = vshrl.u32 %v4292_v39, 16 }
  0x65   : > { %v1549_v6 = vrot.slane %v1547_v5, 4  ;;  %v1552_v18 = vrot.slane %v1550_v60, 5  ;;  %v1497_v23 = vsel %vm4948_vm2, 0, %v3948_v22  ;;  %v1745_v27 = vshll.u32 %v4292_v39, 16 }
  0x66   : > { %v1556_v34 = vshrl.u32 %v1497_v23, 16  ;;  %v1559_v24 = vshll.u32 %v1497_v23, 16  ;;  %v4337_v29 = vor.u32 %v1479_v43, %v1476_v9  ;;  %v1740_v36 = vor.u32 %v1739_v10, %v1736_v0 }
  0x67   : > { %v1553_v31 = vor.u32 %v1552_v18, %v1549_v6  ;;  %v1744_v32 = vrot.slane %v1742_v4, 3  ;;  %v1724_v59 = vsel %vm954_vm8, 0, %v4013_v52  ;;  %v1747_v57 = vrot.slane %v1745_v27, 4 }
  0x68   : > { %v1558_v62 = vrot.slane %v1556_v34, 4  ;;  %v1561_v21 = vrot.slane %v1559_v24, 5  ;;  %v4345_v37 = vsel %vm1118_vm6, %v1471_v51, %v4337_v29  ;;  %vm1490_vm11 = vcmp.ne.s16.totalorder %v4337_v29, 0 }
  0x69   : > { %v1554_v7 = vsel %vm880_vm10, %v1544_v15, %v1553_v31  ;;  %vm1489_vm2 = vcmp.ne.s16.totalorder %v4345_v37, 0  ;;  %v1751_v39 = vshrl.u32 %v1724_v59, 16  ;;  %v1748_v13 = vor.u32 %v1747_v57, %v1744_v32 }
  0x6a   : > { %3577 = vmatprep.mubr.msk.bf16.mxu0 %vm993_vm3, %v1554_v7  ;;  %v1562_v0 = vor.u32 %v1561_v21, %v1558_v62  ;;  %v1498_v10 = vsel %vm1489_vm2, 0, %v3982_v35  ;;  %v1499_v51 = vsel %vm1490_vm11, 0, %v3994_v42  ;;  %v1754_v43 = vshll.u32 %v1724_v59, 16 }
  0x6b   : > { %v1565_v15 = vshrl.u32 %v1498_v10, 16  ;;  %v1568_v8 = vshll.u32 %v1498_v10, 16  ;;  %v1574_v11 = vshrl.u32 %v1499_v51, 16  ;;  %v1577_v5 = vshll.u32 %v1499_v51, 16  ;;  %v4386_v51 = vld [vmem:[%s4940_s3 + $0x1c] sm:$0xf] }
  0x6c   : > { %v1563_v60 = vsel %vm880_vm10, %v1553_v31, %v1562_v0  ;;  %v1749_v14 = vsel %vm1118_vm6, %v1740_v36, %v1748_v13  ;;  %v1753_v9 = vrot.slane %v1751_v39, 3  ;;  %v1756_v34 = vrot.slane %v1754_v43, 4 }
  0x6d   : > { %3578 = vmatmul.mubr.msk.bf16.gmra.mxu0 %vm993_vm3, %v1563_v60  ;;  %v1567_v6 = vrot.slane %v1565_v15, 4  ;;  %v1570_v18 = vrot.slane %v1568_v8, 5  ;;  %3587 = vmatprep.mubr.msk.bf16.mxu1 %vm993_vm3, %v1749_v14  ;;  %v1576_v23 = vrot.slane %v1574_v11, 4  ;;  %v1579_v4 = vrot.slane %v1577_v5, 5 }
  0x6e   : > { %v2193_v24 = vsel %vm535_vm0, %v4128_v46, 0  ;;  %v1725_v27 = vsel %vm955_vm9, 0, %v3937_v19  ;;  %v1726_v31 = vsel %vm956_vm4, 0, %v3940_v20  ;;  %v1757_v21 = vor.u32 %v1756_v34, %v1753_v9 }
  0x6f   : > { %v1571_v36 = vor.u32 %v1570_v18, %v1567_v6  ;;  %v1580_v32 = vor.u32 %v1579_v4, %v1576_v23  ;;  %v1760_v59 = vshrl.u32 %v1725_v27, 16  ;;  %v1763_v62 = vshll.u32 %v1725_v27, 16  ;;  %v461_v27 = vld [vmem:[%s4379_s8] sm:$0xf] }
  0x70   : > { %v1769_v57 = vshrl.u32 %v1726_v31, 16  ;;  %v1772_v7 = vshll.u32 %v1726_v31, 16  ;;  %v1727_v46 = vsel %vm957_vm12, 0, %v3948_v22  ;;  %v1758_v22 = vsel %vm1118_vm6, %v1748_v13, %v1757_v21 }
  0x71   : > { %v1572_v19 = vsel %vm880_vm10, %v1562_v0, %v1571_v36  ;;  %v1581_v20 = vsel %vm880_vm10, %v1571_v36, %v1580_v32  ;;  %v1762_v39 = vrot.slane %v1760_v59, 3  ;;  %v1765_v10 = vrot.slane %v1763_v62, 4  ;;  %3588 = vmatmul.mubr.msk.bf16.vlgmr.msra.gmra.mxu1 %vm993_vm3, %v1758_v22  ;;  %v3755_v59 = vld [vmem:[%s3921_s19 + $0x3c] ss:$0 sps:$4 sm:$0xff]  }
  0x72   : > { %3581 = vmatprep.mubr.msk.bf16.mxu0 %vm993_vm3, %v1572_v19  ;;  %v1771_v15 = vrot.slane %v1769_v57, 3  ;;  %v1774_v8 = vrot.slane %v1772_v7, 4  ;;  %v1778_v11 = vshrl.u32 %v1727_v46, 16  ;;  %v1781_v5 = vshll.u32 %v1727_v46, 16  ;;  %3622 = vmatpush3.bf16.msra.mxu1 %v2193_v24 }
  0x73   : > { %v1766_v0 = vor.u32 %v1765_v10, %v1762_v39  ;;  %v1728_v60 = vsel %vm4950_vm14, 0, %v3982_v35  ;;  %v1729_v14 = vsel %vm4951_vm5, 0, %v3994_v42  ;;  %3703 = vmatprep.subr.msk.bf16.mxu1 %vm535_vm0, %v4386_v51  ;;  %v471_v31 = vstv %s470_s11 }
  0x74   : > { %v1775_v13 = vor.u32 %v1774_v8, %v1771_v15  ;;  %v1780_v9 = vrot.slane %v1778_v11, 3  ;;  %v1787_v43 = vshrl.u32 %v1728_v60, 16  ;;  %v1790_v6 = vshll.u32 %v1728_v60, 16 }
  0x75   : > { %3582 = vmatmul.mubr.msk.bf16.gmra.mxu0 %vm993_vm3, %v1581_v20  ;;  %v1767_v18 = vsel %vm1118_vm6, %v1757_v21, %v1766_v0  ;;  %v1783_v23 = vrot.slane %v1781_v5, 4  ;;  %v1796_v4 = vshrl.u32 %v1729_v14, 16  ;;  %v1799_v34 = vshll.u32 %v1729_v14, 16 }
  0x76   : > { %3591 = vmatprep.mubr.msk.bf16.mxu1 %vm993_vm3, %v1767_v18  ;;  %3605 = vmatprep.mubr.msk.bf16.mxu0 %vm993_vm3, %v4071_v41  ;;  %v1789_v35 = vrot.slane %v1787_v43, 3  ;;  %v1792_v24 = vrot.slane %v1790_v6, 4  ;;  %vm4407_vm14 = vcmp.eq.s32.totalorder %v471_v31, 1  ;;  %v1776_v62 = vsel %vm1118_vm6, %v1766_v0, %v1775_v13 }
  0x77   : > { %v1784_v36 = vor.u32 %v1783_v23, %v1780_v9  ;;  %v473_v21 = vsel %vm4407_vm14, 0, %v461_v27  ;;  %v2077_v57 = vsel %vm4952_vm15, 0, %v4059_v25  ;;  %vm4974_vm5 = vcmp.ne.s16.totalorder %v4123_v40, 0  ;;  %v4448_v27 = vld [vmem:[%s3921_s19 + $0x14] sm:$0xff]  }
  0x78   : > { %v2078_v41 = vsel %vm4974_vm5, 0, %v3989_v38  ;;  %v1798_v46 = vrot.slane %v1796_v4, 3  ;;  %v1801_v19 = vrot.slane %v1799_v34, 4  ;;  %v3270_v20 = vcombine.low %v473_v21, %v473_v21 }
  0x79   : > { %v1785_v7 = vsel %vm1118_vm6, %v1775_v13, %v1784_v36  ;;  %v2424_v39 = vsel %vm535_vm0, %v4239_v26, 0  ;;  %v1793_v10 = vor.u32 %v1792_v24, %v1789_v35  ;;  %v2089_v22 = vshrl.u32 %v2077_v57, 16  ;;  %3592 = vmatmul.mubr.msk.bf16.gmra.mxu1 %vm993_vm3, %v1776_v62  ;;  %v4435_v26 = vld [vmem:[%s4940_s3 + $0x20] sm:$0xf] }
  0x7a   : > { %v4426_v15 = vsel %vm535_vm0, %v3755_v59, %v3270_v20  ;;  %v2092_v25 = vshll.u32 %v2077_v57, 16  ;;  %v2097_v8 = vshrl.u32 %v2078_v41, 16  ;;  %v2100_v11 = vshll.u32 %v2078_v41, 16  ;;  %3595 = vmatprep.mubr.msk.bf16.mxu1 %vm993_vm3, %v1785_v7 }
  0x7b   : > { %v1730_v0 = vsel %vm4953_vm13, 0, %v4426_v15  ;;  %v1802_v5 = vor.u32 %v1801_v19, %v1798_v46  ;;  %v1794_v13 = vsel %vm1118_vm6, %v1784_v36, %v1793_v10  ;;  %vm4975_vm5 = vcmp.ne.s16.totalorder %v4199_v16, 0 }
  0x7c   : > { %v1805_v60 = vshrl.u32 %v1730_v0, 16  ;;  %v1808_v14 = vshll.u32 %v1730_v0, 16  ;;  %v2079_v9 = vsel %vm4975_vm5, 0, %v4013_v52  ;;  %v2091_v43 = vrot.slane %v2089_v22, 4 }
  0x7d   : > { %3606 = vmatmul.mubr.msk.bf16.vlgmr.msra.gmra.mxu0 %vm993_vm3, %v4041_v2  ;;  %v2094_v6 = vrot.slane %v2092_v25, 5  ;;  %v2099_v18 = vrot.slane %v2097_v8, 4  ;;  %v2102_v23 = vrot.slane %v2100_v11, 5  ;;  %vm4976_vm15 = vcmp.ne.s16.totalorder %v4216_v1, 0 }
  0x7e   : > { %3640 = vmatpush3.bf16.msra.mxu0 %v2424_v39  ;;  %3609 = vmatprep.mubr.msk.bf16.mxu0 %vm993_vm3, %v4046_v3  ;;  %v1807_v4 = vrot.slane %v1805_v60, 3  ;;  %v1810_v34 = vrot.slane %v1808_v14, 4  ;;  %v2080_v35 = vsel %vm4976_vm15, 0, %v4448_v27  ;;  %vm4977_vm13 = vcmp.ne.s16.totalorder %v4007_v50, 0 }
  0x7f   : > { %3704 = vmatprep.subr.msk.bf16.mxu0 %vm535_vm0, %v4435_v26  ;;  %v2308_v24 = vsel %vm4977_vm13, 0, %v3989_v38  ;;  %v1803_v31 = vsel %vm1118_vm6, %v1793_v10, %v1802_v5  ;;  %v2106_v36 = vshrl.u32 %v2079_v9, 16  ;;  %v2109_v59 = vshll.u32 %v2079_v9, 16  ;;  %v4465_v10 = vld [vmem:[%s3921_s19 + $0x1c] sm:$0xff]  }
  0x80   : > { %v2309_v62 = vsel %vm953_vm7, 0, %v4013_v52  ;;  %v2115_v21 = vshrl.u32 %v2080_v35, 16  ;;  %v2118_v57 = vshll.u32 %v2080_v35, 16  ;;  %v2320_v41 = vshrl.u32 %v2308_v24, 16 }
  0x81   : > { %3596 = vmatmul.mubr.msk.bf16.gmra.mxu1 %vm993_vm3, %v1794_v13  ;;  %v2323_v7 = vshll.u32 %v2308_v24, 16  ;;  %v2328_v46 = vshrl.u32 %v2309_v62, 16  ;;  %v2331_v19 = vshll.u32 %v2309_v62, 16  ;;  %v1811_v38 = vor.u32 %v1810_v34, %v1807_v4  ;;  %v4479_v34 = vld [vmem:[%s3921_s19 + $0x24] sm:$0xff]  }
  0x82   : > { %3599 = vmatprep.mubr.msk.bf16.mxu1 %vm993_vm3, %v1803_v31  ;;  %v2095_v50 = vor.u32 %v2094_v6, %v2091_v43  ;;  %v2103_v20 = vor.u32 %v2102_v23, %v2099_v18  ;;  %v2108_v39 = vrot.slane %v2106_v36, 4  ;;  %v2111_v45 = vrot.slane %v2109_v59, 5 }
  0x83   : > { %v2081_v52 = vsel %vm1486_vm1, 0, %v4465_v10  ;;  %v2310_v22 = vsel %vm954_vm8, 0, %v4448_v27  ;;  %v2117_v25 = vrot.slane %v2115_v21, 4  ;;  %v2120_v8 = vrot.slane %v2118_v57, 5 }
  0x84   : > { %v2124_v11 = vshrl.u32 %v2081_v52, 16  ;;  %v2127_v0 = vshll.u32 %v2081_v52, 16  ;;  %v2322_v60 = vrot.slane %v2320_v41, 3  ;;  %v2325_v14 = vrot.slane %v2323_v7, 4 }
  0x85   : > { %3610 = vmatmul.mubr.msk.bf16.gmra.mxu0 %vm993_vm3, %v3971_v30  ;;  %v2330_v13 = vrot.slane %v2328_v46, 3  ;;  %v2333_v9 = vrot.slane %v2331_v19, 4  ;;  %v1812_v43 = vsel %vm1118_vm6, %v1802_v5, %v1811_v38  ;;  %v2337_v6 = vshrl.u32 %v2310_v22, 16 }
  0x86   : > { %3613 = vmatprep.mubr.msk.bf16.mxu0 %vm993_vm3, %v3978_v33  ;;  %v2340_v18 = vshll.u32 %v2310_v22, 16  ;;  %v2104_v23 = vsel %vm880_vm10, %v2095_v50, %v2103_v20  ;;  %v1956_v54 = vrot.slane %v4426_v15, 4  ;;  %v2112_v4 = vor.u32 %v2111_v45, %v2108_v39  ;;  %v4510_v22 = vld [vmem:[%s3921_s19 + $0x2c] sm:$0xff]  }
  0x87   : > { %vm4978_vm15 = vcmp.ne.s16.totalorder %v4317_v58, 0  ;;  %v2121_v24 = vor.u32 %v2120_v8, %v2117_v25  ;;  %v2126_v31 = vrot.slane %v2124_v11, 4  ;;  %v2129_v36 = vrot.slane %v2127_v0, 5  ;;  %v4516_v25 = vld [vmem:[%s3921_s19 + $0x34] sm:$0xff]  }
  0x88   : > { %v2082_v35 = vsel %vm4978_vm15, 0, %v4479_v34  ;;  %v2311_v5 = vsel %vm955_vm9, 0, %v4465_v10  ;;  %v2326_v59 = vor.u32 %v2325_v14, %v2322_v60  ;;  %v2334_v62 = vor.u32 %v2333_v9, %v2330_v13 }
  0x89   : > { %3600 = vmatmul.mubr.msk.bf16.gmra.mxu1 %vm993_vm3, %v1812_v43  ;;  %v2339_v21 = vrot.slane %v2337_v6, 3  ;;  %v2342_v57 = vrot.slane %v2340_v18, 4  ;;  %v2133_v41 = vshrl.u32 %v2082_v35, 16  ;;  %v2136_v7 = vshll.u32 %v2082_v35, 16 }
  0x8a   : > { %3623 = vmatprep.mubr.msk.bf16.mxu1 %vm993_vm3, %v2104_v23  ;;  %v2548_v46 = vsel %vm535_vm0, %v4386_v51, 0  ;;  %v2346_v28 = vshrl.u32 %v2311_v5, 16  ;;  %v2349_v19 = vshll.u32 %v2311_v5, 16  ;;  %v4500_v38 = vsel %vm535_vm0, %v991_v49, %v1956_v54 }
  0x8b   : > { %v2113_v50 = vsel %vm880_vm10, %v2103_v20, %v2112_v4  ;;  %v2122_v39 = vsel %vm880_vm10, %v2112_v4, %v2121_v24  ;;  %v2130_v45 = vor.u32 %v2129_v36, %v2126_v31  ;;  %v2335_v52 = vsel %vm1118_vm6, %v2326_v59, %v2334_v62  ;;  %v462_v59 = vld [vmem:[%s4379_s8 + $0x4] sm:$0xf] }
  0x8c   : > { %v4507_v51 = vsel %vm535_vm0, %v4435_v26, 0  ;;  %vm4979_vm7 = vcmp.ne.s16.totalorder %v4329_v61, 0  ;;  %v2084_v49 = vsel %vm1489_vm2, 0, %v4516_v25  ;;  %v2343_v20 = vor.u32 %v2342_v57, %v2339_v21 }
  0x8d   : > { %3614 = vmatmul.mubr.msk.bf16.gmra.mxu0 %vm993_vm3, %v4004_v48  ;;  %v2083_v42 = vsel %vm4979_vm7, 0, %v4510_v22  ;;  %v2135_v8 = vrot.slane %v2133_v41, 4  ;;  %v2138_v11 = vrot.slane %v2136_v7, 5  ;;  %v2151_v0 = vshrl.u32 %v2084_v49, 16 }
  0x8e   : > { %3617 = vmatprep.mubr.msk.bf16.mxu0 %vm993_vm3, %v4025_v56  ;;  %v2348_v60 = vrot.slane %v2346_v28, 3  ;;  %v2351_v14 = vrot.slane %v2349_v19, 4  ;;  %v2154_v26 = vshll.u32 %v2084_v49, 16  ;;  %v2085_v13 = vsel %vm1490_vm11, 0, %v4426_v15 }
  0x8f   : > { %v2131_v9 = vsel %vm880_vm10, %v2121_v24, %v2130_v45  ;;  %v2142_v43 = vshrl.u32 %v2083_v42, 16  ;;  %v2312_v6 = vsel %vm956_vm4, 0, %v4479_v34  ;;  %v2153_v18 = vrot.slane %v2151_v0, 4 }
  0x90   : > { %v2145_v23 = vshll.u32 %v2083_v42, 16  ;;  %v2156_v4 = vrot.slane %v2154_v26, 5  ;;  %v2313_v35 = vsel %vm957_vm12, 0, %v4510_v22  ;;  %v2160_v31 = vshrl.u32 %v2085_v13, 16 }
  0x91   : > { %3624 = vmatmul.mubr.msk.bf16.vlgmr.msra.gmra.mxu1 %vm993_vm3, %v2113_v50  ;;  %v2344_v24 = vsel %vm1118_vm6, %v2334_v62, %v2343_v20  ;;  %v2139_v36 = vor.u32 %v2138_v11, %v2135_v8  ;;  %v2163_v5 = vshll.u32 %v2085_v13, 16  ;;  %vm4980_vm8 = vcmp.ne.s16.totalorder %v4297_v63, 0 }
  0x92   : > { %3658 = vmatpush3.bf16.msra.mxu1 %v2548_v46  ;;  %3627 = vmatprep.mubr.msk.bf16.mxu1 %vm993_vm3, %v2122_v39  ;;  %v2315_v53 = vsel %vm4980_vm8, 0, %v4426_v15  ;;  %v2352_v21 = vor.u32 %v2351_v14, %v2348_v60  ;;  %v2355_v57 = vshrl.u32 %v2312_v6, 16  ;;  %v2358_v44 = vshll.u32 %v2312_v6, 16 }
  0x93   : > { %v2162_v41 = vrot.slane %v2160_v31, 4  ;;  %v2157_v7 = vor.u32 %v2156_v4, %v2153_v18  ;;  %v2364_v46 = vshrl.u32 %v2313_v35, 16  ;;  %v2367_v28 = vshll.u32 %v2313_v35, 16 }
  0x94   : > { %v2165_v62 = vrot.slane %v2163_v5, 5  ;;  %vm4981_vm9 = vcmp.ne.s16.totalorder %v4232_v17, 0  ;;  %v2382_v63 = vshrl.u32 %v2315_v53, 16  ;;  %v2385_v50 = vshll.u32 %v2315_v53, 16 }
  0x95   : > { %3618 = vmatmul.mubr.msk.bf16.gmra.mxu0 %vm993_vm3, %v4500_v38  ;;  %v2314_v19 = vsel %vm4981_vm9, 0, %v4516_v25  ;;  %v474_v39 = vsel %vm4407_vm14, 0, %v462_v59  ;;  %v2140_v42 = vsel %vm880_vm10, %v2130_v45, %v2139_v36  ;;  %v2144_v49 = vrot.slane %v2142_v43, 4  ;;  %vm4984_vm14 = vmmov %vm4978_vm15 }
  0x96   : > { %3641 = vmatprep.mubr.msk.bf16.mxu0 %vm993_vm3, %v2335_v52  ;;  %v2147_v8 = vrot.slane %v2145_v23, 5  ;;  %v2166_v11 = vor.u32 %v2165_v62, %v2162_v41  ;;  %v2353_v52 = vsel %vm1118_vm6, %v2343_v20, %v2352_v21  ;;  %v2357_v0 = vrot.slane %v2355_v57, 3  ;;  %vm4986_vm15 = vmmov %vm4979_vm7 }
  0x97   : > { %v2360_v60 = vrot.slane %v2358_v44, 4  ;;  %v3271_v14 = vcombine.low %v474_v39, %v474_v39  ;;  %v2366_v26 = vrot.slane %v2364_v46, 3  ;;  %v2369_v13 = vrot.slane %v2367_v28, 4 }
  0x98   : > { %v4549_v17 = vsel %vm880_vm10, %v2157_v7, %v2166_v11  ;;  %v2373_v6 = vshrl.u32 %v2314_v19, 16  ;;  %v2376_v32 = vshll.u32 %v2314_v19, 16  ;;  %v2384_v18 = vrot.slane %v2382_v63, 3  ;;  %v3762_v63 = vld [vmem:[%s3921_s19 + $0xc] sm:$0xff]  }
  0x99   : > { %3628 = vmatmul.mubr.msk.bf16.gmra.mxu1 %vm993_vm3, %v2131_v9  ;;  %v2387_v4 = vrot.slane %v2385_v50, 4  ;;  %v549_v45 = vsel %vm535_vm0, %v3271_v14, 0  ;;  %v2148_v43 = vor.u32 %v2147_v8, %v2144_v49  ;;  %vm4982_vm4 = vcmp.ne.s16.totalorder %v4285_v47, 0 }
  0x9a   : > { %3631 = vmatprep.mubr.msk.bf16.mxu1 %vm993_vm3, %v2140_v42  ;;  %v2316_v20 = vsel %vm4982_vm4, 0, %v549_v45  ;;  %v2361_v9 = vor.u32 %v2360_v60, %v2357_v0  ;;  %v2370_v31 = vor.u32 %v2369_v13, %v2366_v26  ;;  %v2375_v5 = vrot.slane %v2373_v6, 3 }
  0x9b   : > { %v2391_v23 = vshrl.u32 %v2316_v20, 16  ;;  %v2394_v35 = vshll.u32 %v2316_v20, 16  ;;  %v2378_v53 = vrot.slane %v2376_v32, 4  ;;  %v2388_v59 = vor.u32 %v2387_v4, %v2384_v18 }
  0x9c   : > { %v2149_v47 = vsel %vm880_vm10, %v2139_v36, %v2148_v43  ;;  %v2158_v41 = vsel %vm880_vm10, %v2148_v43, %v2157_v7  ;;  %vm4983_vm12 = vcmp.ne.s16.totalorder %v4020_v55, 0  ;;  %v2362_v62 = vsel %vm1118_vm6, %v2352_v21, %v2361_v9 }
  0x9d   : > { %3642 = vmatmul.mubr.msk.bf16.vlgmr.msra.gmra.mxu0 %vm993_vm3, %v2344_v24  ;;  %v2393_v57 = vrot.slane %v2391_v23, 3  ;;  %v2396_v44 = vrot.slane %v2394_v35, 4  ;;  %v3761_v24 = vld [vmem:[%s3921_s19 + $0x4] sm:$0xff]   ;;  %v2371_v19 = vsel %vm1118_vm6, %v2361_v9, %v2370_v31  ;;  %vm4985_vm13 = vcmp.ne.s16.totalorder %v4123_v40, 0 }
  0x9e   : > { %3676 = vmatpush3.bf16.msra.mxu0 %v4507_v51  ;;  %3645 = vmatprep.mubr.msk.bf16.mxu0 %vm993_vm3, %v2353_v52  ;;  %v2663_v28 = vsel %vm4983_vm12, 0, %v3761_v24  ;;  %v2668_v51 = vsel %vm4984_vm14, 0, %v4510_v22  ;;  %v2664_v50 = vsel %vm4985_vm13, 0, %v3762_v63  ;;  %v2379_v36 = vor.u32 %v2378_v53, %v2375_v5 }
  0x9f   : > { %v2397_v46 = vor.u32 %v2396_v44, %v2393_v57  ;;  %v2719_v39 = vshrl.u32 %v2668_v51, 16  ;;  %v2722_v55 = vshll.u32 %v2668_v51, 16  ;;  %v2675_v42 = vshrl.u32 %v2663_v28, 16 }
  0xa0   : > { %v2678_v58 = vshll.u32 %v2663_v28, 16  ;;  %v2665_v22 = vsel %vm4975_vm5, 0, %v4448_v27  ;;  %v2542_v21 = vrot.slane %v549_v45, 4  ;;  %v2683_v40 = vshrl.u32 %v2664_v50, 16 }
  0xa1   : > { %3632 = vmatmul.mubr.msk.bf16.gmra.mxu1 %vm993_vm3, %v2149_v47  ;;  %v2398_v7 = vsel %vm1118_vm6, %v2388_v59, %v2397_v46  ;;  %v2721_v49 = vrot.slane %v2719_v39, 4  ;;  %v2724_v8 = vrot.slane %v2722_v55, 5  ;;  %v2669_v11 = vsel %vm4986_vm15, 0, %v4516_v25 }
  0xa2   : > { %3635 = vmatprep.mubr.msk.bf16.mxu1 %vm993_vm3, %v2158_v41  ;;  %v2686_v52 = vshll.u32 %v2664_v50, 16  ;;  %v4586_v0 = vsel %vm535_vm0, %v1956_v54, %v2542_v21  ;;  %v2728_v16 = vshrl.u32 %v2669_v11, 16  ;;  %v2731_v27 = vshll.u32 %v2669_v11, 16 }
  0xa3   : > { %v2380_v60 = vsel %vm1118_vm6, %v2370_v31, %v2379_v36  ;;  %v2725_v14 = vor.u32 %v2724_v8, %v2721_v49  ;;  %v2670_v26 = vsel %vm1489_vm2, 0, %v4426_v15  ;;  %v2671_v61 = vsel %vm1490_vm11, 0, %v549_v45 }
  0xa4   : > { %v2730_v25 = vrot.slane %v2728_v16, 4  ;;  %v2733_v13 = vrot.slane %v2731_v27, 5  ;;  %v2737_v6 = vshrl.u32 %v2670_v26, 16  ;;  %v2740_v32 = vshll.u32 %v2670_v26, 16 }
  0xa5   : > { %3646 = vmatmul.mubr.msk.bf16.gmra.mxu0 %vm993_vm3, %v2362_v62  ;;  %v2389_v18 = vsel %vm1118_vm6, %v2379_v36, %v2388_v59  ;;  %v2677_v54 = vrot.slane %v2675_v42, 4  ;;  %v2746_v4 = vshrl.u32 %v2671_v61, 16  ;;  %v2749_v43 = vshll.u32 %v2671_v61, 16 }
  0xa6   : > { %3649 = vmatprep.mubr.msk.bf16.mxu0 %vm993_vm3, %v2371_v19  ;;  %v2680_v20 = vrot.slane %v2678_v58, 5  ;;  %v2734_v23 = vor.u32 %v2733_v13, %v2730_v25  ;;  %v2739_v35 = vrot.slane %v2737_v6, 4  ;;  %v2742_v9 = vrot.slane %v2740_v32, 5 }
  0xa7   : > { %v2685_v37 = vrot.slane %v2683_v40, 4  ;;  %v2688_v15 = vrot.slane %v2686_v52, 5  ;;  %v2748_v29 = vrot.slane %v2746_v4, 4  ;;  %v2751_v45 = vrot.slane %v2749_v43, 5 }
  0xa8   : > { %vm4987_vm0 = vcmp.ne.s16.totalorder %v4216_v1, 0  ;;  %v2735_v5 = vsel %vm880_vm10, %v2725_v14, %v2734_v23  ;;  %v2743_v53 = vor.u32 %v2742_v9, %v2739_v35  ;;  %v2692_v57 = vshrl.u32 %v2665_v22, 16 }
  0xa9   : > { %3636 = vmatmul.mubr.msk.bf16.gmra.mxu1 %vm993_vm3, %v4549_v17  ;;  %v2666_v31 = vsel %vm4987_vm0, 0, %v4465_v10  ;;  %v2752_v59 = vor.u32 %v2751_v45, %v2748_v29  ;;  %v2681_v17 = vor.u32 %v2680_v20, %v2677_v54  ;;  %v2695_v44 = vshll.u32 %v2665_v22, 16 }
  0xaa   : > { %3659 = vmatprep.mubr.msk.bf16.mxu1 %vm993_vm3, %v4041_v2  ;;  %v2744_v47 = vsel %vm880_vm10, %v2734_v23, %v2743_v53  ;;  %v2689_v41 = vor.u32 %v2688_v15, %v2685_v37  ;;  %v2701_v46 = vshrl.u32 %v2666_v31, 16  ;;  %v2704_v2 = vshll.u32 %v2666_v31, 16 }
  0xab   : > { %v2753_v24 = vsel %vm880_vm10, %v2743_v53, %v2752_v59  ;;  %v2694_v1 = vrot.slane %v2692_v57, 4  ;;  %v2697_v10 = vrot.slane %v2695_v44, 5  ;;  %v2667_v19 = vsel %vm1486_vm1, 0, %v4479_v34 }
  0xac   : > { %v2690_v28 = vsel %vm880_vm10, %v2681_v17, %v2689_v41  ;;  %v2703_v51 = vrot.slane %v2701_v46, 4  ;;  %v2706_v62 = vrot.slane %v2704_v2, 5  ;;  %v2710_v50 = vshrl.u32 %v2667_v19, 16 }
  0xad   : > { %3650 = vmatmul.mubr.msk.bf16.gmra.mxu0 %vm993_vm3, %v2380_v60  ;;  %v2698_v63 = vor.u32 %v2697_v10, %v2694_v1  ;;  %v2713_v36 = vshll.u32 %v2667_v19, 16 }
  0xae   : > { %3653 = vmatprep.mubr.msk.bf16.mxu0 %vm993_vm3, %v2389_v18  ;;  %v2707_v39 = vor.u32 %v2706_v62, %v2703_v51  ;;  %v2712_v55 = vrot.slane %v2710_v50, 4 }
  0xaf   : > { %v2715_v42 = vrot.slane %v2713_v36, 5 }
  0xb0   : > { %v2708_v12 = vsel %vm880_vm10, %v2698_v63, %v2707_v39 }
  0xb1   : > { %3660 = vmatmul.mubr.msk.bf16.vlgmr.msra.gmra.mxu1 %vm993_vm3, %v4046_v3  ;;  %v2699_v3 = vsel %vm880_vm10, %v2689_v41, %v2698_v63 }
  0xb2   : > { %3663 = vmatprep.mubr.msk.bf16.mxu1 %vm993_vm3, %v3971_v30  ;;  %v2716_v30 = vor.u32 %v2715_v42, %v2712_v55 }
  0xb4   : > { %v2717_v34 = vsel %vm880_vm10, %v2707_v39, %v2716_v30 }
  0xb5   : > { %3654 = vmatmul.mubr.msk.bf16.gmra.mxu0 %vm993_vm3, %v2398_v7  ;;  %v2726_v7 = vsel %vm880_vm10, %v2716_v30, %v2725_v14 }
  0xb6   : > { %3677 = vmatprep.mubr.msk.bf16.mxu0 %vm993_vm3, %v2690_v28 }
  0xb9   : > { %3664 = vmatmul.mubr.msk.bf16.gmra.mxu1 %vm993_vm3, %v3978_v33 }
  0xba   : > { %3667 = vmatprep.mubr.msk.bf16.mxu1 %vm993_vm3, %v4004_v48 }
  0xbd   : > { %3678 = vmatmul.mubr.msk.bf16.vlgmr.msra.gmra.mxu0 %vm993_vm3, %v2699_v3 }
  0xbe   : > { %3681 = vmatprep.mubr.msk.bf16.mxu0 %vm993_vm3, %v2708_v12 }
  0xc1   : > { %3668 = vmatmul.mubr.msk.bf16.gmra.mxu1 %vm993_vm3, %v4025_v56 }
  0xc2   : > { %3671 = vmatprep.mubr.msk.bf16.mxu1 %vm993_vm3, %v4500_v38 }
  0xc5   : > { %3682 = vmatmul.mubr.msk.bf16.gmra.mxu0 %vm993_vm3, %v2717_v34 }
  0xc6   : > { %3685 = vmatprep.mubr.msk.bf16.mxu0 %vm993_vm3, %v2726_v7 }
  0xc9   : > { %3672 = vmatmul.mubr.msk.bf16.gmra.mxu1 %vm993_vm3, %v4586_v0 }
  0xcd   : > { %3686 = vmatmul.mubr.msk.bf16.gmra.mxu0 %vm993_vm3, %v2735_v5 }
  0xce   : > { %3689 = vmatprep.mubr.msk.bf16.mxu0 %vm993_vm3, %v2744_v47 }
  0xd5   : > { %3690 = vmatmul.mubr.msk.bf16.gmra.mxu0 %vm993_vm3, %v2753_v24  ;;  %vm3055_vm3 = vcmask 1040384  }
  0xda   : > { %v3543_v33 = vpop.f32.mrf.mxu1 }
  0xdc   : > { %v1087_v48 = vpop.f32.mrf.mxu1 }
  0xde   : > { %v3544_v56 = vpop.f32.mrf.mxu1 }
  0xe0   : > { %v1090_v58 = vpop.f32.mrf.mxu1 }
  0xe2   : > { %v4638_v22 = vpop.f32.mrf.mxu1 }
  0xe4   : > { %v4640_v38 = vpop.f32.mrf.mxu1 }
  0xe6   : > { %v4642_v21 = vpop.f32.mrf.mxu1 }
  0xe8   : > { %v1106_v49 = vpop.f32.mrf.mxu1 }
  0xe9   : > { %v3535_v40 = vpop.f32.mrf.mxu0 }
  0xeb   : > { %v1055_v8 = vpop.f32.mrf.mxu0 }
  0xed   : > { %v3536_v52 = vpop.f32.mrf.mxu0 }
  0xef   : > { %v1058_v14 = vpop.f32.mrf.mxu0 }
  0xf1   : > { %v3539_v13 = vpop.f32.mrf.mxu0 }
  0xf3   : > { %v3553_v11 = vpop.f32.mrf.mxu1  ;;  %v1071_v6 = vpop.f32.mrf.mxu0 }
  0xf4   : > { %v1269_v0 = vadd.f32 %v3553_v11, %v3535_v40 }
  0xf5   : > { %v1260_v16 = vpop.f32.mrf.mxu1  ;;  %v3540_v32 = vpop.f32.mrf.mxu0 }
  0xf6   : > { %v1261_v27 = vadd.f32 %v1260_v16, %v1055_v8 }
  0xf7   : > { %v3554_v60 = vpop.f32.mrf.mxu1  ;;  %v1074_v18 = vpop.f32.mrf.mxu0 }
  0xf8   : > { %v1272_v26 = vadd.f32 %v3554_v60, %v3536_v52 }
  0xf9   : > { %v1263_v61 = vpop.f32.mrf.mxu1 }
  0xfa   : > { %v1264_v25 = vadd.f32 %v1263_v61, %v1058_v14 }
 0x10a   : > { %v3557_v54 = vpop.f32.mrf.mxu1 }
 0x10b   : > { %v1285_v4 = vadd.f32 %v3557_v54, %v3539_v13 }
 0x10c   : > { %v1276_v43 = vpop.f32.mrf.mxu1 }
 0x10d   : > { %v3571_v20 = vpop.f32.mrf.mxu0  ;;  %v1277_v23 = vadd.f32 %v1276_v43, %v1071_v6 }
 0x10e   : > { %v4644_v35 = vadd.f32 %v3571_v20, %v1269_v0  ;;  %v3558_v9 = vpop.f32.mrf.mxu1 }
 0x10f   : > { %v1643_v37 = vpop.f32.mrf.mxu0  ;;  %v1288_v15 = vadd.f32 %v3558_v9, %v3540_v32 }
 0x110   : > { %v4646_v29 = vadd.f32 %v1643_v37, %v1261_v27  ;;  %v1279_v45 = vpop.f32.mrf.mxu1 }
 0x111   : > { %v3572_v31 = vpop.f32.mrf.mxu0  ;;  %v1280_v5 = vadd.f32 %v1279_v45, %v1074_v18 }
 0x112   : > { %v4648_v53 = vadd.f32 %v3572_v31, %v1272_v26 }
 0x113   : > { %v1646_v59 = vpop.f32.mrf.mxu0 }
 0x114   : > { %v4650_v17 = vadd.f32 %v1646_v59, %v1264_v25 }
 0x116   : > { %v3561_v57 = vpop.f32.mrf.mxu1 }
 0x117   : > { %v1301_v44 = vadd.f32 %v3561_v57, %v3543_v33 }
 0x118   : > { %v1292_v47 = vpop.f32.mrf.mxu1 }
 0x119   : > { %v1293_v41 = vadd.f32 %v1292_v47, %v1087_v48 }
 0x11a   : > { %v3562_v46 = vpop.f32.mrf.mxu1 }
 0x11b   : > { %v1304_v2 = vadd.f32 %v3562_v46, %v3544_v56 }
 0x11c   : > { %v1295_v24 = vpop.f32.mrf.mxu1 }
 0x11d   : > { %v1296_v1 = vadd.f32 %v1295_v24, %v1090_v58 }
 0x11e   : > { %v3575_v10 = vpop.f32.mrf.mxu0 }
 0x11f   : > { %v4652_v28 = vadd.f32 %v3575_v10, %v1285_v4 }
 0x120   : > { %v1659_v51 = vpop.f32.mrf.mxu0 }
 0x121   : > { %v4654_v62 = vadd.f32 %v1659_v51, %v1277_v23 }
 0x122   : > { %v3576_v19 = vpop.f32.mrf.mxu0 }
 0x123   : > { %v4656_v63 = vadd.f32 %v3576_v19, %v1288_v15 }
 0x124   : > { %v1662_v50 = vpop.f32.mrf.mxu0  ;;  %v3565_v36 = vpop.f32.mrf.mxu1 }
 0x125   : > { %v4658_v39 = vadd.f32 %v1662_v50, %v1280_v5  ;;  %v1317_v8 = vadd.f32 %v3565_v36, %v4638_v22 }
 0x126   : > { %v1308_v3 = vpop.f32.mrf.mxu1 }
 0x128   : > { %v3566_v55 = vpop.f32.mrf.mxu1 }
 0x129   : > { %v1320_v14 = vadd.f32 %v3566_v55, %v4642_v21 }
 0x12a   : > { %v1311_v42 = vpop.f32.mrf.mxu1 }
 0x12b   : > { %v1312_v12 = vadd.f32 %v1311_v42, %v1106_v49  ;;  %v1309_v49 = vadd.f32 %v1308_v3, %v4640_v38 }
 0x12d   : > { %v3579_v30 = vpop.f32.mrf.mxu0 }
 0x12e   : > { %v4660_v34 = vadd.f32 %v3579_v30, %v1301_v44 }
 0x12f   : > { %v1675_v7 = vpop.f32.mrf.mxu0 }
 0x130   : > { %v4662_v33 = vadd.f32 %v1675_v7, %v1293_v41 }
 0x131   : > { %v3580_v48 = vpop.f32.mrf.mxu0  ;;  %v4666_v40 = vpop.f32.mrf.mxu1 }
 0x132   : > { %v4664_v56 = vadd.f32 %v3580_v48, %v1304_v2 }
 0x133   : > { %v1678_v58 = vpop.f32.mrf.mxu0  ;;  %v4671_v0 = vpop.f32.mrf.mxu1 }
 0x134   : > { %v4669_v11 = vadd.f32 %v1678_v58, %v1296_v1 }
 0x135   : > { %v3583_v52 = vpop.f32.mrf.mxu0  ;;  %v4676_v60 = vpop.f32.mrf.mxu1 }
 0x136   : > { %v4674_v16 = vadd.f32 %v3583_v52, %v1317_v8 }
 0x137   : > { %v1691_v27 = vpop.f32.mrf.mxu0  ;;  %v4681_v25 = vpop.f32.mrf.mxu1 }
 0x138   : > { %v4679_v26 = vadd.f32 %v1691_v27, %v1309_v49 }
 0x139   : > { %v3584_v61 = vpop.f32.mrf.mxu0  ;;  %v4685_v6 = vpop.f32.mrf.mxu1 }
 0x13a   : > { %v4683_v22 = vadd.f32 %v3584_v61, %v1320_v14 }
 0x13b   : > { %v1694_v13 = vpop.f32.mrf.mxu0  ;;  %v4691_v18 = vpop.f32.mrf.mxu1 }
 0x13c   : > { %v4687_v32 = vadd.f32 %v1694_v13, %v1312_v12 }
 0x13d   : > { %v4689_v38 = vpop.f32.mrf.mxu0  ;;  %v4695_v4 = vpop.f32.mrf.mxu1 }
 0x13f   : > { %v4693_v54 = vpop.f32.mrf.mxu0  ;;  %v4699_v43 = vpop.f32.mrf.mxu1 }
 0x141   : > { %v4697_v21 = vpop.f32.mrf.mxu0  ;;  %v4703_v23 = vpop.f32.mrf.mxu1 }
 0x143   : > { %v4701_v20 = vpop.f32.mrf.mxu0  ;;  %v4707_v37 = vpop.f32.mrf.mxu1 }
 0x145   : > { %v4705_v9 = vpop.f32.mrf.mxu0  ;;  %v4711_v45 = vpop.f32.mrf.mxu1 }
 0x147   : > { %v4709_v15 = vpop.f32.mrf.mxu0  ;;  %v4715_v5 = vpop.f32.mrf.mxu1 }
 0x149   : > { %v4713_v31 = vpop.f32.mrf.mxu0  ;;  %v4719_v57 = vpop.f32.mrf.mxu1 }
 0x14b   : > { %v4717_v59 = vpop.f32.mrf.mxu0  ;;  %v4723_v47 = vpop.f32.mrf.mxu1 }
 0x14d   : > { %v4721_v44 = vpop.f32.mrf.mxu0  ;;  %v4727_v46 = vpop.f32.mrf.mxu1 }
 0x14f   : > { %v4725_v41 = vpop.f32.mrf.mxu0  ;;  %v4731_v24 = vpop.f32.mrf.mxu1 }
 0x151   : > { %v4729_v2 = vpop.f32.mrf.mxu0  ;;  %v3625_v10 = vpop.f32.mrf.mxu1 }
 0x153   : > { %v4733_v1 = vpop.f32.mrf.mxu0  ;;  %v2229_v19 = vpop.f32.mrf.mxu1 }
 0x155   : > { %v4735_v51 = vpop.f32.mrf.mxu0  ;;  %v3626_v36 = vpop.f32.mrf.mxu1 }
 0x157   : > { %v4737_v50 = vpop.f32.mrf.mxu0  ;;  %v4741_v55 = vpop.f32.mrf.mxu1 }
 0x158   : > { %4988 = vst [vmem:[#allocation2_spill] sm:$0xff] %v4737_v50 }
 0x159   : > { %v4739_v3 = vpop.f32.mrf.mxu0  ;;  %v4745_v12 = vpop.f32.mrf.mxu1 }
 0x15a   : > { %4989 = vst [vmem:[#allocation3_spill] sm:$0xff] %v4739_v3  ;;  %4991 = vst [vmem:[#allocation5_spill] sm:$0xff] %v4745_v12 }
 0x15b   : > { %v4743_v42 = vpop.f32.mrf.mxu0  ;;  %v4747_v7 = vpop.f32.mrf.mxu1 }
 0x15c   : > { %4990 = vst [vmem:[#allocation4_spill] sm:$0xff] %v4743_v42  ;;  %4992 = vst [vmem:[#allocation6_spill] sm:$0xff] %v4747_v7 }
 0x15d   : > { %v3643_v30 = vpop.f32.mrf.mxu0  ;;  %v4749_v58 = vpop.f32.mrf.mxu1 }
 0x15e   : > { %4993 = vst [vmem:[#allocation7_spill] sm:$0xff] %v4749_v58 }
 0x15f   : > { %v2460_v48 = vpop.f32.mrf.mxu0  ;;  %v4751_v52 = vpop.f32.mrf.mxu1 }
 0x160   : > { %4994 = vst [vmem:[#allocation8_spill] sm:$0xff] %v4751_v52 }
 0x161   : > { %v3644_v8 = vpop.f32.mrf.mxu0  ;;  %v4755_v27 = vpop.f32.mrf.mxu1 }
 0x162   : > { %4995 = vst [vmem:[#allocation9_spill] sm:$0xff] %v4755_v27 }
 0x163   : > { %v4753_v49 = vpop.f32.mrf.mxu0  ;;  %v4759_v61 = vpop.f32.mrf.mxu1 }
 0x164   : > { %4997 = vst [vmem:[#allocation11_spill] sm:$0xff] %v4759_v61 }
 0x165   : > { %v4757_v14 = vpop.f32.mrf.mxu0  ;;  %v4763_v42 = vpop.f32.mrf.mxu1 }
 0x166   : > { %4996 = vst [vmem:[#allocation10_spill] sm:$0xff] %v4757_v14  ;;  %4999 = vst [vmem:[#allocation13_spill] sm:$0xff] %v4763_v42 }
 0x167   : > { %v4761_v13 = vpop.f32.mrf.mxu0  ;;  %v4767_v7 = vpop.f32.mrf.mxu1 }
 0x168   : > { %4998 = vst [vmem:[#allocation12_spill] sm:$0xff] %v4761_v13  ;;  %5001 = vst [vmem:[#allocation15_spill] sm:$0xff] %v4767_v7 }
 0x169   : > { %v4765_v3 = vpop.f32.mrf.mxu0  ;;  %v4771_v12 = vpop.f32.mrf.mxu1 }
 0x16a   : > { %5000 = vst [vmem:[#allocation14_spill] sm:$0xff] %v4765_v3  ;;  %5003 = vst [vmem:[#allocation17_spill] sm:$0xff] %v4771_v12  ;;  %v1939_v12 = vadd.f32 %v4666_v40, %v4644_v35  ;;  %v1941_v35 = vadd.f32 %v4691_v18, %v4654_v62 }
 0x16b   : > { %v4769_v58 = vpop.f32.mrf.mxu0  ;;  %v4775_v50 = vpop.f32.mrf.mxu1 }
 0x16c   : > { %5002 = vst [vmem:[#allocation16_spill] sm:$0xff] %v4769_v58  ;;  %5004 = vst [vmem:[#allocation18_spill] sm:$0xff] %v4775_v50  ;;  %v1937_v50 = vadd.f32 %v4671_v0, %v4646_v29  ;;  %v1944_v29 = vadd.f32 %v4695_v4, %v4656_v63  ;;  %v1945_v63 = vadd.f32 %v4707_v37, %v4662_v33 }
 0x16d   : > { %v4773_v52 = vpop.f32.mrf.mxu0  ;;  %v4779_v14 = vpop.f32.mrf.mxu1  ;;  %v2065_v18 = vadd.f32 %v4709_v15, %v1941_v35  ;;  %v1951_v33 = vadd.f32 %v4719_v57, %v4674_v16  ;;  %v1950_v16 = vadd.f32 %v4731_v24, %v4687_v32  ;;  %v4851_v32 = vld [vmem:[%s4941_s4] ss:$0 sm:$0xff] }
 0x16e   : > { %5006 = vst [vmem:[#allocation20_spill] sm:$0xff] %v4779_v14  ;;  %v1938_v14 = vadd.f32 %v4681_v25, %v4650_v17  ;;  %v2061_v40 = vadd.f32 %v4693_v54, %v1937_v50  ;;  %v1942_v17 = vadd.f32 %v4699_v43, %v4658_v39  ;;  %v1947_v25 = vadd.f32 %v4703_v23, %v4660_v34 }
 0x16f   : > { %v4777_v27 = vpop.f32.mrf.mxu0  ;;  %v4783_v13 = vpop.f32.mrf.mxu1  ;;  %v1948_v39 = vadd.f32 %v4711_v45, %v4664_v56  ;;  %v2068_v54 = vadd.f32 %v4713_v31, %v1944_v29  ;;  %v1946_v34 = vadd.f32 %v4715_v5, %v4669_v11  ;;  %v1949_v56 = vadd.f32 %v4723_v47, %v4679_v26 }
 0x170   : > { %5005 = vst [vmem:[#allocation19_spill] sm:$0xff] %v4777_v27  ;;  %5008 = vst [vmem:[#allocation22_spill] sm:$0xff] %v4783_v13  ;;  %v1940_v27 = vadd.f32 %v4676_v60, %v4648_v53  ;;  %v2062_v0 = vadd.f32 %v4701_v20, %v1938_v14  ;;  %v2071_v37 = vadd.f32 %v4721_v44, %v1947_v25 }
 0x171   : > { %v4781_v61 = vpop.f32.mrf.mxu0  ;;  %v3661_v3 = vpop.f32.mrf.mxu1  ;;  %v2069_v5 = vadd.f32 %v4725_v41, %v1945_v63  ;;  %v2072_v50 = vadd.f32 %v4729_v2, %v1948_v39  ;;  %v5011_v41 = vld [vmem:[#allocation2_spill] sm:$0xff]  ;;  %v5020_v63 = vld [vmem:[#allocation12_spill] sm:$0xff] }
 0x172   : > { %5007 = vst [vmem:[#allocation21_spill] sm:$0xff] %v4781_v61  ;;  %v2064_v53 = vadd.f32 %v4697_v21, %v1940_v27  ;;  %v2293_v31 = vadd.f32 %v4741_v55, %v2062_v0  ;;  %v5016_v27 = vld [vmem:[#allocation7_spill] sm:$0xff] }
 0x173   : > { %v4785_v42 = vpop.f32.mrf.mxu0  ;;  %v2584_v58 = vpop.f32.mrf.mxu1  ;;  %v2299_v14 = vadd.f32 %v5016_v27, %v2068_v54 }
 0x174   : > { %5009 = vst [vmem:[#allocation23_spill] sm:$0xff] %v4785_v42  ;;  %v1943_v42 = vadd.f32 %v4685_v6, %v4652_v28  ;;  %v2295_v43 = vadd.f32 %v3626_v36, %v2064_v53  ;;  %v2524_v26 = vadd.f32 %v4753_v49, %v2293_v31  ;;  %v5024_v31 = vld [vmem:[#allocation16_spill] sm:$0xff] }
 0x175   : > { %v4787_v7 = vpop.f32.mrf.mxu0  ;;  %v3662_v13 = vpop.f32.mrf.mxu1 }
 0x176   : > { %5010 = vst [vmem:[#allocation24_spill] sm:$0xff] %v4787_v7  ;;  %v2063_v7 = vadd.f32 %v4689_v38, %v1939_v12  ;;  %v2067_v62 = vadd.f32 %v4705_v9, %v1943_v42  ;;  %v2292_v38 = vadd.f32 %v2229_v19, %v2061_v40  ;;  %v2066_v9 = vadd.f32 %v4717_v59, %v1942_v17  ;;  %v5018_v40 = vld [vmem:[#allocation10_spill] sm:$0xff] }
 0x177   : > { %v4797_v61 = vpop.f32.mrf.mxu0  ;;  %v2587_v28 = vpop.f32.mrf.mxu1  ;;  %v1952_v59 = vadd.f32 %v4727_v46, %v4683_v22  ;;  %v4842_v42 = vadd.f32 %v4735_v51, %v1951_v33  ;;  %v4845_v12 = vadd.f32 %v5011_v41, %v1949_v56  ;;  %v5012_v22 = vld [vmem:[#allocation5_spill] sm:$0xff] }
 0x178   : > { %v2294_v6 = vadd.f32 %v3625_v10, %v2063_v7  ;;  %v2523_v23 = vadd.f32 %v2460_v48, %v2292_v38  ;;  %v2526_v10 = vadd.f32 %v3644_v8, %v2295_v43  ;;  %v2298_v46 = vadd.f32 %v5012_v22, %v2067_v62  ;;  %v5014_v48 = vld [vmem:[#allocation4_spill] sm:$0xff]  ;;  %v5015_v8 = vld [vmem:[#allocation6_spill] sm:$0xff]  ;;  %v5023_v33 = vld [vmem:[#allocation13_spill] sm:$0xff] }
 0x179   : > { %v4811_v60 = vpop.f32.mrf.mxu0  ;;  %v3665_v21 = vpop.f32.mrf.mxu1  ;;  %v2648_v51 = vadd.f32 %v2587_v28, %v2524_v26  ;;  %v2296_v49 = vadd.f32 %v5015_v8, %v2065_v18  ;;  %v5019_v28 = vld [vmem:[#allocation9_spill] sm:$0xff]  ;;  %v5021_v18 = vld [vmem:[#allocation14_spill] sm:$0xff]  ;;  %v2303_v56 = vadd.f32 %v5023_v33, %v2072_v50 }
 0x17a   : > { %v2525_v20 = vadd.f32 %v3643_v30, %v2294_v6  ;;  %v2647_v11 = vadd.f32 %v2584_v58, %v2523_v23  ;;  %v2650_v47 = vadd.f32 %v3662_v13, %v2526_v10  ;;  %v5013_v30 = vld [vmem:[#allocation3_spill] sm:$0xff]  ;;  %v5017_v13 = vld [vmem:[#allocation8_spill] sm:$0xff]  ;;  %v2529_v29 = vadd.f32 %v5018_v40, %v2298_v46 }
 0x17b   : > { %v4822_v4 = vpop.f32.mrf.mxu0  ;;  %v2600_v45 = vpop.f32.mrf.mxu1  ;;  %v4854_v7 = vadd.f32 %v5013_v30, %v1952_v59  ;;  %v2297_v35 = vadd.f32 %v5017_v13, %v2066_v9  ;;  %v2302_v38 = vadd.f32 %v5019_v28, %v2071_v37  ;;  %v2527_v39 = vadd.f32 %v5020_v63, %v2296_v49  ;;  %v5022_v23 = vld [vmem:[#allocation11_spill] sm:$0xff] }
 0x17c   : > { %v2649_v19 = vadd.f32 %v3661_v3, %v2525_v20  ;;  %v2070_v3 = vadd.f32 %v4733_v1, %v1946_v34  ;;  %v4857_v1 = vadd.f32 %v5014_v48, %v1950_v16  ;;  %v2530_v34 = vadd.f32 %v5021_v18, %v2299_v14 }
 0x17d   : > { %v3679_v15 = vpop.f32.mrf.mxu0  ;;  %v3666_v44 = vpop.f32.mrf.mxu1  ;;  %v2653_v54 = vadd.f32 %v3665_v21, %v2529_v29  ;;  %v2300_v9 = vadd.f32 %v5022_v23, %v2069_v5  ;;  %v2528_v10 = vadd.f32 %v5024_v31, %v2297_v35  ;;  %v2533_v50 = vadd.f32 %v4773_v52, %v2302_v38  ;;  %v5031_v23 = vld [vmem:[#allocation23_spill] sm:$0xff]  ;;  %v5032_v31 = vld [vmem:[#allocation22_spill] sm:$0xff] }
 0x17e   : > { %v2880_v36 = vadd.f32 %v3679_v15, %v2649_v19  ;;  %v2651_v19 = vadd.f32 %v2600_v45, %v2527_v39 }
 0x17f   : > { %v2815_v57 = vpop.f32.mrf.mxu0  ;;  %v2603_v24 = vpop.f32.mrf.mxu1 }
 0x180   : > { %v2878_v55 = vadd.f32 %v2815_v57, %v2647_v11  ;;  %v2903_v0 = vadd.f32 %v4851_v32, %v2880_v36  ;;  %v2654_v11 = vadd.f32 %v3666_v44, %v2530_v34  ;;  %v2652_v30 = vadd.f32 %v2603_v24, %v2528_v10  ;;  %v5027_v24 = vld [vmem:[#allocation17_spill] sm:$0xff]  ;;  %v5029_v34 = vld [vmem:[#allocation18_spill] sm:$0xff] }
 0x181   : > { %v3680_v2 = vpop.f32.mrf.mxu0  ;;  %v3669_v17 = vpop.f32.mrf.mxu1  ;;  %v2306_v29 = vadd.f32 %v5027_v24, %v4842_v42  ;;  %v2305_v10 = vadd.f32 %v5032_v31, %v4857_v1 }
 0x182   : > { %v2881_v58 = vadd.f32 %v3680_v2, %v2650_v47  ;;  %v2901_v25 = vadd.f32 %v4851_v32, %v2878_v55  ;;  %v5025_v55 = vld [vmem:[#allocation15_spill] sm:$0xff]  ;;  %v3020_v41 = vmul.f32 %v2903_v0, %v2903_v0 }
 0x183   : > { %v2818_v53 = vpop.f32.mrf.mxu0  ;;  %v2616_v20 = vpop.f32.mrf.mxu1  ;;  %v2301_v5 = vadd.f32 %v5025_v55, %v2070_v3 }
 0x184   : > { %v2904_v62 = vadd.f32 %v4851_v32, %v2881_v58  ;;  %v2879_v6 = vadd.f32 %v2818_v53, %v2648_v51  ;;  %v3018_v57 = vmul.f32 %v2901_v25, %v2901_v25  ;;  %v5026_v51 = vld [vmem:[#allocation19_spill] sm:$0xff]  ;;  %v5028_v53 = vld [vmem:[#allocation21_spill] sm:$0xff] }
 0x185   : > { %v3683_v43 = vpop.f32.mrf.mxu0  ;;  %v3670_v16 = vpop.f32.mrf.mxu1  ;;  %v2531_v58 = vadd.f32 %v5026_v51, %v2300_v9  ;;  %v2532_v9 = vadd.f32 %v5031_v23, %v2301_v5 }
 0x186   : > { %v3411_v15 = vpack.c.bf16 %v2904_v62, %v2903_v0  ;;  %v2902_v37 = vadd.f32 %v4851_v32, %v2879_v6  ;;  %v2884_v21 = vadd.f32 %v3683_v43, %v2653_v54  ;;  %v3021_v8 = vmul.f32 %v2904_v62, %v2904_v62 }
 0x187   : > { %v2831_v59 = vpop.f32.mrf.mxu0  ;;  %v2619_v2 = vpop.f32.mrf.mxu1  ;;  %v2655_v6 = vadd.f32 %v2616_v20, %v2531_v58  ;;  %v2304_v54 = vadd.f32 %v5029_v34, %v4845_v12 }
 0x188   : > { %3443 = vst [vmem:[%s4873_s20 + $0x8] sm:$0xff] %v3411_v15   ;;  %v3406_v26 = vpack.c.bf16 %v2902_v37, %v2901_v25  ;;  %v2997_v47 = vadd.f32 %v2902_v37, %v2901_v25  ;;  %v3019_v36 = vmul.f32 %v2902_v37, %v2902_v37  ;;  %v2882_v22 = vadd.f32 %v2831_v59, %v2651_v19 }
 0x189   : > { %v3684_v46 = vpop.f32.mrf.mxu0  ;;  %v2907_v49 = vadd.f32 %v4851_v32, %v2884_v21  ;;  %v3673_v3 = vpop.f32.mrf.mxu1  ;;  %v2657_v25 = vadd.f32 %v3669_v17, %v2533_v50 }
 0x18a   : > { %3407 = vst [vmem:[%s4873_s20] sm:$0xff] %v3406_v26   ;;  %v2998_v45 = vadd.f32 %v2997_v47, %v2903_v0  ;;  %v3034_v44 = vadd.f32 %v3019_v36, %v3018_v57  ;;  %v2885_v48 = vadd.f32 %v3684_v46, %v2654_v11  ;;  %v2905_v27 = vadd.f32 %v4851_v32, %v2882_v22 }
 0x18b   : > { %v2834_v14 = vpop.f32.mrf.mxu0  ;;  %v2534_v0 = vadd.f32 %v5028_v53, %v2303_v56  ;;  %v2632_v33 = vpop.f32.mrf.mxu1  ;;  %v2535_v57 = vadd.f32 %v4797_v61, %v2304_v54  ;;  %v2656_v26 = vadd.f32 %v2619_v2, %v2532_v9  ;;  %v3024_v36 = vmul.f32 %v2907_v49, %v2907_v49 }
 0x18c   : > { %v3035_v13 = vadd.f32 %v3034_v44, %v3020_v41  ;;  %v2999_v52 = vadd.f32 %v2998_v45, %v2904_v62  ;;  %v2908_v35 = vadd.f32 %v4851_v32, %v2885_v48  ;;  %v2883_v40 = vadd.f32 %v2834_v14, %v2652_v30  ;;  %v5030_v62 = vld [vmem:[#allocation20_spill] sm:$0xff] }
 0x18d   : > { %v3687_v28 = vpop.f32.mrf.mxu0  ;;  %v3022_v63 = vmul.f32 %v2905_v27, %v2905_v27  ;;  %v2307_v43 = vadd.f32 %v5030_v62, %v4854_v7  ;;  %v2658_v20 = vadd.f32 %v3670_v16, %v2534_v0  ;;  %v5033_v7 = vld [vmem:[#allocation24_spill] sm:$0xff]  ;;  %v3674_v50 = vpop.f32.mrf.mxu1  ;;  %v2536_v61 = vadd.f32 %v4822_v4, %v2305_v10 }
 0x18e   : > { %v3000_v38 = vadd.f32 %v2999_v52, %v2905_v27  ;;  %v3036_v39 = vadd.f32 %v3035_v13, %v3021_v8  ;;  %v3421_v18 = vpack.c.bf16 %v2908_v35, %v2907_v49  ;;  %v2906_v42 = vadd.f32 %v4851_v32, %v2883_v40 }
 0x18f   : > { %v2847_v56 = vpop.f32.mrf.mxu0  ;;  %v2888_v15 = vadd.f32 %v3687_v28, %v2657_v25  ;;  %v2537_v59 = vadd.f32 %v5033_v7, %v2306_v29  ;;  %v2538_v1 = vadd.f32 %v4811_v60, %v2307_v43  ;;  %v3025_v2 = vmul.f32 %v2908_v35, %v2908_v35  ;;  %v2635_v52 = vpop.f32.mrf.mxu1 }
 0x190   : > { %v3037_v17 = vadd.f32 %v3036_v39, %v3022_v63  ;;  %3445 = vst [vmem:[%s4873_s20 + $0x18] sm:$0xff] %v3421_v18   ;;  %v2886_v37 = vadd.f32 %v2847_v56, %v2655_v6  ;;  %v3416_v19 = vpack.c.bf16 %v2906_v42, %v2905_v27  ;;  %v3001_v12 = vadd.f32 %v3000_v38, %v2906_v42 }
 0x191   : > { %v3023_v11 = vmul.f32 %v2906_v42, %v2906_v42  ;;  %v3688_v21 = vpop.f32.mrf.mxu0  ;;  %v2911_v22 = vadd.f32 %v4851_v32, %v2888_v15  ;;  %v2661_v51 = vadd.f32 %v3673_v3, %v2537_v59  ;;  %v2659_v58 = vadd.f32 %v2632_v33, %v2535_v57 }
 0x192   : > { %v2889_v47 = vadd.f32 %v3688_v21, %v2658_v20  ;;  %3444 = vst [vmem:[%s4873_s20 + $0x10] sm:$0xff] %v3416_v19   ;;  %v3002_v55 = vadd.f32 %v3001_v12, %v2907_v49  ;;  %v2909_v5 = vadd.f32 %v4851_v32, %v2886_v37  ;;  %v2662_v13 = vadd.f32 %v3674_v50, %v2538_v1 }
 0x193   : > { %v3038_v16 = vadd.f32 %v3037_v17, %v3023_v11  ;;  %v2850_v41 = vpop.f32.mrf.mxu0  ;;  %v2660_v3 = vadd.f32 %v2635_v52, %v2536_v61  ;;  %v3028_v28 = vmul.f32 %v2911_v22, %v2911_v22 }
 0x194   : > { %v2912_v46 = vadd.f32 %v4851_v32, %v2889_v47  ;;  %v2887_v30 = vadd.f32 %v2850_v41, %v2656_v26  ;;  %v3003_v44 = vadd.f32 %v3002_v55, %v2908_v35  ;;  %v3026_v60 = vmul.f32 %v2909_v5, %v2909_v5 }
 0x195   : > { %v3039_v45 = vadd.f32 %v3038_v16, %v3024_v36  ;;  %v3691_v48 = vpop.f32.mrf.mxu0 }
 0x196   : > { %v3431_v8 = vpack.c.bf16 %v2912_v46, %v2911_v22  ;;  %v2910_v49 = vadd.f32 %v4851_v32, %v2887_v30  ;;  %v3004_v27 = vadd.f32 %v3003_v44, %v2909_v5  ;;  %v2892_v4 = vadd.f32 %v3691_v48, %v2661_v51 }
 0x197   : > { %v3040_v14 = vadd.f32 %v3039_v45, %v3025_v2  ;;  %v2863_v40 = vpop.f32.mrf.mxu0  ;;  %v3029_v43 = vmul.f32 %v2912_v46, %v2912_v46 }
 0x198   : > { %3447 = vst [vmem:[%s4873_s20 + $0x28] sm:$0xff] %v3431_v8   ;;  %v3426_v24 = vpack.c.bf16 %v2910_v49, %v2909_v5  ;;  %v3027_v29 = vmul.f32 %v2910_v49, %v2910_v49  ;;  %v2890_v53 = vadd.f32 %v2863_v40, %v2659_v58  ;;  %v3005_v35 = vadd.f32 %v3004_v27, %v2910_v49 }
 0x199   : > { %v3041_v0 = vadd.f32 %v3040_v14, %v3026_v60  ;;  %v3692_v25 = vpop.f32.mrf.mxu0  ;;  %v2915_v34 = vadd.f32 %v4851_v32, %v2892_v4 }
 0x19a   : > { %3446 = vst [vmem:[%s4873_s20 + $0x20] sm:$0xff] %v3426_v24   ;;  %v2893_v6 = vadd.f32 %v3692_v25, %v2662_v13  ;;  %v3006_v38 = vadd.f32 %v3005_v35, %v2911_v22  ;;  %v2913_v39 = vadd.f32 %v4851_v32, %v2890_v53 }
 0x19b   : > { %v3042_v63 = vadd.f32 %v3041_v0, %v3027_v29  ;;  %v2866_v18 = vpop.f32.mrf.mxu0  ;;  %v3032_v19 = vmul.f32 %v2915_v34, %v2915_v34 }
 0x19c   : > { %v2916_v54 = vadd.f32 %v4851_v32, %v2893_v6  ;;  %v2891_v62 = vadd.f32 %v2866_v18, %v2660_v3  ;;  %v3007_v9 = vadd.f32 %v3006_v38, %v2912_v46  ;;  %v3030_v17 = vmul.f32 %v2913_v39, %v2913_v39 }
 0x19d   : > { %v3043_v23 = vadd.f32 %v3042_v63, %v3028_v28 }
 0x19e   : > { %v3441_v42 = vpack.c.bf16 %v2916_v54, %v2915_v34  ;;  %v2914_v33 = vadd.f32 %v4851_v32, %v2891_v62  ;;  %v3008_v56 = vadd.f32 %v3007_v9, %v2913_v39  ;;  %v3033_v21 = vmul.f32 %v2916_v54, %v2916_v54 }
 0x19f   : > { %v3044_v20 = vadd.f32 %v3043_v23, %v3029_v43 }
 0x1a0   : > { %3449 = vst [vmem:[%s4873_s20 + $0x38] sm:$0xff] %v3441_v42   ;;  %v3436_v15 = vpack.c.bf16 %v2914_v33, %v2913_v39  ;;  %v3031_v37 = vmul.f32 %v2914_v33, %v2914_v33  ;;  %v3009_v10 = vadd.f32 %v3008_v56, %v2914_v33 }
 0x1a1   : > { %v3045_v31 = vadd.f32 %v3044_v20, %v3030_v17 }
 0x1a2   : > { %3448 = vst [vmem:[%s4873_s20 + $0x30] sm:$0xff] %v3436_v15   ;;  %v3010_v12 = vadd.f32 %v3009_v10, %v2915_v34 }
 0x1a3   : > { %v3046_v11 = vadd.f32 %v3045_v31, %v3031_v37 }
 0x1a4   : > { %v3011_v7 = vadd.f32 %v3010_v12, %v2916_v54 }
 0x1a5   : > { %v3047_v59 = vadd.f32 %v3046_v11, %v3032_v19 }
 0x1a6   : > { %v3012_v57 = vrot.slane %v3011_v7, 4 }
 0x1a7   : > { %v3048_v32 = vadd.f32 %v3047_v59, %v3033_v21 }
 0x1a8   : > { %v3013_v26 = vadd.f32 %v3012_v57, %v3011_v7 }
 0x1a9   : > { %v3049_v47 = vrot.slane %v3048_v32, 4 }
 0x1aa   : > { %v3014_v36 = vrot.slane %v3013_v26, 2 }
 0x1ab   : > { %v3050_v55 = vadd.f32 %v3049_v47, %v3048_v32 }
 0x1ac   : > { %v3015_v16 = vadd.f32 %v3014_v36, %v3013_v26 }
 0x1ad   : > { %v3051_v5 = vrot.slane %v3050_v55, 2 }
 0x1ae   : > { %v3016_v50 = vrot.slane %v3015_v16, 1 }
 0x1af   : > { %v3052_v41 = vadd.f32 %v3051_v5, %v3050_v55 }
 0x1b0   : > { %v3017_v22 = vadd.f32 %v3016_v50, %v3015_v16 }
 0x1b1   : > { %v3053_v1 = vrot.slane %v3052_v41, 1 }
 0x1b3   : > { %v3054_v46 = vadd.f32 %v3053_v1, %v3052_v41 }
 0x1b5   : > { %v3056_v30 = vsel %vm3055_vm3, %v3017_v22, %v3054_v46 }
 0x1b6   : > { %3057 = vst [vmem:[%s439_s28] sm:$0x3] %v3056_v30 }
 0x1b7 PF: > { %s17_s25 = sadd.s32 1, %s3801_s25   ;;  %s5034_s21 = smov %s3793_s23 }
 0x1b8   : > { %p14_p0 = scmp.ge.s32.totalorder %s17_s25, 6   ;;  %s5035_s22 = smov %s3797_s24 }
 0x1b9   : > { %s5036_s23 = smov %s5039_s26  ;;  %s5037_s24 = smov %s5043_s27 }
 0x1ba   :  { %16 = sbr.rel (!%p14_p0) target bundleno = 3 (0x3), region = 96 }

// kernel: double_conv.3
= control target key start
LH: loop header
LB: loop body
LE: loop exit
PB: predicated region body
PF: predicated region fallthrough
CT: control target
= control target key end

     0   :  { %s4808_s27 = smov 0   ;;  %s4810_s28 = smov 0   ;;  %s6000_s0 = inlined_call_operand.vmem [shape: bf16[2,256,128], index: 0, kind: input, shape index: {}, may-alias: {0,1,2}]   ;;  %s6001_s1 = inlined_call_operand.vmem [shape: bf16[2,256,128], index: 1, kind: input, shape index: {}, may-alias: {0,1,2}]   ;;  %s6002_s2 = inlined_call_operand.vmem [shape: bf16[2,256,128], index: 2, kind: input, shape index: {}, may-alias: {0,1,2}]   ;;  %s6003_s3 = inlined_call_operand.vmem [shape: bf16[9,128,128], index: 3, kind: input, shape index: {}]   ;;  %s6004_s4 = inlined_call_operand.vmem [shape: f32[1,128], index: 4, kind: input, shape index: {}]   ;;  %s6005_s5 = inlined_call_operand.vmem [shape: f32[1,128], index: 5, kind: input, shape index: {}]   ;;  %s6006_s6 = inlined_call_operand.vmem [shape: f32[1,128], index: 6, kind: input, shape index: {}]   ;;  %s6007_s7 = inlined_call_operand.vmem [shape: bf16[2,256,128], index: 7, kind: output, shape index: {0}]   ;;  %s6008_s8 = inlined_call_operand.vmem [shape: f32[2,2,2,128], index: 8, kind: output, shape index: {1}]  }
   0x1   :  { %s4812_s29 = smov 0   ;;  %s4814_s30 = smov 0  }
   0x2   :  { %s4816_s9 = smov 0  }
   0x3 LB: > { %s28_s10 = sadd.s32 1, %s4751_s29  ;;  %s31_s11 = sadd.s32 1, %s4755_s30  ;;  %s4759_s9 = sphi %s4816_s9, %s19_s9   ;;  %s4755_s30 = sphi %s4814_s30, %s6085_s30   ;;  %s4751_s29 = sphi %s4812_s29, %s6084_s29   ;;  %s4747_s28 = sphi %s4810_s28, %s6083_s28   ;;  %s4743_s27 = sphi %s4808_s27, %s6082_s27  }
   0x4   : > { %p29_p0 = scmp.ge.s32.totalorder %s28_s10, 2  ;;  %p3792_p1 = scmp.ge.s32.totalorder %s4759_s9, 1 }
   0x5   : > { %p354_p2 = scmp.lt.s32.totalorder %s4759_s9, 5 }
   0x6   : > { %s6087_s10 = smov (%p29_p0, %s28_s10), 0  ;;  %s6089_s11 = smov (!%p29_p0, %s31_s11), %s4755_s30 }
   0x7   : > { %p355_p3 = pnand %p3792_p1, %p354_p2  ;;  %p33_p4 = scmp.ge.s32.totalorder %s6089_s11, 2 }
   0x9   : > { %s6091_s11 = smov (%p33_p4, %s6089_s11), 0  ;;  %358 = sbr.rel (%p355_p3) target bundleno = 479 (0x1df), region = 48 }
   0xe   : > { %v4647_v0 = vld [vmem:[%s6003_s3 + $0x78] sm:$0xff]   ;;  %s3793_s14 = sshll.u32 %s4743_s27, 3  ;;  %v4649_v2 = vld [vmem:[%s6003_s3 + $0x70] sm:$0xff]   ;;  %p435_p6 = scmp.lt.s32.totalorder %s4747_s28, 1  ;;  %v4651_v4 = vld [vmem:[%s6003_s3 + $0x68] sm:$0xff]   ;;  %v680_v9 = vlaneseq  ;;  %vm641_vm0 = vcmask 1043456  }
   0xf   : > { %v4648_v1 = vld [vmem:[%s6003_s3 + $0x38] sm:$0xff]   ;;  %s3794_s17 = sadd.s32 4294967295, %s3793_s14  ;;  %4301 = vmatprep.subr.bf16.mxu0 %v4647_v0  ;;  %v4650_v3 = vld [vmem:[%s6003_s3 + $0x30] sm:$0xff]   ;;  %v4652_v5 = vld [vmem:[%s6003_s3 + $0x28] sm:$0xff]   ;;  %s3798_s19 = sshll.u32 %s4743_s27, 4  ;;  %vm4761_vm1 = vmmov 0  }
  0x10   : > { %p432_p5 = scmp.gt.s32.totalorder %s3794_s17, 0  ;;  %4302 = vmatpush3.bf16.msra.mxu0 %v4647_v0  ;;  %4333 = vmatprep.subr.bf16.mxu1 %v4648_v1  ;;  %s6095_s28 = smov (!%p435_p6, %s4747_s28), 1  ;;  %v4653_v6 = vld [vmem:[%s6003_s3 + $0x60] sm:$0xff]   ;;  %v4655_v8 = vld [vmem:[%s6003_s3 + $0x58] sm:$0xff]   ;;  %v4657_v11 = vld [vmem:[%s6003_s3 + $0x50] sm:$0xff]   ;;  %v4904_v17 = vshrl.u32 %v680_v9, 7 }
  0x11   : > { %4303 = vmatprep.subr.bf16.mxu0 %v4649_v2  ;;  %4334 = vmatpush3.bf16.msra.mxu1 %v4648_v1  ;;  %s4871_s15 = sshll.u32 %s6095_s28, 5  ;;  %v4654_v7 = vld [vmem:[%s6003_s3 + $0x20] sm:$0xff]   ;;  %p451_p8 = scmp.lt.s32.totalorder %s3798_s19, 31  ;;  %v4656_v10 = vld [vmem:[%s6003_s3 + $0x18] sm:$0xff]   ;;  %v4658_v18 = vld [vmem:[%s6003_s3 + $0x10] sm:$0xff]   ;;  %v6011_v25 = vmov 0  }
  0x12   : > { %s6093_s17 = smov (!%p432_p5, %s3794_s17), 0  ;;  %4335 = vmatprep.subr.bf16.mxu1 %v4650_v3  ;;  %s459_s13 = sadd.s32 8, %s3793_s14  ;;  %v4895_v13 = vld [vmem:[%s6005_s5] ss:$0 sm:$0xff]  ;;  %v4659_v19 = vld [vmem:[%s6003_s3 + $0x48] sm:$0xff]   ;;  %v682_v22 = vadd.s32 8, %v4904_v17  ;;  %vm954_vm2 = vmpackc.low %vm4761_vm1, %vm4761_vm1 }
  0x13   : > { %s3795_s26 = sshll.u32 %s6093_s17, 1  ;;  %s6099_s19 = smov (!%p451_p8, %s3798_s19), 31  ;;  %v4901_v16 = vld [vmem:[%s6006_s6] ss:$0 sm:$0xff]  ;;  %v683_v23 = vadd.s32 16, %v4904_v17  ;;  %v4929_v26 = vsel %vm954_vm2, 65537, %v6011_v25 }
  0x14   : > { %4304 = vmatpush3.bf16.msra.mxu0 %v4649_v2  ;;  %p437_p7 = scmp.lt.s32.totalorder %s3795_s26, 31  ;;  %p460_p9 = scmp.lt.s32.totalorder %s459_s13, 15  ;;  %v701_v28 = vand.u32 15, %v4904_v17  ;;  %v4934_v29 = vadd.s32 32, %v4904_v17  ;;  %v4660_v34 = vld [vmem:[%s6003_s3 + $0x8] sm:$0xff]   ;;  %v708_v35 = vand.u32 15, %v682_v22 }
  0x15   : > { %4305 = vmatprep.subr.bf16.mxu0 %v4651_v4  ;;  %4336 = vmatpush3.bf16.msra.mxu1 %v4650_v3  ;;  %s454_s21 = sadd.s32 %s4871_s15, %s6099_s19  ;;  %p621_p10 = scmp.eq.s32.totalorder %s4743_s27, 0  ;;  %v715_v38 = vand.u32 15, %v683_v23  ;;  %v4661_v46 = vld [vmem:[%s6003_s3 + $0x40] sm:$0xff]   ;;  %v4663_v2 = vld [vmem:[%s6003_s3 + $0xb8] sm:$0xff]   ;;  %vm1009_vm11 = vsmask.f32 3328 }
  0x16   : > { %4337 = vmatprep.subr.bf16.mxu1 %v4652_v5  ;;  %s6097_s26 = smov (!%p437_p7, %s3795_s26), 31  ;;  %s4909_s25 = sshll.u32 %s454_s21, 2  ;;  %vm906_vm3 = vcmp.eq.s32.totalorder %v708_v35, 15  ;;  %v4662_v51 = vld [vmem:[%s6003_s3] sm:$0xff]   ;;  %vm4963_vm6 = vcmp.eq.s32.totalorder %v701_v28, 0  ;;  %v4996_v9 = vld [vmem:[%s6003_s3 + $0xf8] sm:$0xff]  }
  0x17   : > { %s440_s17 = sadd.s32 %s4871_s15, %s6097_s26  ;;  %s4918_s18 = scalar_lea.vmem %s6001_s1, %s4909_s25  ;;  %vm1571_vm5 = vmpackc.low %vm906_vm3, %vm906_vm3  ;;  %vm891_vm8 = vcmp.eq.s32.totalorder %v715_v38, 0  ;;  %vm1304_vm13 = vsmask.f32 4352  ;;  %v4667_v50 = vld [vmem:[%s6003_s3 + $0xa8] sm:$0xff]  }
  0x18   : > { %4306 = vmatpush3.bf16.msra.mxu0 %v4651_v4  ;;  %s3797_s22 = sshll.u32 %s440_s17, 2  ;;  %s6101_s13 = smov (!%p460_p9, %s459_s13), 15  ;;  %v4068_v24 = vld [vmem:[%s4918_s18] sm:$0xff]   ;;  %v4143_v27 = vld [vmem:[%s4918_s18 + $0x8] sm:$0xff]   ;;  %v1587_v52 = vsel %vm1571_vm5, 65537, %v6011_v25  ;;  %vm953_vm7 = vmpackc.low %vm4963_vm6, %vm4963_vm6 }
  0x19   : > { %4307 = vmatprep.subr.bf16.mxu0 %v4653_v6  ;;  %4338 = vmatpush3.bf16.msra.mxu1 %v4652_v5  ;;  %s442_s26 = scalar_lea.vmem %s6000_s0, %s3797_s22  ;;  %v4069_v32 = vunpack.c.l.bf16 %v4068_v24  ;;  %v4070_v33 = vunpack.c.h.bf16 %v4068_v24  ;;  %s3802_s22 = sshll.u32 %s6101_s13, 1  ;;  %v4073_v36 = vunpack.c.l.bf16 %v4143_v27  ;;  %v4074_v37 = vunpack.c.h.bf16 %v4143_v27  ;;  %vm955_vm9 = vmpackc.low %vm891_vm8, %vm891_vm8  ;;  %v4144_v24 = vld [vmem:[%s4918_s18 + $0x10] sm:$0xff]   ;;  %v4145_v27 = vld [vmem:[%s4918_s18 + $0x18] sm:$0xff]  }
  0x1a   : > { %4339 = vmatprep.subr.bf16.mxu1 %v4654_v7  ;;  %v4064_v12 = vld [vmem:[%s442_s26] sm:$0xff]   ;;  %s622_s17 = scalar_select %p621_p10, 1, 0  ;;  %v3852_v59 = vcombine.low %v4929_v26, %v1587_v52  ;;  %v969_v3 = vsel %vm953_vm7, 65537, %v6011_v25 }
  0x1b   : > { %v4065_v14 = vunpack.c.l.bf16 %v4064_v12  ;;  %v4066_v15 = vunpack.c.h.bf16 %v4064_v12  ;;  %p465_p11 = scmp.lt.s32.totalorder %s3802_s22, 31  ;;  %v554_v41 = vmul.f32 %v4069_v32, %v4895_v13  ;;  %v555_v42 = vmul.f32 %v4070_v33, %v4895_v13  ;;  %v4665_v33 = vld [vmem:[%s6003_s3 + $0xb0] sm:$0xff]   ;;  %p626_p12 = scmp.eq.s32.totalorder %s4743_s27, 1 }
  0x1c   : > { %4308 = vmatpush3.bf16.msra.mxu0 %v4653_v6  ;;  %v623_v43 = vstv %s622_s17  ;;  %v556_v44 = vmul.f32 %v4073_v36, %v4895_v13  ;;  %v557_v45 = vmul.f32 %v4074_v37, %v4895_v13  ;;  %v1627_v0 = vshrl.u32 %v3852_v59, 16  ;;  %p488_p13 = scmp.lt.s32.totalorder %s4743_s27, 1 }
  0x1d   : > { %4309 = vmatprep.subr.bf16.mxu0 %v4655_v8  ;;  %4340 = vmatpush3.bf16.msra.mxu1 %v4654_v7  ;;  %v508_v20 = vmul.f32 %v4065_v14, %v4895_v13  ;;  %v509_v21 = vmul.f32 %v4066_v15, %v4895_v13  ;;  %s6103_s22 = smov (!%p465_p11, %s3802_s22), 31  ;;  %v570_v48 = vadd.f32 %v4901_v16, %v554_v41  ;;  %vm4953_vm4 = vcmp.eq.s32.totalorder %v623_v43, 1 }
  0x1e   : > { %4341 = vmatprep.subr.bf16.mxu1 %v4656_v10  ;;  %v571_v49 = vadd.f32 %v4901_v16, %v555_v42  ;;  %v572_v53 = vadd.f32 %v4901_v16, %v556_v44  ;;  %v573_v54 = vadd.f32 %v4901_v16, %v557_v45  ;;  %s468_s12 = sadd.s32 %s4871_s15, %s6103_s22  ;;  %v1630_v1 = vshll.u32 %v3852_v59, 16  ;;  %s5941_s15 = scalar_lea.vmem %s6007_s7, %s4909_s25 }
  0x1f   : > { %v517_v30 = vadd.f32 %v4901_v16, %v508_v20  ;;  %v518_v31 = vadd.f32 %v4901_v16, %v509_v21  ;;  %v586_v56 = vmax.f32 %v570_v48, 0.0  ;;  %s3804_s26 = sshll.u32 %s468_s12, 2  ;;  %v971_v7 = vsel %vm955_vm9, 65537, %v6011_v25  ;;  %s6105_s27 = smov (!%p488_p13, %s4743_s27), 1 }
  0x20   : > { %4310 = vmatpush3.bf16.msra.mxu0 %v4655_v8  ;;  %v587_v57 = vmax.f32 %v571_v49, 0.0  ;;  %v588_v61 = vmax.f32 %v572_v53, 0.0  ;;  %v589_v62 = vmax.f32 %v573_v54, 0.0  ;;  %s470_s16 = scalar_lea.vmem %s6002_s2, %s3804_s26  ;;  %v3812_v8 = vcombine.low %v969_v3, %v4929_v26  ;;  %s3808_s25 = sshll.u32 %s6095_s28, 1 }
  0x21   : > { %4311 = vmatprep.subr.bf16.mxu0 %v4657_v11  ;;  %4342 = vmatpush3.bf16.msra.mxu1 %v4656_v10  ;;  %v519_v39 = vmax.f32 %v517_v30, 0.0  ;;  %v520_v40 = vmax.f32 %v518_v31, 0.0  ;;  %v4986_v4 = vld [vmem:[%s470_s16] sm:$0xff]   ;;  %v1629_v14 = vrot.slane %v1627_v0, 3  ;;  %v1632_v15 = vrot.slane %v1630_v1, 4  ;;  %s491_s19 = sadd.s32 %s3808_s25, %s6105_s27 }
  0x22   : > { %4343 = vmatprep.subr.bf16.mxu1 %v4658_v18  ;;  %v602_v63 = vpack.c.bf16 %v587_v57, %v586_v56  ;;  %v4989_v6 = vpack.c.bf16 %v589_v62, %v588_v61  ;;  %v1011_v22 = vshrl.u32 %v3812_v8, 16  ;;  %v1014_v23 = vshll.u32 %v3812_v8, 16  ;;  %v4669_v1 = vld [vmem:[%s6003_s3 + $0xa0] sm:$0xff]   ;;  %s627_s24 = scalar_select %p626_p12, 1, 0 }
  0x23   : > { %v521_v47 = vpack.c.bf16 %v520_v40, %v519_v39  ;;  %v5008_v30 = vor.u32 %v1632_v15, %v1629_v14  ;;  %v729_v44 = vand.u32 15, %v4934_v29  ;;  %v4077_v45 = vunpack.c.l.bf16 %v4144_v24  ;;  %v4146_v8 = vld [vmem:[%s4918_s18 + $0x20] sm:$0xff]   ;;  %s3809_s16 = sshll.u32 %s491_s19, 1 }
  0x24   : > { %4312 = vmatpush3.bf16.msra.mxu0 %v4657_v11  ;;  %v642_v11 = vrot.slane %v602_v63, 4  ;;  %v1013_v35 = vrot.slane %v1011_v22, 4  ;;  %v1016_v36 = vrot.slane %v1014_v23, 5  ;;  %v4082_v49 = vunpack.c.h.bf16 %v4145_v27 }
  0x25   : > { %4313 = vmatprep.subr.bf16.mxu0 %v4659_v19  ;;  %4344 = vmatpush3.bf16.msra.mxu1 %v4658_v18  ;;  %v625_v58 = vsel %vm4953_vm4, 0, %v521_v47  ;;  %v643_v18 = vrot.slane %v4989_v6, 4  ;;  %vm1697_vm10 = vcmp.ne.s16.totalorder %v5008_v30, 0  ;;  %v4081_v47 = vunpack.c.l.bf16 %v4145_v27  ;;  %v4673_v6 = vld [vmem:[%s6003_s3 + $0x90] sm:$0xff]  }
  0x26   : > { %4345 = vmatprep.subr.bf16.mxu1 %v4660_v34  ;;  %v632_v60 = vrot.slane %v625_v58, 4  ;;  %v5031_v42 = vor.u32 %v1016_v36, %v1013_v35  ;;  %vm893_vm14 = vcmp.eq.s32.totalorder %v729_v44, 0  ;;  %v558_v29 = vmul.f32 %v4077_v45, %v4895_v13 }
  0x27   : > { %v5013_v31 = vsel %vm641_vm0, %v642_v11, %v643_v18  ;;  %vm957_vm15 = vmpackc.low %vm893_vm14, %vm893_vm14  ;;  %v560_v57 = vmul.f32 %v4081_v47, %v4895_v13  ;;  %v561_v15 = vmul.f32 %v4082_v49, %v4895_v13  ;;  %v4085_v45 = vunpack.c.l.bf16 %v4146_v8 }
  0x28   : > { %4314 = vmatpush3.bf16.msra.mxu0 %v4659_v19  ;;  %v669_v5 = vsel %vm641_vm0, 0, %v632_v60  ;;  %v3813_v19 = vcombine.low %v971_v7, %v4929_v26  ;;  %v5003_v21 = vsel %vm641_vm0, %v632_v60, %v642_v11  ;;  %vm1081_vm12 = vcmp.ne.s16.totalorder %v5031_v42, 0 }
  0x29   : > { %4315 = vmatprep.subr.bf16.mxu0 %v4661_v46  ;;  %4346 = vmatpush3.bf16.msra.mxu1 %v4660_v34  ;;  %v1134_v12 = vrot.slane %v669_v5, 4  ;;  %v1135_v28 = vrot.slane %v5003_v21, 4  ;;  %v1137_v34 = vrot.slane %v5013_v31, 4  ;;  %v5024_v40 = vsel %vm1697_vm10, 0, %v669_v5 }
  0x2a   : > { %4347 = vmatprep.subr.bf16.mxu1 %v4662_v51  ;;  %v1019_v32 = vshrl.u32 %v3813_v19, 16  ;;  %v1022_v37 = vshll.u32 %v3813_v19, 16  ;;  %v1090_v52 = vsel %vm1081_vm12, 0, %v669_v5  ;;  %v973_v58 = vsel %vm957_vm15, 65537, %v6011_v25 }
  0x2b   : > { %v1136_v38 = vsel %vm641_vm0, %v1134_v12, %v1135_v28  ;;  %v5029_v41 = vsel %vm641_vm0, %v1135_v28, %v1137_v34  ;;  %v1306_v55 = vshrl.u32 %v1090_v52, 16  ;;  %v1309_v56 = vshll.u32 %v1090_v52, 16 }
  0x2c   : > { %4316 = vmatpush3.bf16.msra.mxu0 %v4661_v46  ;;  %v1021_v39 = vrot.slane %v1019_v32, 4  ;;  %4317 = vmatprep.mubr.bf16.mxu0 %v1136_v38  ;;  %v1024_v43 = vrot.slane %v1022_v37, 5  ;;  %v4078_v46 = vunpack.c.h.bf16 %v4144_v24  ;;  %v574_v59 = vadd.f32 %v4901_v16, %v558_v29 }
  0x2d   : > { %4348 = vmatpush3.bf16.msra.mxu1 %v4662_v51  ;;  %4365 = vmatprep.subr.bf16.mxu0 %v4663_v2  ;;  %v687_v51 = vadd.s32 48, %v4904_v17  ;;  %v1308_v62 = vrot.slane %v1306_v55, 3  ;;  %v1311_v63 = vrot.slane %v1309_v56, 4  ;;  %v3814_v0 = vcombine.low %v973_v58, %v4929_v26 }
  0x2e   : > { %4397 = vmatprep.subr.bf16.mxu1 %v4996_v9  ;;  %v1025_v48 = vor.u32 %v1024_v43, %v1021_v39  ;;  %v559_v53 = vmul.f32 %v4078_v46, %v4895_v13  ;;  %v590_v5 = vmax.f32 %v574_v59, 0.0  ;;  %v576_v24 = vadd.f32 %v4901_v16, %v560_v57  ;;  %v4671_v39 = vld [vmem:[%s6003_s3 + $0x98] sm:$0xff]  }
  0x2f   : > { %4318 = vmatmul.mubr.bf16.vlgmr.msra.gmra.mxu0 %v5029_v41  ;;  %v1312_v11 = vor.u32 %v1311_v63, %v1308_v62  ;;  %v1028_v12 = vshrl.u32 %v3814_v0, 16  ;;  %v1031_v14 = vshll.u32 %v3814_v0, 16  ;;  %v577_v32 = vadd.f32 %v4901_v16, %v561_v15 }
  0x30   : > { %4366 = vmatpush3.bf16.msra.mxu0 %v4663_v2  ;;  %v5046_v54 = vsel %vm1009_vm11, %v5031_v42, %v1025_v48  ;;  %v575_v60 = vadd.f32 %v4901_v16, %v559_v53  ;;  %v592_v37 = vmax.f32 %v576_v24, 0.0  ;;  %v689_v38 = vadd.s32 64, %v4904_v17 }
  0x31   : > { %4367 = vmatprep.subr.bf16.mxu0 %v4665_v33  ;;  %vm6017_vm1 = vcmp.ne.s16.totalorder %v5046_v54, 0  ;;  %v1030_v27 = vrot.slane %v1028_v12, 4  ;;  %v1033_v28 = vrot.slane %v1031_v14, 5  ;;  %v593_v44 = vmax.f32 %v577_v32, 0.0 }
  0x32   : > { %v1091_v61 = vsel %vm6017_vm1, 0, %v5003_v21  ;;  %v591_v7 = vmax.f32 %v575_v60, 0.0  ;;  %v757_v49 = vand.u32 15, %v689_v38  ;;  %v562_v55 = vmul.f32 %v4085_v45, %v4895_v13 }
  0x33   : > { %v1314_v2 = vshrl.u32 %v1091_v61, 16  ;;  %v1317_v3 = vshll.u32 %v1091_v61, 16  ;;  %v5070_v43 = vor.u32 %v1033_v28, %v1030_v27  ;;  %v5084_v29 = vpack.c.bf16 %v593_v44, %v592_v37  ;;  %v4666_v28 = vld [vmem:[%s6003_s3 + $0xf0] sm:$0xff]  }
  0x34   : > { %4368 = vmatpush3.bf16.msra.mxu0 %v4665_v33  ;;  %v604_v23 = vpack.c.bf16 %v591_v7, %v590_v5  ;;  %v743_v33 = vand.u32 15, %v687_v51  ;;  %vm897_vm5 = vcmp.eq.s32.totalorder %v757_v49, 0  ;;  %v691_v45 = vadd.s32 80, %v4904_v17 }
  0x35   : > { %4369 = vmatprep.subr.bf16.mxu0 %v4667_v50  ;;  %v1316_v19 = vrot.slane %v1314_v2, 3  ;;  %v1319_v22 = vrot.slane %v1317_v3, 4  ;;  %v5081_v51 = vsel %vm1009_vm11, %v1025_v48, %v5070_v43  ;;  %v647_v57 = vrot.slane %v5084_v29, 4  ;;  %vm961_vm6 = vmpackc.low %vm897_vm5, %vm897_vm5  ;;  %v4147_v2 = vld [vmem:[%s4918_s18 + $0x28] sm:$0xff]   ;;  %v4677_v29 = vld [vmem:[%s6003_s3 + $0x80] sm:$0xff]  }
  0x36   : > { %v645_v36 = vrot.slane %v604_v23, 4  ;;  %vm895_vm2 = vcmp.eq.s32.totalorder %v743_v33, 0  ;;  %vm6016_vm4 = vcmp.ne.s16.totalorder %v5081_v51, 0  ;;  %v977_v0 = vsel %vm961_vm6, 65537, %v6011_v25 }
  0x37   : > { %v5064_v35 = vor.u32 %v1319_v22, %v1316_v19  ;;  %vm959_vm3 = vmpackc.low %vm895_vm2, %vm895_vm2  ;;  %v1092_v48 = vsel %vm6016_vm4, 0, %v5013_v31  ;;  %v3816_v12 = vcombine.low %v977_v0, %v4929_v26  ;;  %v4675_v19 = vld [vmem:[%s6003_s3 + $0x88] sm:$0xff]   ;;  %v4089_v24 = vunpack.c.l.bf16 %v4147_v2 }
  0x38   : > { %4370 = vmatpush3.bf16.msra.mxu0 %v4667_v50  ;;  %v5077_v47 = vsel %vm641_vm0, %v643_v18, %v645_v36  ;;  %v4086_v50 = vunpack.c.h.bf16 %v4146_v8  ;;  %v975_v53 = vsel %vm959_vm3, 65537, %v6011_v25  ;;  %v1323_v59 = vshrl.u32 %v1092_v48, 16 }
  0x39   : > { %4371 = vmatprep.subr.bf16.mxu0 %v4669_v1  ;;  %v1321_v46 = vsel %vm1304_vm13, %v1312_v11, %v5064_v35  ;;  %v1139_v52 = vrot.slane %v5077_v47, 4  ;;  %v3815_v18 = vcombine.low %v975_v53, %v4929_v26  ;;  %v1326_v60 = vshll.u32 %v1092_v48, 16 }
  0x3a   : > { %4349 = vmatprep.mubr.bf16.mxu1 %v1321_v46  ;;  %v563_v58 = vmul.f32 %v4086_v50, %v4895_v13  ;;  %v5105_v63 = vsel %vm641_vm0, %v645_v36, %v647_v57  ;;  %v1325_v3 = vrot.slane %v1323_v59, 3  ;;  %v4090_v27 = vunpack.c.h.bf16 %v4147_v2 }
  0x3b   : > { %v5099_v56 = vsel %vm641_vm0, %v1137_v34, %v1139_v52  ;;  %v1037_v61 = vshrl.u32 %v3815_v18, 16  ;;  %v1040_v62 = vshll.u32 %v3815_v18, 16  ;;  %v1328_v5 = vrot.slane %v1326_v60, 4 }
  0x3c   : > { %4372 = vmatpush3.bf16.msra.mxu0 %v4669_v1  ;;  %4321 = vmatprep.mubr.bf16.mxu0 %v5099_v56  ;;  %v578_v1 = vadd.f32 %v4901_v16, %v562_v55  ;;  %v579_v34 = vadd.f32 %v4901_v16, %v563_v58  ;;  %v1141_v7 = vrot.slane %v5105_v63, 4  ;;  %v1046_v33 = vshrl.u32 %v3816_v12, 16 }
  0x3d   : > { %4373 = vmatprep.subr.bf16.mxu0 %v4671_v39  ;;  %v1039_v8 = vrot.slane %v1037_v61, 4  ;;  %v1042_v11 = vrot.slane %v1040_v62, 5  ;;  %v5116_v22 = vor.u32 %v1328_v5, %v1325_v3  ;;  %v1049_v36 = vshll.u32 %v3816_v12, 16  ;;  %v4670_v12 = vld [vmem:[%s6003_s3 + $0xe0] sm:$0xff]  }
  0x3e   : > { %v594_v14 = vmax.f32 %v578_v1, 0.0  ;;  %v595_v15 = vmax.f32 %v579_v34, 0.0  ;;  %v5119_v23 = vsel %vm641_vm0, %v1139_v52, %v1141_v7  ;;  %v565_v44 = vmul.f32 %v4090_v27, %v4895_v13  ;;  %v4668_v52 = vld [vmem:[%s6003_s3 + $0xe8] sm:$0xff]   ;;  %v5169_v34 = vld [vmem:[%s6003_s3 + $0x138] sm:$0xff]  }
  0x3f   : > { %4322 = vmatmul.mubr.bf16.gmra.mxu0 %v5119_v23  ;;  %v1043_v32 = vor.u32 %v1042_v11, %v1039_v8  ;;  %v1330_v38 = vsel %vm1304_vm13, %v5064_v35, %v5116_v22  ;;  %v1048_v49 = vrot.slane %v1046_v33, 4  ;;  %v1051_v50 = vrot.slane %v1049_v36, 5  ;;  %v4148_v8 = vld [vmem:[%s4918_s18 + $0x30] sm:$0xff]  }
  0x40   : > { %4374 = vmatpush3.bf16.msra.mxu0 %v4671_v39  ;;  %v5125_v37 = vpack.c.bf16 %v595_v15, %v594_v14  ;;  %v564_v39 = vmul.f32 %v4089_v24, %v4895_v13  ;;  %4350 = vmatmul.mubr.bf16.vlgmr.msra.gmra.mxu1 %v1330_v38  ;;  %v581_v53 = vadd.f32 %v4901_v16, %v565_v44  ;;  %v693_v58 = vadd.s32 96, %v4904_v17 }
  0x41   : > { %4375 = vmatprep.subr.bf16.mxu0 %v4673_v6  ;;  %v5135_v46 = vsel %vm1009_vm11, %v5070_v43, %v1043_v32  ;;  %4398 = vmatpush3.bf16.msra.mxu1 %v4996_v9  ;;  %v5151_v55 = vor.u32 %v1051_v50, %v1048_v49  ;;  %v4093_v33 = vunpack.c.l.bf16 %v4148_v8  ;;  %v4094_v36 = vunpack.c.h.bf16 %v4148_v8 }
  0x42   : > { %v649_v35 = vrot.slane %v5125_v37, 4  ;;  %vm6015_vm7 = vcmp.ne.s16.totalorder %v5135_v46, 0  ;;  %v580_v43 = vadd.f32 %v4901_v16, %v564_v39  ;;  %4399 = vmatprep.subr.bf16.mxu1 %v4666_v28  ;;  %v597_v0 = vmax.f32 %v581_v53, 0.0 }
  0x43   : > { %v1093_v18 = vsel %vm6015_vm7, 0, %v5077_v47  ;;  %v5160_v62 = vsel %vm1009_vm11, %v1043_v32, %v5151_v55 }
  0x44   : > { %4376 = vmatpush3.bf16.msra.mxu0 %v4673_v6  ;;  %v771_v6 = vand.u32 15, %v691_v45  ;;  %v5154_v48 = vsel %vm641_vm0, %v647_v57, %v649_v35  ;;  %v1332_v9 = vshrl.u32 %v1093_v18, 16  ;;  %v1335_v59 = vshll.u32 %v1093_v18, 16  ;;  %v4672_v45 = vld [vmem:[%s6003_s3 + $0xd8] sm:$0xff]  }
  0x45   : > { %4377 = vmatprep.subr.bf16.mxu0 %v4675_v19  ;;  %v1143_v60 = vrot.slane %v5154_v48, 4  ;;  %v596_v61 = vmax.f32 %v580_v43, 0.0  ;;  %v785_v57 = vand.u32 15, %v693_v58  ;;  %4400 = vmatpush3.bf16.msra.mxu1 %v4666_v28  ;;  %vm1085_vm9 = vcmp.ne.s16.totalorder %v5160_v62, 0  ;;  %v4149_v43 = vld [vmem:[%s4918_s18 + $0x38] sm:$0xff]   ;;  %s493_s18 = scalar_lea.vmem %s6008_s8, %s3809_s16 }
  0x46   : > { %vm5162_vm8 = vcmp.eq.s32.totalorder %v771_v6, 0  ;;  %v1334_v2 = vrot.slane %v1332_v9, 3  ;;  %v1337_v3 = vrot.slane %v1335_v59, 4  ;;  %v1094_v11 = vsel %vm1085_vm9, 0, %v5105_v63  ;;  %4401 = vmatprep.subr.bf16.mxu1 %v4668_v52 }
  0x47   : > { %v5173_v5 = vsel %vm641_vm0, %v1141_v7, %v1143_v60  ;;  %vm963_vm14 = vmpackc.low %vm5162_vm8, %vm5162_vm8  ;;  %v5186_v14 = vpack.c.bf16 %v597_v0, %v596_v61  ;;  %vm901_vm15 = vcmp.eq.s32.totalorder %v785_v57, 0  ;;  %v1344_v24 = vshll.u32 %v1094_v11, 16 }
  0x48   : > { %4378 = vmatpush3.bf16.msra.mxu0 %v4675_v19  ;;  %4325 = vmatprep.mubr.bf16.mxu0 %v5173_v5  ;;  %v979_v7 = vsel %vm963_vm14, 65537, %v6011_v25  ;;  %v1338_v15 = vor.u32 %v1337_v3, %v1334_v2  ;;  %v1341_v19 = vshrl.u32 %v1094_v11, 16  ;;  %vm965_vm2 = vmpackc.low %vm901_vm15, %vm901_vm15  ;;  %v567_v18 = vmul.f32 %v4094_v36, %v4895_v13 }
  0x49   : > { %4379 = vmatprep.subr.bf16.mxu0 %v4677_v29  ;;  %v3817_v27 = vcombine.low %v979_v7, %v4929_v26  ;;  %v651_v28 = vrot.slane %v5186_v14, 4  ;;  %v981_v32 = vsel %vm965_vm2, 65537, %v6011_v25  ;;  %v1346_v39 = vrot.slane %v1344_v24, 4  ;;  %4402 = vmatpush3.bf16.msra.mxu1 %v4668_v52  ;;  %v4674_v7 = vld [vmem:[%s6003_s3 + $0xd0] sm:$0xff]  }
  0x4a   : > { %v1339_v37 = vsel %vm1304_vm13, %v5116_v22, %v1338_v15  ;;  %v1343_v38 = vrot.slane %v1341_v19, 3  ;;  %4403 = vmatprep.subr.bf16.mxu1 %v4670_v12  ;;  %v566_v22 = vmul.f32 %v4093_v33, %v4895_v13  ;;  %v583_v1 = vadd.f32 %v4901_v16, %v567_v18 }
  0x4b   : > { %v1055_v44 = vshrl.u32 %v3817_v27, 16  ;;  %4353 = vmatprep.mubr.bf16.mxu1 %v1339_v37  ;;  %v5201_v49 = vsel %vm641_vm0, %v649_v35, %v651_v28  ;;  %v1058_v50 = vshll.u32 %v3817_v27, 16  ;;  %v4097_v57 = vunpack.c.l.bf16 %v4149_v43 }
  0x4c   : > { %4380 = vmatpush3.bf16.msra.mxu0 %v4677_v29  ;;  %v3818_v29 = vcombine.low %v981_v32, %v4929_v26  ;;  %v5206_v53 = vor.u32 %v1346_v39, %v1343_v38  ;;  %v1145_v52 = vrot.slane %v5201_v49, 4  ;;  %v582_v61 = vadd.f32 %v4901_v16, %v566_v22 }
  0x4d   : > { %4429 = vmatprep.subr.bf16.mxu0 %v5169_v34  ;;  %v1057_v6 = vrot.slane %v1055_v44, 4  ;;  %v1060_v58 = vrot.slane %v1058_v50, 5  ;;  %4404 = vmatpush3.bf16.msra.mxu1 %v4670_v12  ;;  %v4098_v19 = vunpack.c.h.bf16 %v4149_v43  ;;  %v695_v12 = vadd.s32 112, %v4904_v17  ;;  %v4676_v50 = vld [vmem:[%s6003_s3 + $0xc8] sm:$0xff]  }
  0x4e   : > { %v1064_v9 = vshrl.u32 %v3818_v29, 16  ;;  %v1067_v59 = vshll.u32 %v3818_v29, 16  ;;  %v1348_v35 = vsel %vm1304_vm13, %v1338_v15, %v5206_v53  ;;  %v5216_v0 = vsel %vm641_vm0, %v1143_v60, %v1145_v52  ;;  %4405 = vmatprep.subr.bf16.mxu1 %v4672_v45 }
  0x4f   : > { %4354 = vmatmul.mubr.bf16.gmra.mxu1 %v1348_v35  ;;  %4326 = vmatmul.mubr.bf16.gmra.mxu0 %v5216_v0  ;;  %v1061_v2 = vor.u32 %v1060_v58, %v1057_v6  ;;  %v598_v11 = vmax.f32 %v582_v61, 0.0  ;;  %v599_v15 = vmax.f32 %v583_v1, 0.0  ;;  %v568_v60 = vmul.f32 %v4097_v57, %v4895_v13 }
  0x50   : > { %v1066_v3 = vrot.slane %v1064_v9, 4  ;;  %v1069_v8 = vrot.slane %v1067_v59, 5  ;;  %v684_v32 = vadd.s32 24, %v4904_v17  ;;  %v1733_v33 = vshrl.u32 %v5024_v40, 16 }
  0x51   : > { %v5227_v24 = vsel %vm1009_vm11, %v5151_v55, %v1061_v2  ;;  %4406 = vmatpush3.bf16.msra.mxu1 %v4672_v45  ;;  %v608_v36 = vpack.c.bf16 %v599_v15, %v598_v11  ;;  %v569_v37 = vmul.f32 %v4098_v19, %v4895_v13  ;;  %v584_v38 = vadd.f32 %v4901_v16, %v568_v60  ;;  %v4678_v11 = vld [vmem:[%s6003_s3 + $0xc0] sm:$0xff]  }
  0x52   : > { %v5229_v27 = vor.u32 %v1069_v8, %v1066_v3  ;;  %vm6019_vm3 = vcmp.ne.s16.totalorder %v5227_v24, 0  ;;  %4407 = vmatprep.subr.bf16.mxu1 %v4674_v7  ;;  %v799_v44 = vand.u32 15, %v695_v12  ;;  %v722_v45 = vand.u32 15, %v684_v32 }
  0x53   : > { %v1095_v39 = vsel %vm6019_vm3, 0, %v5154_v48  ;;  %v653_v13 = vrot.slane %v608_v36, 4  ;;  %v585_v6 = vadd.f32 %v4901_v16, %v569_v37  ;;  %v600_v18 = vmax.f32 %v584_v38, 0.0 }
  0x54   : > { %v5241_v55 = vsel %vm1009_vm11, %v1061_v2, %v5229_v27  ;;  %v1350_v29 = vshrl.u32 %v1095_v39, 16  ;;  %v1353_v22 = vshll.u32 %v1095_v39, 16  ;;  %vm903_vm6 = vcmp.eq.s32.totalorder %v799_v44, 0 }
  0x55   : > { %vm6018_vm5 = vcmp.ne.s16.totalorder %v5241_v55, 0  ;;  %4408 = vmatpush3.bf16.msra.mxu1 %v4674_v7  ;;  %vm967_vm8 = vmpackc.low %vm903_vm6, %vm903_vm6  ;;  %v5254_v35 = vsel %vm641_vm0, %v651_v28, %v653_v13  ;;  %v601_v1 = vmax.f32 %v585_v6, 0.0  ;;  %vm908_vm14 = vcmp.eq.s32.totalorder %v722_v45, 15 }
  0x56   : > { %v1096_v43 = vsel %vm6018_vm5, 0, %v5201_v49  ;;  %v1352_v58 = vrot.slane %v1350_v29, 3  ;;  %v1355_v9 = vrot.slane %v1353_v22, 4  ;;  %v983_v57 = vsel %vm967_vm8, 65537, %v6011_v25  ;;  %4409 = vmatprep.subr.bf16.mxu1 %v4676_v50  ;;  %vm1573_vm15 = vmpackc.low %vm908_vm14, %vm908_vm14 }
  0x57   : > { %v1359_v59 = vshrl.u32 %v1096_v43, 16  ;;  %v1362_v61 = vshll.u32 %v1096_v43, 16  ;;  %v1147_v8 = vrot.slane %v5254_v35, 4  ;;  %v5261_v7 = vpack.c.bf16 %v601_v1, %v600_v18 }
  0x58   : > { %v1356_v2 = vor.u32 %v1355_v9, %v1352_v58  ;;  %v3819_v14 = vcombine.low %v983_v57, %v4929_v26  ;;  %v1589_v28 = vsel %vm1573_vm15, 65537, %v6011_v25  ;;  %v5265_v15 = vrot.slane %v1733_v33, 4 }
  0x59   : > { %v1361_v16 = vrot.slane %v1359_v59, 3  ;;  %v1364_v3 = vrot.slane %v1362_v61, 4  ;;  %v5274_v12 = vsel %vm641_vm0, %v1145_v52, %v1147_v8  ;;  %4410 = vmatpush3.bf16.msra.mxu1 %v4676_v50  ;;  %v3853_v32 = vcombine.low %v4929_v26, %v1589_v28 }
  0x5a   : > { %v1357_v19 = vsel %vm1304_vm13, %v5206_v53, %v1356_v2  ;;  %4329 = vmatprep.mubr.bf16.mxu0 %v5274_v12  ;;  %v6010_v36 = vrot.slane %v5261_v7, 4  ;;  %v1073_v33 = vshrl.u32 %v3819_v14, 16  ;;  %v1076_v37 = vshll.u32 %v3819_v14, 16  ;;  %v5283_v53 = vld [vmem:[%s6003_s3 + $0x178] sm:$0xff]   ;;  %4411 = vmatprep.subr.bf16.mxu1 %v4678_v11 }
  0x5b   : > { %v5269_v60 = vor.u32 %v1364_v3, %v1361_v16  ;;  %4357 = vmatprep.mubr.bf16.mxu1 %v1357_v19  ;;  %v1736_v38 = vshll.u32 %v5024_v40, 16  ;;  %v1635_v39 = vshrl.u32 %v3853_v32, 16  ;;  %v1638_v44 = vshll.u32 %v3853_v32, 16 }
  0x5c   : > { %v686_v50 = vadd.s32 40, %v4904_v17  ;;  %v5291_v45 = vsel %vm641_vm0, %v653_v13, %v6010_v36  ;;  %v1075_v40 = vrot.slane %v1073_v33, 4  ;;  %v1078_v29 = vrot.slane %v1076_v37, 5 }
  0x5d   : > { %v1366_v52 = vsel %vm1304_vm13, %v1356_v2, %v5269_v60  ;;  %v1738_v22 = vrot.slane %v1736_v38, 5  ;;  %v6009_v43 = vrot.slane %v5291_v45, 4  ;;  %v1637_v6 = vrot.slane %v1635_v39, 3  ;;  %4412 = vmatpush3.bf16.msra.mxu1 %v4678_v11 }
  0x5e   : > { %4358 = vmatmul.mubr.bf16.gmra.mxu1 %v1366_v52  ;;  %v1640_v18 = vrot.slane %v1638_v44, 4  ;;  %v736_v58 = vand.u32 15, %v686_v50  ;;  %v5294_v9 = vor.u32 %v1078_v29, %v1075_v40  ;;  %v1981_v61 = vsel %vm1081_vm12, 0, %v5003_v21  ;;  %4461 = vmatprep.subr.bf16.mxu1 %v5283_v53 }
  0x5f   : > { %v1739_v59 = vor.u32 %v1738_v22, %v5265_v15  ;;  %v1982_v13 = vsel %vm6017_vm1, 0, %v5013_v31  ;;  %v5307_v1 = vsel %vm641_vm0, %v1147_v8, %v6009_v43  ;;  %v2008_v2 = vshrl.u32 %v1981_v61, 16 }
  0x60   : > { %6027 = vst [vmem:[#allocation2_spill] sm:$0xff] %v5307_v1  ;;  %v1641_v57 = vor.u32 %v1640_v18, %v1637_v6  ;;  %vm910_vm2 = vcmp.eq.s32.totalorder %v736_v58, 15  ;;  %4330 = vmatmul.mubr.bf16.gmra.mxu0 %v5307_v1  ;;  %v5313_v16 = vsel %vm1009_vm11, %v5229_v27, %v5294_v9  ;;  %vm1089_vm6 = vcmp.ne.s16.totalorder %v5294_v9, 0 }
  0x61   : > { %vm1575_vm8 = vmpackc.low %vm910_vm2, %vm910_vm2  ;;  %v2011_v3 = vshll.u32 %v1981_v61, 16  ;;  %v2016_v11 = vshrl.u32 %v1982_v13, 16  ;;  %vm1088_vm14 = vcmp.ne.s16.totalorder %v5313_v16, 0  ;;  %v1098_v8 = vsel %vm1089_vm6, 0, %v5291_v45  ;;  %v4705_v16 = vld [vmem:[%s6003_s3 + $0x190] sm:$0xff]  }
  0x62   : > { %v5322_v14 = vsel %vm1304_vm13, %v5008_v30, %v1641_v57  ;;  %v1591_v28 = vsel %vm1575_vm8, 65537, %v6011_v25  ;;  %v1097_v27 = vsel %vm1088_vm14, 0, %v5254_v35  ;;  %v1377_v15 = vshrl.u32 %v1098_v8, 16 }
  0x63   : > { %v1380_v19 = vshll.u32 %v1098_v8, 16  ;;  %vm6020_vm15 = vcmp.ne.s16.totalorder %v5322_v14, 0  ;;  %v1368_v32 = vshrl.u32 %v1097_v27, 16  ;;  %v1371_v33 = vshll.u32 %v1097_v27, 16 }
  0x64   : > { %v1707_v37 = vsel %vm6020_vm15, 0, %v5003_v21  ;;  %v3854_v38 = vcombine.low %v4929_v26, %v1591_v28  ;;  %v1379_v52 = vrot.slane %v1377_v15, 3  ;;  %v2010_v8 = vrot.slane %v2008_v2, 3 }
  0x65   : > { %v1382_v39 = vrot.slane %v1380_v19, 4  ;;  %v1741_v44 = vshrl.u32 %v1707_v37, 16  ;;  %v1744_v50 = vshll.u32 %v1707_v37, 16  ;;  %v1370_v40 = vrot.slane %v1368_v32, 3 }
  0x66   : > { %v1373_v29 = vrot.slane %v1371_v33, 4  ;;  %v1644_v22 = vshrl.u32 %v3854_v38, 16  ;;  %v1647_v6 = vshll.u32 %v3854_v38, 16  ;;  %v2013_v20 = vrot.slane %v2011_v3, 4 }
  0x67   : > { %v1383_v18 = vor.u32 %v1382_v39, %v1379_v52  ;;  %v1743_v58 = vrot.slane %v1741_v44, 4  ;;  %v1746_v61 = vrot.slane %v1744_v50, 5  ;;  %v2018_v25 = vrot.slane %v2016_v11, 3 }
  0x68   : > { %v1374_v43 = vor.u32 %v1373_v29, %v1370_v40  ;;  %v1646_v27 = vrot.slane %v1644_v22, 3  ;;  %v1649_v36 = vrot.slane %v1647_v6, 4  ;;  %v2019_v1 = vshll.u32 %v1982_v13, 16 }
  0x69   : > { %v1747_v10 = vor.u32 %v1746_v61, %v1743_v58  ;;  %v1983_v28 = vsel %vm6016_vm4, 0, %v5077_v47  ;;  %v2014_v33 = vor.u32 %v2013_v20, %v2010_v8  ;;  %v688_v11 = vadd.s32 56, %v4904_v17 }
  0x6a   : > { %v1375_v15 = vsel %vm1304_vm13, %v5269_v60, %v1374_v43  ;;  %v1384_v19 = vsel %vm1304_vm13, %v1374_v43, %v1383_v18  ;;  %v5339_v32 = vor.u32 %v1649_v36, %v1646_v27  ;;  %v2021_v37 = vrot.slane %v2019_v1, 4 }
  0x6b   : > { %4361 = vmatprep.mubr.bf16.mxu1 %v1375_v15  ;;  %v1748_v2 = vsel %vm1009_vm11, %v1739_v59, %v1747_v10  ;;  %v2025_v3 = vshrl.u32 %v1983_v28, 16  ;;  %v2028_v38 = vshll.u32 %v1983_v28, 16  ;;  %v690_v60 = vadd.s32 72, %v4904_v17  ;;  %v4682_v15 = vld [vmem:[%s6003_s3 + $0x170] sm:$0xff]  }
  0x6c   : > { %4362 = vmatmul.mubr.bf16.gmra.mxu1 %v1384_v19  ;;  %4381 = vmatprep.mubr.bf16.mxu0 %v1748_v2  ;;  %v5344_v13 = vsel %vm1304_vm13, %v1641_v57, %v5339_v32  ;;  %v1984_v20 = vsel %vm6015_vm7, 0, %v5105_v63  ;;  %v2022_v36 = vor.u32 %v2021_v37, %v2018_v25  ;;  %v750_v52 = vand.u32 15, %v688_v11 }
  0x6d   : > { %vm1699_vm2 = vcmp.ne.s16.totalorder %v5344_v13, 0  ;;  %v2027_v43 = vrot.slane %v2025_v3, 3  ;;  %v2030_v59 = vrot.slane %v2028_v38, 4  ;;  %v764_v57 = vand.u32 15, %v690_v60  ;;  %v4681_v60 = vld [vmem:[%s6003_s3 + $0x130] sm:$0xff]  }
  0x6e   : > { %v1708_v1 = vsel %vm1699_vm2, 0, %v5013_v31  ;;  %v2034_v39 = vshrl.u32 %v1984_v20, 16  ;;  %v2023_v40 = vsel %vm1304_vm13, %v2014_v33, %v2022_v36  ;;  %vm912_vm8 = vcmp.eq.s32.totalorder %v750_v52, 15 }
  0x6f   : > { %v1750_v44 = vshrl.u32 %v1708_v1, 16  ;;  %v1753_v50 = vshll.u32 %v1708_v1, 16  ;;  %v2031_v29 = vor.u32 %v2030_v59, %v2027_v43  ;;  %4413 = vmatprep.mubr.bf16.mxu1 %v2023_v40  ;;  %vm5356_vm7 = vcmp.eq.s32.totalorder %v764_v57, 15  ;;  %vm1577_vm4 = vmpackc.low %vm912_vm8, %vm912_vm8 }
  0x70   : > { %v2036_v25 = vrot.slane %v2034_v39, 3  ;;  %v2037_v6 = vshll.u32 %v1984_v20, 16  ;;  %v1985_v8 = vsel %vm1085_vm9, 0, %v5154_v48  ;;  %v6030_v27 = vmov 0   ;;  %vm1579_vm1 = vmpackc.low %vm5356_vm7, %vm5356_vm7 }
  0x71   : > { %v1752_v18 = vrot.slane %v1750_v44, 4  ;;  %v1755_v58 = vrot.slane %v1753_v50, 5  ;;  %v2032_v61 = vsel %vm1304_vm13, %v2022_v36, %v2031_v29  ;;  %v1593_v28 = vsel %vm1577_vm4, 65537, %v6030_v27 }
  0x72   : > { %v2039_v19 = vrot.slane %v2037_v6, 4  ;;  %v2043_v33 = vshrl.u32 %v1985_v8, 16  ;;  %v2046_v2 = vshll.u32 %v1985_v8, 16  ;;  %v3855_v3 = vcombine.low %v4929_v26, %v1593_v28 }
  0x73   : > { %v5371_v37 = vor.u32 %v1755_v58, %v1752_v18  ;;  %v1595_v38 = vsel %vm1579_vm1, 65537, %v6030_v27  ;;  %v692_v11 = vadd.s32 88, %v4904_v17 }
  0x74   : > { %4414 = vmatmul.mubr.bf16.vlgmr.msra.gmra.mxu1 %v2032_v61  ;;  %v3856_v20 = vcombine.low %v4929_v26, %v1595_v38  ;;  %v2040_v36 = vor.u32 %v2039_v19, %v2036_v25  ;;  %v2045_v43 = vrot.slane %v2043_v33, 3  ;;  %v2048_v59 = vrot.slane %v2046_v2, 4  ;;  %v4684_v25 = vld [vmem:[%s6003_s3 + $0x168] sm:$0xff]   ;;  %v4686_v38 = vld [vmem:[%s6003_s3 + $0x160] sm:$0xff]  }
  0x75   : > { %v1757_v1 = vsel %vm1009_vm11, %v1747_v10, %v5371_v37  ;;  %4462 = vmatpush3.bf16.msra.mxu1 %v5283_v53  ;;  %v1653_v52 = vshrl.u32 %v3855_v3, 16  ;;  %v1656_v57 = vshll.u32 %v3855_v3, 16  ;;  %v778_v39 = vand.u32 15, %v692_v11 }
  0x76   : > { %4382 = vmatmul.mubr.bf16.vlgmr.msra.gmra.mxu0 %v1757_v1  ;;  %4463 = vmatprep.subr.bf16.mxu1 %v4682_v15  ;;  %v1662_v44 = vshrl.u32 %v3856_v20, 16  ;;  %v1665_v50 = vshll.u32 %v3856_v20, 16  ;;  %v2041_v40 = vsel %vm1304_vm13, %v2031_v29, %v2040_v36  ;;  %v5384_v22 = vor.u32 %v2048_v59, %v2045_v43  ;;  %v4683_v29 = vld [vmem:[%s6003_s3 + $0x128] sm:$0xff]   ;;  %v4685_v1 = vld [vmem:[%s6003_s3 + $0x120] sm:$0xff]  }
  0x77   : > { %4430 = vmatpush3.bf16.msra.mxu0 %v5169_v34  ;;  %v1655_v10 = vrot.slane %v1653_v52, 3  ;;  %v1658_v6 = vrot.slane %v1656_v57, 4  ;;  %4417 = vmatprep.mubr.bf16.mxu1 %v2041_v40  ;;  %vm916_vm1 = vcmp.eq.s32.totalorder %v778_v39, 15  ;;  %v694_v53 = vadd.s32 104, %v4904_v17 }
  0x78   : > { %4431 = vmatprep.subr.bf16.mxu0 %v4681_v60  ;;  %v1664_v18 = vrot.slane %v1662_v44, 3  ;;  %v1667_v58 = vrot.slane %v1665_v50, 4  ;;  %v2050_v61 = vsel %vm1304_vm13, %v2040_v36, %v5384_v22  ;;  %vm1581_vm4 = vmpackc.low %vm916_vm1, %vm916_vm1  ;;  %v1986_v34 = vsel %vm6019_vm3, 0, %v5201_v49 }
  0x79   : > { %v1659_v8 = vor.u32 %v1658_v6, %v1655_v10  ;;  %4464 = vmatpush3.bf16.msra.mxu1 %v4682_v15  ;;  %v1597_v28 = vsel %vm1581_vm4, 65537, %v6030_v27  ;;  %v792_v19 = vand.u32 15, %v694_v53  ;;  %v2052_v33 = vshrl.u32 %v1986_v34, 16  ;;  %v4688_v6 = vld [vmem:[%s6003_s3 + $0x158] sm:$0xff]  }
  0x7a   : > { %v1668_v2 = vor.u32 %v1667_v58, %v1664_v18  ;;  %4465 = vmatprep.subr.bf16.mxu1 %v4684_v25  ;;  %v3857_v3 = vcombine.low %v4929_v26, %v1597_v28  ;;  %v2055_v11 = vshll.u32 %v1986_v34, 16  ;;  %v1987_v20 = vsel %vm6018_vm5, 0, %v5254_v35 }
  0x7b   : > { %4432 = vmatpush3.bf16.msra.mxu0 %v4681_v60  ;;  %v5409_v15 = vsel %vm1304_vm13, %v5339_v32, %v1659_v8  ;;  %vm918_vm7 = vcmp.eq.s32.totalorder %v792_v19, 15  ;;  %v2054_v36 = vrot.slane %v2052_v33, 3  ;;  %v2061_v43 = vshrl.u32 %v1987_v20, 16 }
  0x7c   : > { %vm1700_vm8 = vcmp.ne.s16.totalorder %v5409_v15, 0  ;;  %v5413_v59 = vsel %vm1304_vm13, %v1659_v8, %v1668_v2  ;;  %4433 = vmatprep.subr.bf16.mxu0 %v4683_v29  ;;  %4418 = vmatmul.mubr.bf16.gmra.mxu1 %v2050_v61  ;;  %v1671_v52 = vshrl.u32 %v3857_v3, 16  ;;  %v1674_v60 = vshll.u32 %v3857_v3, 16  ;;  %vm1583_vm1 = vmpackc.low %vm918_vm7, %vm918_vm7  ;;  %v4687_v8 = vld [vmem:[%s6003_s3 + $0x118] sm:$0xff]  }
  0x7d   : > { %v1709_v32 = vsel %vm1700_vm8, 0, %v5077_v47  ;;  %vm1701_vm4 = vcmp.ne.s16.totalorder %v5413_v59, 0  ;;  %4466 = vmatpush3.bf16.msra.mxu1 %v4684_v25  ;;  %v1599_v57 = vsel %vm1583_vm1, 65537, %v6030_v27  ;;  %v2057_v39 = vrot.slane %v2055_v11, 4 }
  0x7e   : > { %v1759_v44 = vshrl.u32 %v1709_v32, 16  ;;  %v1762_v50 = vshll.u32 %v1709_v32, 16  ;;  %v1710_v40 = vsel %vm1701_vm4, 0, %v5105_v63  ;;  %v1673_v10 = vrot.slane %v1671_v52, 3  ;;  %4467 = vmatprep.subr.bf16.mxu1 %v4686_v38 }
  0x7f   : > { %v1768_v53 = vshrl.u32 %v1710_v40, 16  ;;  %v1771_v18 = vshll.u32 %v1710_v40, 16  ;;  %4434 = vmatpush3.bf16.msra.mxu0 %v4683_v29  ;;  %v1676_v58 = vrot.slane %v1674_v60, 4  ;;  %v3858_v25 = vcombine.low %v4929_v26, %v1599_v57  ;;  %v4690_v57 = vld [vmem:[%s6003_s3 + $0x150] sm:$0xff]  }
  0x80   : > { %v1761_v61 = vrot.slane %v1759_v44, 4  ;;  %v1764_v34 = vrot.slane %v1762_v50, 5  ;;  %4435 = vmatprep.subr.bf16.mxu0 %v4685_v1  ;;  %v2058_v28 = vor.u32 %v2057_v39, %v2054_v36  ;;  %v2063_v19 = vrot.slane %v2061_v43, 3 }
  0x81   : > { %v1770_v33 = vrot.slane %v1768_v53, 4  ;;  %v1773_v3 = vrot.slane %v1771_v18, 5  ;;  %v1677_v11 = vor.u32 %v1676_v58, %v1673_v10  ;;  %v1680_v52 = vshrl.u32 %v3858_v25, 16  ;;  %4468 = vmatpush3.bf16.msra.mxu1 %v4686_v38 }
  0x82   : > { %v1765_v32 = vor.u32 %v1764_v34, %v1761_v61  ;;  %v1683_v40 = vshll.u32 %v3858_v25, 16  ;;  %v2059_v29 = vsel %vm1304_vm13, %v5384_v22, %v2058_v28  ;;  %v2064_v60 = vshll.u32 %v1987_v20, 16  ;;  %4469 = vmatprep.subr.bf16.mxu1 %v4688_v6  ;;  %v4719_v34 = vld [vmem:[%s6005_s5] ss:$0 sm:$0xff] }
  0x83   : > { %v1774_v44 = vor.u32 %v1773_v3, %v1770_v33  ;;  %4436 = vmatpush3.bf16.msra.mxu0 %v4685_v1  ;;  %v5439_v36 = vsel %vm1304_vm13, %v1668_v2, %v1677_v11  ;;  %v1682_v43 = vrot.slane %v1680_v52, 3  ;;  %4421 = vmatprep.mubr.bf16.mxu1 %v2059_v29  ;;  %v696_v38 = vadd.s32 120, %v4904_v17  ;;  %v4689_v1 = vld [vmem:[%s6003_s3 + $0x110] sm:$0xff]   ;;  %v4691_v29 = vld [vmem:[%s6003_s3 + $0x108] sm:$0xff]  }
  0x84   : > { %v1766_v39 = vsel %vm1009_vm11, %v5371_v37, %v1765_v32  ;;  %vm1702_vm7 = vcmp.ne.s16.totalorder %v5439_v36, 0  ;;  %v1685_v22 = vrot.slane %v1683_v40, 4  ;;  %4437 = vmatprep.subr.bf16.mxu0 %v4687_v8  ;;  %v2066_v20 = vrot.slane %v2064_v60, 4 }
  0x85   : > { %4385 = vmatprep.mubr.bf16.mxu0 %v1766_v39  ;;  %v1775_v2 = vsel %vm1009_vm11, %v1765_v32, %v1774_v44  ;;  %v1711_v17 = vsel %vm1702_vm7, 0, %v5154_v48  ;;  %4470 = vmatpush3.bf16.msra.mxu1 %v4688_v6  ;;  %v806_v50 = vand.u32 15, %v696_v38  ;;  %v1988_v37 = vsel %vm1088_vm14, 0, %v5291_v45 }
  0x86   : > { %4386 = vmatmul.mubr.bf16.gmra.mxu0 %v1775_v2  ;;  %v1777_v10 = vshrl.u32 %v1711_v17, 16  ;;  %v1780_v53 = vshll.u32 %v1711_v17, 16  ;;  %v5455_v18 = vor.u32 %v1685_v22, %v1682_v43  ;;  %v2067_v58 = vor.u32 %v2066_v20, %v2063_v19  ;;  %4471 = vmatprep.subr.bf16.mxu1 %v4690_v57  ;;  %v4692_v19 = vld [vmem:[%s6003_s3 + $0x148] sm:$0xff]  }
  0x87   : > { %4438 = vmatpush3.bf16.msra.mxu0 %v4687_v8  ;;  %vm5458_vm1 = vcmp.eq.s32.totalorder %v806_v50, 15  ;;  %v2070_v61 = vshrl.u32 %v1988_v37, 16  ;;  %v2073_v6 = vshll.u32 %v1988_v37, 16  ;;  %v6033_v33 = vunpack.c.l.bf16 %v4986_v4 }
  0x88   : > { %v1779_v52 = vrot.slane %v1777_v10, 4  ;;  %v1782_v32 = vrot.slane %v1780_v53, 5  ;;  %v5472_v8 = vsel %vm1304_vm13, %v1677_v11, %v5455_v18  ;;  %v2068_v40 = vsel %vm1304_vm13, %v2058_v28, %v2067_v58  ;;  %4439 = vmatprep.subr.bf16.mxu0 %v4689_v1  ;;  %vm1585_vm5 = vmpackc.low %vm5458_vm1, %vm5458_vm1 }
  0x89   : > { %v614_v3 = vmul.f32 %v4719_v34, %v6033_v33  ;;  %vm1703_vm3 = vcmp.ne.s16.totalorder %v5472_v8, 0  ;;  %4422 = vmatmul.mubr.bf16.gmra.mxu1 %v2068_v40  ;;  %v1601_v60 = vsel %vm1585_vm5, 65537, %v6030_v27  ;;  %v2072_v43 = vrot.slane %v2070_v61, 3  ;;  %v4720_v27 = vld [vmem:[%s6006_s6] ss:$0 sm:$0xff] }
  0x8a   : > { %v2075_v38 = vrot.slane %v2073_v6, 4  ;;  %v1783_v11 = vor.u32 %v1782_v32, %v1779_v52  ;;  %v1712_v28 = vsel %vm1703_vm3, 0, %v5201_v49  ;;  %v3859_v39 = vcombine.low %v4929_v26, %v1601_v60  ;;  %4472 = vmatpush3.bf16.msra.mxu1 %v4690_v57  ;;  %v4694_v26 = vld [vmem:[%s6003_s3 + $0x140] sm:$0xff]  }
  0x8b   : > { %v6034_v22 = vunpack.c.h.bf16 %v4986_v4  ;;  %v1786_v2 = vshrl.u32 %v1712_v28, 16  ;;  %v1789_v17 = vshll.u32 %v1712_v28, 16  ;;  %4440 = vmatpush3.bf16.msra.mxu0 %v4689_v1  ;;  %v616_v37 = vadd.f32 %v4720_v27, %v614_v3  ;;  %4473 = vmatprep.subr.bf16.mxu1 %v4692_v19  ;;  %v4693_v1 = vld [vmem:[%s6003_s3 + $0x100] sm:$0xff]  }
  0x8c   : > { %v5491_v50 = vor.u32 %v2075_v38, %v2072_v43  ;;  %v1784_v4 = vsel %vm1009_vm11, %v1774_v44, %v1783_v11  ;;  %v1689_v57 = vshrl.u32 %v3859_v39, 16  ;;  %v1692_v10 = vshll.u32 %v3859_v39, 16  ;;  %4441 = vmatprep.subr.bf16.mxu0 %v4691_v29  ;;  %v5518_v43 = vld [vmem:[%s6003_s3 + $0x1f8] sm:$0xff]  }
  0x8d   : > { %v615_v20 = vmul.f32 %v4719_v34, %v6034_v22  ;;  %4389 = vmatprep.mubr.bf16.mxu0 %v1784_v4  ;;  %v1788_v25 = vrot.slane %v1786_v2, 4  ;;  %v1791_v61 = vrot.slane %v1789_v17, 5  ;;  %v618_v34 = vmax.f32 %v616_v37, 0.0  ;;  %v5525_v38 = vld [vmem:[%s6003_s3 + $0x1b8] sm:$0xff]  }
  0x8e   : > { %v2077_v6 = vsel %vm1304_vm13, %v2067_v58, %v5491_v50  ;;  %v1691_v33 = vrot.slane %v1689_v57, 3  ;;  %v1694_v3 = vrot.slane %v1692_v10, 4  ;;  %v628_v44 = vstv %s627_s24  ;;  %4474 = vmatpush3.bf16.msra.mxu1 %v4692_v19 }
  0x8f   : > { %v617_v53 = vadd.f32 %v4720_v27, %v615_v20  ;;  %4425 = vmatprep.mubr.bf16.mxu1 %v2077_v6  ;;  %v1792_v32 = vor.u32 %v1791_v61, %v1788_v25  ;;  %4442 = vmatpush3.bf16.msra.mxu0 %v4691_v29  ;;  %vm5505_vm5 = vcmp.eq.s32.totalorder %v628_v44, 1  ;;  %v2438_v60 = vsel %vm1697_vm10, 0, %v5003_v21 }
  0x90   : > { %4475 = vmatprep.subr.bf16.mxu1 %v4694_v26  ;;  %v2439_v58 = vsel %vm6020_vm15, 0, %v5013_v31  ;;  %v5520_v19 = vor.u32 %v1694_v3, %v1691_v33  ;;  %4443 = vmatprep.subr.bf16.mxu0 %v4693_v1  ;;  %v2465_v28 = vshrl.u32 %v2438_v60, 16  ;;  %v2468_v21 = vshll.u32 %v2438_v60, 16 }
  0x91   : > { %v619_v52 = vmax.f32 %v617_v53, 0.0  ;;  %v1793_v39 = vsel %vm1009_vm11, %v1783_v11, %v1792_v32  ;;  %v2473_v22 = vshrl.u32 %v2439_v58, 16  ;;  %v2476_v20 = vshll.u32 %v2439_v58, 16 }
  0x92   : > { %v2440_v2 = vsel %vm1699_vm2, 0, %v5077_v47  ;;  %4390 = vmatmul.mubr.bf16.gmra.mxu0 %v1793_v39  ;;  %v5534_v17 = vsel %vm1304_vm13, %v5455_v18, %v5520_v19  ;;  %vm1705_vm1 = vcmp.ne.s16.totalorder %v5520_v19, 0  ;;  %4476 = vmatpush3.bf16.msra.mxu1 %v4694_v26  ;;  %v2467_v37 = vrot.slane %v2465_v28, 4 }
  0x93   : > { %v620_v29 = vpack.c.bf16 %v619_v52, %v618_v34  ;;  %vm1704_vm15 = vcmp.ne.s16.totalorder %v5534_v17, 0  ;;  %v1714_v11 = vsel %vm1705_vm1, 0, %v5291_v45  ;;  %4444 = vmatpush3.bf16.msra.mxu0 %v4693_v1  ;;  %v2470_v57 = vrot.slane %v2468_v21, 5  ;;  %4525 = vmatprep.subr.bf16.mxu1 %v5518_v43 }
  0x94   : > { %v1713_v18 = vsel %vm1704_vm15, 0, %v5254_v35  ;;  %v1804_v10 = vshrl.u32 %v1714_v11, 16  ;;  %v1807_v53 = vshll.u32 %v1714_v11, 16  ;;  %4493 = vmatprep.subr.bf16.mxu0 %v5525_v38  ;;  %v2475_v26 = vrot.slane %v2473_v22, 4 }
  0x95   : > { %v630_v27 = vsel %vm5505_vm5, 0, %v620_v29  ;;  %v1795_v25 = vshrl.u32 %v1713_v18, 16  ;;  %v1798_v61 = vshll.u32 %v1713_v18, 16  ;;  %v6037_v6 = vrot.slane %v5261_v7, 4 }
  0x96   : > { %v5543_v4 = vrot.slane %v630_v27, 4  ;;  %v2471_v1 = vor.u32 %v2470_v57, %v2467_v37  ;;  %v1806_v33 = vrot.slane %v1804_v10, 4  ;;  %v1809_v3 = vrot.slane %v1807_v53, 5 }
  0x97   : > { %v2478_v44 = vrot.slane %v2476_v20, 5  ;;  %v1797_v40 = vrot.slane %v1795_v25, 4  ;;  %v1800_v60 = vrot.slane %v1798_v61, 5  ;;  %v2482_v39 = vshrl.u32 %v2440_v2, 16 }
  0x98   : > { %v5554_v34 = vsel %vm641_vm0, %v6037_v6, %v5543_v4  ;;  %v1810_v28 = vor.u32 %v1809_v3, %v1806_v33  ;;  %v2485_v22 = vshll.u32 %v2440_v2, 16  ;;  %v2441_v37 = vsel %vm1700_vm8, 0, %v5105_v63 }
  0x99   : > { %v1989_v52 = vsel %vm1089_vm6, 0, %v5554_v34  ;;  %v2479_v21 = vor.u32 %v2478_v44, %v2475_v26  ;;  %v1801_v7 = vor.u32 %v1800_v60, %v1797_v40  ;;  %v2484_v57 = vrot.slane %v2482_v39, 4 }
  0x9a   : > { %v2079_v58 = vshrl.u32 %v1989_v52, 16  ;;  %v2082_v29 = vshll.u32 %v1989_v52, 16  ;;  %v2487_v18 = vrot.slane %v2485_v22, 5  ;;  %v2491_v10 = vshrl.u32 %v2441_v37, 16 }
  0x9b   : > { %v1802_v20 = vsel %vm1009_vm11, %v1792_v32, %v1801_v7  ;;  %v1811_v53 = vsel %vm1009_vm11, %v1801_v7, %v1810_v28  ;;  %v2494_v61 = vshll.u32 %v2441_v37, 16  ;;  %v2480_v26 = vsel %vm1009_vm11, %v2471_v1, %v2479_v21  ;;  %v4697_v28 = vld [vmem:[%s6003_s3 + $0x1b0] sm:$0xff]  }
  0x9c   : > { %v2081_v27 = vrot.slane %v2079_v58, 3  ;;  %v2084_v11 = vrot.slane %v2082_v29, 4  ;;  %4393 = vmatprep.mubr.bf16.mxu0 %v1802_v20  ;;  %v2442_v2 = vsel %vm1701_vm4, 0, %v5154_v48  ;;  %v2488_v33 = vor.u32 %v2487_v18, %v2484_v57 }
  0x9d   : > { %4394 = vmatmul.mubr.bf16.gmra.mxu0 %v1811_v53  ;;  %v2493_v32 = vrot.slane %v2491_v10, 4  ;;  %v2496_v3 = vrot.slane %v2494_v61, 5  ;;  %v2500_v52 = vshrl.u32 %v2442_v2, 16  ;;  %v2503_v44 = vshll.u32 %v2442_v2, 16  ;;  %v4699_v53 = vld [vmem:[%s6003_s3 + $0x1a8] sm:$0xff]  }
  0x9e   : > { %v2085_v25 = vor.u32 %v2084_v11, %v2081_v27  ;;  %4445 = vmatprep.mubr.bf16.mxu0 %v5029_v41  ;;  %v2443_v1 = vsel %vm1702_vm7, 0, %v5201_v49  ;;  %v2444_v40 = vsel %vm1703_vm3, 0, %v5254_v35  ;;  %v2489_v41 = vsel %vm1009_vm11, %v2479_v21, %v2488_v33  ;;  %v4698_v11 = vld [vmem:[%s6003_s3 + $0x1f0] sm:$0xff]  }
  0x9f   : > { %v2497_v60 = vor.u32 %v2496_v3, %v2493_v32  ;;  %v2509_v58 = vshrl.u32 %v2443_v1, 16  ;;  %v2512_v29 = vshll.u32 %v2443_v1, 16  ;;  %v2502_v39 = vrot.slane %v2500_v52, 4  ;;  %v4701_v1 = vld [vmem:[%s6003_s3 + $0x1a0] sm:$0xff]  }
  0xa0   : > { %v2086_v6 = vsel %vm1304_vm13, %v5491_v50, %v2085_v25  ;;  %v2445_v50 = vsel %vm1704_vm15, 0, %v5291_v45  ;;  %v2505_v22 = vrot.slane %v2503_v44, 5  ;;  %v2518_v7 = vshrl.u32 %v2444_v40, 16 }
  0xa1   : > { %4426 = vmatmul.mubr.bf16.gmra.mxu1 %v2086_v6  ;;  %v2521_v27 = vshll.u32 %v2444_v40, 16  ;;  %v2527_v37 = vshrl.u32 %v2445_v50, 16  ;;  %v2530_v57 = vshll.u32 %v2445_v50, 16  ;;  %v2498_v21 = vsel %vm1009_vm11, %v2488_v33, %v2497_v60  ;;  %v4702_v50 = vld [vmem:[%s6003_s3 + $0x1e0] sm:$0xff]  }
  0xa2   : > { %4477 = vmatprep.mubr.bf16.mxu1 %v2480_v26  ;;  %v2511_v18 = vrot.slane %v2509_v58, 4  ;;  %v2514_v10 = vrot.slane %v2512_v29, 5  ;;  %v2446_v20 = vsel %vm1705_vm1, 0, %v5554_v34  ;;  %v2506_v25 = vor.u32 %v2505_v22, %v2502_v39 }
  0xa3   : > { %v2520_v61 = vrot.slane %v2518_v7, 4  ;;  %v2523_v26 = vrot.slane %v2521_v27, 5  ;;  %v2529_v2 = vrot.slane %v2527_v37, 4  ;;  %v2713_v6 = vsel %vm1081_vm12, 0, %v5013_v31  ;;  %v4703_v7 = vld [vmem:[%s6003_s3 + $0x198] sm:$0xff]  }
  0xa4   : > { %v2536_v33 = vshrl.u32 %v2446_v20, 16  ;;  %v2539_v32 = vshll.u32 %v2446_v20, 16  ;;  %vm6038_vm5 = vcmp.ne.s16.totalorder %v5046_v54, 0  ;;  %v2515_v52 = vor.u32 %v2514_v10, %v2511_v18 }
  0xa5   : > { %4446 = vmatmul.mubr.bf16.vlgmr.msra.gmra.mxu0 %v5099_v56  ;;  %v2714_v3 = vsel %vm6038_vm5, 0, %v5077_v47  ;;  %v2507_v44 = vsel %vm1009_vm11, %v2497_v60, %v2506_v25  ;;  %v2524_v42 = vor.u32 %v2523_v26, %v2520_v61  ;;  %v2740_v40 = vshrl.u32 %v2713_v6, 16 }
  0xa6   : > { %4494 = vmatpush3.bf16.msra.mxu0 %v5525_v38  ;;  %4449 = vmatprep.mubr.bf16.mxu0 %v5119_v23  ;;  %v4700_v38 = vld [vmem:[%s6003_s3 + $0x1e8] sm:$0xff]   ;;  %v2748_v54 = vshrl.u32 %v2714_v3, 16  ;;  %v5617_v29 = vrot.slane %v2536_v33, 4  ;;  %v5619_v60 = vrot.slane %v2539_v32, 5  ;;  %v2516_v39 = vsel %vm1009_vm11, %v2506_v25, %v2515_v52 }
  0xa7   : > { %4495 = vmatprep.subr.bf16.mxu0 %v4697_v28  ;;  %vm6039_vm12 = vcmp.ne.s16.totalorder %v5081_v51, 0  ;;  %v2525_v27 = vsel %vm1009_vm11, %v2515_v52, %v2524_v42  ;;  %v2742_v37 = vrot.slane %v2740_v40, 3  ;;  %vm6040_vm5 = vcmp.ne.s16.totalorder %v5135_v46, 0 }
  0xa8   : > { %v2715_v22 = vsel %vm6039_vm12, 0, %v5105_v63  ;;  %v2716_v18 = vsel %vm6040_vm5, 0, %v5154_v48  ;;  %v2720_v10 = vsel %vm1088_vm14, 0, %v5554_v34  ;;  %v5646_v46 = vsel %vm641_vm0, %v5543_v4, 0  ;;  %v4706_v4 = vld [vmem:[%s6003_s3 + $0x1d0] sm:$0xff]  }
  0xa9   : > { %4478 = vmatmul.mubr.bf16.vlgmr.msra.gmra.mxu1 %v2489_v41  ;;  %v2743_v41 = vshll.u32 %v2713_v6, 16  ;;  %v2757_v61 = vshrl.u32 %v2715_v22, 16  ;;  %v2760_v26 = vshll.u32 %v2715_v22, 16  ;;  %v2766_v6 = vshrl.u32 %v2716_v18, 16 }
  0xaa   : > { %4526 = vmatpush3.bf16.msra.mxu1 %v5518_v43  ;;  %4481 = vmatprep.mubr.bf16.mxu1 %v2498_v21  ;;  %v2532_v43 = vrot.slane %v2530_v57, 5  ;;  %v4704_v57 = vld [vmem:[%s6003_s3 + $0x1d8] sm:$0xff]   ;;  %v2750_v21 = vrot.slane %v2748_v54, 3  ;;  %v2717_v33 = vsel %vm1085_vm9, 0, %v5201_v49  ;;  %v2721_v32 = vsel %vm1089_vm6, 0, %v5646_v46 }
  0xab   : > { %4527 = vmatprep.subr.bf16.mxu1 %v4698_v11  ;;  %4496 = vmatpush3.bf16.msra.mxu0 %v4697_v28  ;;  %v2751_v28 = vshll.u32 %v2714_v3, 16  ;;  %v2745_v51 = vrot.slane %v2743_v41, 4  ;;  %v2759_v62 = vrot.slane %v2757_v61, 3  ;;  %v2762_v9 = vrot.slane %v2760_v26, 4 }
  0xac   : > { %4497 = vmatprep.subr.bf16.mxu0 %v4699_v53  ;;  %v5615_v58 = vor.u32 %v2532_v43, %v2529_v2  ;;  %v2805_v2 = vshll.u32 %v2720_v10, 16  ;;  %v2769_v43 = vshll.u32 %v2716_v18, 16  ;;  %v2775_v22 = vshrl.u32 %v2717_v33, 16 }
  0xad   : > { %4450 = vmatmul.mubr.bf16.gmra.mxu0 %v5173_v5  ;;  %v2753_v25 = vrot.slane %v2751_v28, 4  ;;  %v2768_v28 = vrot.slane %v2766_v6, 3  ;;  %vm6042_vm9 = vcmp.ne.s16.totalorder %v5227_v24, 0  ;;  %v6043_v18 = vrot.slane %v5291_v45, 4 }
  0xae   : > { %4528 = vmatpush3.bf16.msra.mxu1 %v4698_v11  ;;  %v2274_v11 = vrot.slane %v5554_v34, 4  ;;  %4453 = vmatprep.mubr.bf16.mxu0 %v5216_v0  ;;  %v2534_v20 = vsel %vm1009_vm11, %v2524_v42, %v5615_v58  ;;  %v2807_v52 = vrot.slane %v2805_v2, 4  ;;  %v2746_v42 = vor.u32 %v2745_v51, %v2742_v37  ;;  %v6041_v51 = vld [vmem:[#allocation2_spill] sm:$0xff] }
  0xaf   : > { %4529 = vmatprep.subr.bf16.mxu1 %v4700_v38  ;;  %4498 = vmatpush3.bf16.msra.mxu0 %v4699_v53  ;;  %v2542_v53 = vor.u32 %v5619_v60, %v5617_v29  ;;  %v5661_v40 = vor.u32 %v2753_v25, %v2750_v21  ;;  %v4707_v60 = vld [vmem:[%s6003_s3 + $0x188] sm:$0xff]   ;;  %vm6044_vm6 = vcmp.ne.s16.totalorder %v5241_v55, 0  ;;  %v2763_v24 = vor.u32 %v2762_v9, %v2759_v62  ;;  %v4709_v55 = vld [vmem:[%s6003_s3 + $0x180] sm:$0xff]  }
  0xb0   : > { %4499 = vmatprep.subr.bf16.mxu0 %v4701_v1  ;;  %v5693_v26 = vsel %vm6044_vm6, 0, %v5291_v45 }
  0xb1   : > { %4482 = vmatmul.mubr.bf16.gmra.mxu1 %v2507_v44  ;;  %v2811_v44 = vshrl.u32 %v2721_v32, 16  ;;  %v2543_v25 = vsel %vm1009_vm11, %v5615_v58, %v2542_v53  ;;  %v2755_v61 = vsel %vm1304_vm13, %v2746_v42, %v5661_v40  ;;  %v3175_v58 = vsel %vm1702_vm7, 0, %v5254_v35  ;;  %v4711_v42 = vld [vmem:[%s6003_s3 + $0x238] sm:$0xff]  }
  0xb2   : > { %4530 = vmatpush3.bf16.msra.mxu1 %v4700_v38  ;;  %4485 = vmatprep.mubr.bf16.mxu1 %v2516_v39  ;;  %v2802_v38 = vshrl.u32 %v2720_v10, 16  ;;  %v2771_v39 = vrot.slane %v2769_v43, 4  ;;  %v5684_v10 = vsel %vm641_vm0, %v6043_v18, %v2274_v11  ;;  %v2777_v53 = vrot.slane %v2775_v22, 3 }
  0xb3   : > { %4531 = vmatprep.subr.bf16.mxu1 %v4702_v50  ;;  %4500 = vmatpush3.bf16.msra.mxu0 %v4701_v1  ;;  %v2814_v1 = vshll.u32 %v2721_v32, 16  ;;  %v2813_v54 = vrot.slane %v2811_v44, 3  ;;  %v3244_v6 = vshll.u32 %v3175_v58, 16  ;;  %v3176_v32 = vsel %vm1703_vm3, 0, %v5291_v45 }
  0xb4   : > { %4501 = vmatprep.subr.bf16.mxu0 %v4703_v7  ;;  %v2804_v3 = vrot.slane %v2802_v38, 3  ;;  %v3250_v62 = vshrl.u32 %v3176_v32, 16  ;;  %v3253_v8 = vshll.u32 %v3176_v32, 16 }
  0xb5   : > { %4454 = vmatmul.mubr.bf16.gmra.mxu0 %v5274_v12  ;;  %v2816_v29 = vrot.slane %v2814_v1, 4  ;;  %v3246_v1 = vrot.slane %v3244_v6, 5 }
  0xb6   : > { %4532 = vmatpush3.bf16.msra.mxu1 %v4702_v50  ;;  %v3006_v50 = vrot.slane %v5646_v46, 4  ;;  %v5664_v41 = vor.u32 %v2807_v52, %v2804_v3  ;;  %4457 = vmatprep.mubr.bf16.mxu0 %v6041_v51  ;;  %v2793_v3 = vshrl.u32 %v5693_v26, 16 }
  0xb7   : > { %4533 = vmatprep.subr.bf16.mxu1 %v4704_v57  ;;  %4502 = vmatpush3.bf16.msra.mxu0 %v4703_v7  ;;  %v4708_v7 = vld [vmem:[%s6003_s3 + $0x1c8] sm:$0xff]   ;;  %v2817_v21 = vor.u32 %v2816_v29, %v2813_v54  ;;  %v3177_v54 = vsel %vm1704_vm15, 0, %v5554_v34  ;;  %v3252_v29 = vrot.slane %v3250_v62, 4 }
  0xb8   : > { %4503 = vmatprep.subr.bf16.mxu0 %v4705_v16  ;;  %v5670_v37 = vsel %vm641_vm0, %v2274_v11, %v3006_v50  ;;  %v3174_v11 = vsel %vm1701_vm4, 0, %v5201_v49  ;;  %v4710_v49 = vld [vmem:[%s6003_s3 + $0x1c0] sm:$0xff]   ;;  %vm6045_vm0 = vcmp.ne.s16.totalorder %v5322_v14, 0 }
  0xb9   : > { %4486 = vmatmul.mubr.bf16.gmra.mxu1 %v2525_v27  ;;  %v2778_v27 = vshll.u32 %v2717_v33, 16  ;;  %v5697_v38 = vsel %vm1304_vm13, %v5664_v41, %v2817_v21  ;;  %v3235_v36 = vshll.u32 %v3174_v11, 16 }
  0xba   : > { %4534 = vmatpush3.bf16.msra.mxu1 %v4704_v57  ;;  %v5679_v57 = vsel %vm6042_vm9, 0, %v5254_v35  ;;  %4489 = vmatprep.mubr.bf16.mxu1 %v2534_v20  ;;  %v5708_v20 = vor.u32 %v2771_v39, %v2768_v28  ;;  %v3241_v35 = vshrl.u32 %v3175_v58, 16 }
  0xbb   : > { %4535 = vmatprep.subr.bf16.mxu1 %v4706_v4  ;;  %4504 = vmatpush3.bf16.msra.mxu0 %v4705_v16  ;;  %v2784_v2 = vshrl.u32 %v5679_v57, 16  ;;  %v3232_v16 = vshrl.u32 %v3174_v11, 16  ;;  %v2780_v59 = vrot.slane %v2778_v27, 4  ;;  %v2787_v43 = vshll.u32 %v5679_v57, 16 }
  0xbc   : > { %4505 = vmatprep.subr.bf16.mxu0 %v4707_v60  ;;  %v3237_v52 = vrot.slane %v3235_v36, 5  ;;  %v3243_v44 = vrot.slane %v3241_v35, 4  ;;  %v3262_v27 = vshll.u32 %v3177_v54, 16  ;;  %v2773_v18 = vsel %vm1304_vm13, %v2763_v24, %v5708_v20  ;;  %v4713_v36 = vld [vmem:[%s6003_s3 + $0x228] sm:$0xff]  }
  0xbd   : > { %4458 = vmatmul.mubr.bf16.gmra.mxu0 %v5684_v10  ;;  %v3234_v33 = vrot.slane %v3232_v16, 4  ;;  %v2789_v19 = vrot.slane %v2787_v43, 4  ;;  %v2781_v16 = vor.u32 %v2780_v59, %v2777_v53  ;;  %v2795_v53 = vrot.slane %v2793_v3, 3  ;;  %v4715_v3 = vld [vmem:[%s6003_s3 + $0x218] sm:$0xff]  }
  0xbe   : > { %4536 = vmatpush3.bf16.msra.mxu1 %v4706_v4  ;;  %v3173_v4 = vsel %vm1700_vm8, 0, %v5154_v48  ;;  %4509 = vmatprep.mubr.bf16.mxu0 %v2755_v61  ;;  %v2764_v48 = vsel %vm1304_vm13, %v5661_v40, %v2763_v24  ;;  %v3247_v9 = vor.u32 %v3246_v1, %v3243_v44  ;;  %v3178_v40 = vsel %vm1705_vm1, 0, %v5646_v46 }
  0xbf   : > { %4537 = vmatprep.subr.bf16.mxu1 %v4708_v7  ;;  %4506 = vmatpush3.bf16.msra.mxu0 %v4707_v60  ;;  %v3223_v45 = vshrl.u32 %v3173_v4, 16  ;;  %v3226_v50 = vshll.u32 %v3173_v4, 16  ;;  %v3238_v15 = vor.u32 %v3237_v52, %v3234_v33  ;;  %v3255_v60 = vrot.slane %v3253_v8, 5  ;;  %v4714_v33 = vld [vmem:[%s6003_s3 + $0x220] sm:$0xff]  }
  0xc0   : > { %4507 = vmatprep.subr.bf16.mxu0 %v4709_v55  ;;  %v3268_v57 = vshrl.u32 %v3178_v40, 16  ;;  %v3271_v21 = vshll.u32 %v3178_v40, 16  ;;  %v3264_v11 = vrot.slane %v3262_v27, 5  ;;  %v3171_v4 = vsel %vm6045_vm0, 0, %v5077_v47 }
  0xc1   : > { %4490 = vmatmul.mubr.bf16.gmra.mxu1 %v2543_v25  ;;  %v3225_v28 = vrot.slane %v3223_v45, 4  ;;  %v3228_v39 = vrot.slane %v3226_v50, 5  ;;  %v5733_v22 = vsel %vm1009_vm11, %v3238_v15, %v3247_v9  ;;  %v3256_v17 = vor.u32 %v3255_v60, %v3252_v29 }
  0xc2   : > { %4538 = vmatpush3.bf16.msra.mxu1 %v4708_v7  ;;  %4541 = vmatprep.mubr.bf16.mxu1 %v5099_v56  ;;  %v3259_v7 = vshrl.u32 %v3177_v54, 16  ;;  %v4712_v56 = vld [vmem:[%s6003_s3 + $0x230] sm:$0xff]   ;;  %v2786_v25 = vrot.slane %v2784_v2, 3  ;;  %v3273_v2 = vrot.slane %v3271_v21, 5  ;;  %v3205_v44 = vshrl.u32 %v3171_v4, 16 }
  0xc3   : > { %4539 = vmatprep.subr.bf16.mxu1 %v4710_v49  ;;  %4508 = vmatpush3.bf16.msra.mxu0 %v4709_v55  ;;  %v5741_v34 = vor.u32 %v3228_v39, %v3225_v28  ;;  %v5746_v46 = vsel %vm1009_vm11, %v3247_v9, %v3256_v17  ;;  %v3270_v55 = vrot.slane %v3268_v57, 4  ;;  %v3208_v1 = vshll.u32 %v3171_v4, 16 }
  0xc4   : > { %4557 = vmatprep.subr.bf16.mxu0 %v4711_v42  ;;  %v3261_v61 = vrot.slane %v3259_v7, 4  ;;  %v3172_v47 = vsel %vm1699_vm2, 0, %v5105_v63  ;;  %v3207_v62 = vrot.slane %v3205_v44, 4  ;;  %v4717_v63 = vld [vmem:[%s6003_s3 + $0x208] sm:$0xff]  }
  0xc5   : > { %v5750_v58 = vsel %vm1009_vm11, %v5741_v34, %v3238_v15  ;;  %v3274_v6 = vor.u32 %v3273_v2, %v3270_v55  ;;  %v3210_v8 = vrot.slane %v3208_v1, 5  ;;  %v3214_v45 = vshrl.u32 %v3172_v47, 16 }
  0xc6   : > { %4540 = vmatpush3.bf16.msra.mxu1 %v4710_v49  ;;  %4510 = vmatmul.mubr.bf16.vlgmr.msra.gmra.mxu0 %v2764_v48  ;;  %v2796_v49 = vshll.u32 %v5693_v26, 16  ;;  %v3265_v24 = vor.u32 %v3264_v11, %v3261_v61  ;;  %v2782_v26 = vsel %vm1304_vm13, %v5708_v20, %v2781_v16  ;;  %v3170_v20 = vsel %vm1697_vm10, 0, %v5013_v31  ;;  %v4716_v31 = vld [vmem:[%s6003_s3 + $0x210] sm:$0xff]  }
  0xc7   : > { %4589 = vmatprep.subr.bf16.mxu1 %v4711_v42  ;;  %4558 = vmatpush3.bf16.msra.mxu0 %v4711_v42  ;;  %v3200_v52 = vshll.u32 %v3170_v20, 16  ;;  %v3217_v50 = vshll.u32 %v3172_v47, 16  ;;  %v3216_v48 = vrot.slane %v3214_v45, 4  ;;  %vm3606_vm10 = vcmask 1040384  }
  0xc8   : > { %4559 = vmatprep.subr.bf16.mxu0 %v4712_v56  ;;  %4513 = vmatprep.mubr.bf16.mxu0 %v2773_v18  ;;  %v5758_v35 = vsel %vm1009_vm11, %v3256_v17, %v3265_v24  ;;  %v2798_v59 = vrot.slane %v2796_v49, 4  ;;  %v5764_v43 = vsel %vm1009_vm11, %v3265_v24, %v3274_v6 }
  0xc9   : > { %4542 = vmatmul.mubr.bf16.vlgmr.msra.gmra.mxu1 %v5119_v23  ;;  %v2790_v23 = vor.u32 %v2789_v19, %v2786_v25  ;;  %v3219_v15 = vrot.slane %v3217_v50, 5 }
  0xca   : > { %4597 = vmatpush3.bf16.msra.mxu1 %v4711_v42  ;;  %4545 = vmatprep.mubr.bf16.mxu1 %v5173_v5  ;;  %v2799_v32 = vor.u32 %v2798_v59, %v2795_v53  ;;  %v3202_v42 = vrot.slane %v3200_v52, 5 }
  0xcb   : > { %4590 = vmatprep.subr.bf16.mxu1 %v4712_v56  ;;  %4560 = vmatpush3.bf16.msra.mxu0 %v4712_v56  ;;  %v2791_v5 = vsel %vm1304_vm13, %v2781_v16, %v2790_v23 }
  0xcc   : > { %4561 = vmatprep.subr.bf16.mxu0 %v4713_v36  ;;  %v2800_v30 = vsel %vm1304_vm13, %v2790_v23, %v2799_v32 }
  0xce   : > { %4598 = vmatpush3.bf16.msra.mxu1 %v4712_v56  ;;  %4514 = vmatmul.mubr.bf16.gmra.mxu0 %v2782_v26 }
  0xcf   : > { %4591 = vmatprep.subr.bf16.mxu1 %v4713_v36  ;;  %4562 = vmatpush3.bf16.msra.mxu0 %v4713_v36 }
  0xd0   : > { %4563 = vmatprep.subr.bf16.mxu0 %v4714_v33  ;;  %4517 = vmatprep.mubr.bf16.mxu0 %v2791_v5 }
  0xd1   : > { %4546 = vmatmul.mubr.bf16.gmra.mxu1 %v5216_v0  ;;  %v3197_v0 = vshrl.u32 %v3170_v20, 16 }
  0xd2   : > { %4599 = vmatpush3.bf16.msra.mxu1 %v4713_v36  ;;  %4549 = vmatprep.mubr.bf16.mxu1 %v5274_v12  ;;  %v2809_v12 = vsel %vm1304_vm13, %v2799_v32, %v5664_v41  ;;  %v3211_v41 = vor.u32 %v3210_v8, %v3207_v62 }
  0xd3   : > { %4592 = vmatprep.subr.bf16.mxu1 %v4714_v33  ;;  %4564 = vmatpush3.bf16.msra.mxu0 %v4714_v33  ;;  %v3199_v14 = vrot.slane %v3197_v0, 4 }
  0xd4   : > { %4565 = vmatprep.subr.bf16.mxu0 %v4715_v3 }
  0xd5   : > { %v3203_v13 = vor.u32 %v3202_v42, %v3199_v14 }
  0xd6   : > { %4600 = vmatpush3.bf16.msra.mxu1 %v4714_v33  ;;  %4518 = vmatmul.mubr.bf16.gmra.mxu0 %v2800_v30 }
  0xd7   : > { %4593 = vmatprep.subr.bf16.mxu1 %v4715_v3  ;;  %4566 = vmatpush3.bf16.msra.mxu0 %v4715_v3  ;;  %v3212_v9 = vsel %vm1009_vm11, %v3203_v13, %v3211_v41 }
  0xd8   : > { %4567 = vmatprep.subr.bf16.mxu0 %v4716_v31  ;;  %4521 = vmatprep.mubr.bf16.mxu0 %v2809_v12 }
  0xd9   : > { %4550 = vmatmul.mubr.bf16.gmra.mxu1 %v6041_v51  ;;  %v4718_v51 = vld [vmem:[%s6003_s3 + $0x200] sm:$0xff]  }
  0xda   : > { %4601 = vmatpush3.bf16.msra.mxu1 %v4715_v3  ;;  %4553 = vmatprep.mubr.bf16.mxu1 %v5684_v10  ;;  %v3220_v10 = vor.u32 %v3219_v15, %v3216_v48 }
  0xdb   : > { %4594 = vmatprep.subr.bf16.mxu1 %v4716_v31  ;;  %4568 = vmatpush3.bf16.msra.mxu0 %v4716_v31 }
  0xdc   : > { %4569 = vmatprep.subr.bf16.mxu0 %v4717_v63  ;;  %v3221_v54 = vsel %vm1009_vm11, %v3211_v41, %v3220_v10  ;;  %v3230_v29 = vsel %vm1009_vm11, %v3220_v10, %v5741_v34 }
  0xde   : > { %4602 = vmatpush3.bf16.msra.mxu1 %v4716_v31  ;;  %4522 = vmatmul.mubr.bf16.gmra.mxu0 %v5697_v38 }
  0xdf   : > { %4595 = vmatprep.subr.bf16.mxu1 %v4717_v63  ;;  %4570 = vmatpush3.bf16.msra.mxu0 %v4717_v63 }
  0xe0   : > { %4571 = vmatprep.subr.bf16.mxu0 %v4718_v51  ;;  %4573 = vmatprep.mubr.bf16.mxu0 %v3212_v9 }
  0xe1   : > { %4554 = vmatmul.mubr.bf16.gmra.mxu1 %v5670_v37 }
  0xe2   : > { %4603 = vmatpush3.bf16.msra.mxu1 %v4717_v63  ;;  %4581 = vmatprep.mubr.bf16.mxu1 %v5733_v22 }
  0xe3   : > { %4596 = vmatprep.subr.bf16.mxu1 %v4718_v51  ;;  %4572 = vmatpush3.bf16.msra.mxu0 %v4718_v51 }
  0xe6   : > { %4604 = vmatpush3.bf16.msra.mxu1 %v4718_v51  ;;  %4574 = vmatmul.mubr.bf16.vlgmr.msra.gmra.mxu0 %v3221_v54 }
  0xe7   : > { %4577 = vmatprep.mubr.bf16.mxu0 %v3230_v29 }
  0xe9   : > { %4582 = vmatmul.mubr.bf16.vlgmr.msra.gmra.mxu1 %v5746_v46 }
  0xea   : > { %4585 = vmatprep.mubr.bf16.mxu1 %v5758_v35 }
  0xee   : > { %4578 = vmatmul.mubr.bf16.gmra.mxu0 %v5750_v58 }
  0xef   : > { %v4319_v37 = vpop.f32.mrf.mxu0 }
  0xf1   : > { %4586 = vmatmul.mubr.bf16.gmra.mxu1 %v5764_v43  ;;  %v1241_v38 = vpop.f32.mrf.mxu0 }
  0xf3   : > { %v4320_v60 = vpop.f32.mrf.mxu0 }
  0xf5   : > { %v1244_v22 = vpop.f32.mrf.mxu0 }
  0xff   : > { %v4323_v17 = vpop.f32.mrf.mxu0 }
 0x100   : > { %v4351_v28 = vpop.f32.mrf.mxu1 }
 0x101   : > { %v1484_v39 = vadd.f32 %v4351_v28, %v4319_v37  ;;  %v1257_v21 = vpop.f32.mrf.mxu0 }
 0x102   : > { %v1475_v7 = vpop.f32.mrf.mxu1 }
 0x103   : > { %v1476_v27 = vadd.f32 %v1475_v7, %v1241_v38  ;;  %v4324_v18 = vpop.f32.mrf.mxu0 }
 0x104   : > { %v4352_v40 = vpop.f32.mrf.mxu1 }
 0x105   : > { %v1487_v56 = vadd.f32 %v4352_v40, %v4320_v60  ;;  %v1260_v46 = vpop.f32.mrf.mxu0 }
 0x106   : > { %v1478_v34 = vpop.f32.mrf.mxu1 }
 0x107   : > { %v1479_v57 = vadd.f32 %v1478_v34, %v1244_v22 }
 0x10f   : > { %v4355_v25 = vpop.f32.mrf.mxu1  ;;  %v4327_v49 = vpop.f32.mrf.mxu0 }
 0x110   : > { %v1500_v61 = vadd.f32 %v4355_v25, %v4323_v17 }
 0x111   : > { %v1491_v11 = vpop.f32.mrf.mxu1  ;;  %v1273_v2 = vpop.f32.mrf.mxu0 }
 0x112   : > { %v1492_v19 = vadd.f32 %v1491_v11, %v1257_v21 }
 0x113   : > { %v4356_v58 = vpop.f32.mrf.mxu1  ;;  %v4328_v6 = vpop.f32.mrf.mxu0 }
 0x114   : > { %v1503_v55 = vadd.f32 %v4356_v58, %v4324_v18 }
 0x115   : > { %v1494_v16 = vpop.f32.mrf.mxu1  ;;  %v1276_v59 = vpop.f32.mrf.mxu0 }
 0x116   : > { %v1495_v24 = vadd.f32 %v1494_v16, %v1260_v46 }
 0x11e   : > { %v4359_v36 = vpop.f32.mrf.mxu1 }
 0x11f   : > { %v1516_v35 = vadd.f32 %v4359_v36, %v4327_v49 }
 0x120   : > { %v1507_v23 = vpop.f32.mrf.mxu1  ;;  %v4331_v32 = vpop.f32.mrf.mxu0 }
 0x121   : > { %v1508_v26 = vadd.f32 %v1507_v23, %v1273_v2 }
 0x122   : > { %v4360_v53 = vpop.f32.mrf.mxu1  ;;  %v1289_v20 = vpop.f32.mrf.mxu0 }
 0x123   : > { %v1519_v43 = vadd.f32 %v4360_v53, %v4328_v6 }
 0x124   : > { %v1510_v33 = vpop.f32.mrf.mxu1  ;;  %v4332_v0 = vpop.f32.mrf.mxu0 }
 0x125   : > { %v1511_v5 = vadd.f32 %v1510_v33, %v1276_v59 }
 0x126   : > { %v1292_v31 = vpop.f32.mrf.mxu0 }
 0x12c   : > { %v4363_v4 = vpop.f32.mrf.mxu1 }
 0x12d   : > { %v1532_v3 = vadd.f32 %v4363_v4, %v4331_v32 }
 0x12e   : > { %v1523_v52 = vpop.f32.mrf.mxu1 }
 0x12f   : > { %v1524_v44 = vadd.f32 %v1523_v52, %v1289_v20 }
 0x130   : > { %v4364_v1 = vpop.f32.mrf.mxu1 }
 0x131   : > { %v1535_v30 = vadd.f32 %v4364_v1, %v4332_v0 }
 0x132   : > { %v1526_v47 = vpop.f32.mrf.mxu1 }
 0x133   : > { %v1527_v12 = vadd.f32 %v1526_v47, %v1292_v31 }
 0x134   : > { %v4415_v14 = vpop.f32.mrf.mxu1 }
 0x136   : > { %v4383_v42 = vpop.f32.mrf.mxu0  ;;  %v2177_v62 = vpop.f32.mrf.mxu1 }
 0x137   : > { %v1967_v8 = vadd.f32 %v4383_v42, %v1484_v39 }
 0x138   : > { %v1902_v45 = vpop.f32.mrf.mxu0  ;;  %v4416_v50 = vpop.f32.mrf.mxu1 }
 0x139   : > { %v1965_v63 = vadd.f32 %v1902_v45, %v1476_v27  ;;  %v5809_v13 = vadd.f32 %v4415_v14, %v1967_v8 }
 0x13a   : > { %v4384_v41 = vpop.f32.mrf.mxu0  ;;  %v2180_v48 = vpop.f32.mrf.mxu1 }
 0x13b   : > { %v1968_v15 = vadd.f32 %v4384_v41, %v1487_v56  ;;  %v5811_v51 = vadd.f32 %v2177_v62, %v1965_v63 }
 0x13c   : > { %v1905_v9 = vpop.f32.mrf.mxu0  ;;  %v4419_v10 = vpop.f32.mrf.mxu1 }
 0x13d   : > { %v1966_v54 = vadd.f32 %v1905_v9, %v1479_v57  ;;  %v5813_v29 = vadd.f32 %v4416_v50, %v1968_v15 }
 0x13e   : > { %v2193_v38 = vpop.f32.mrf.mxu1 }
 0x13f   : > { %v5815_v37 = vadd.f32 %v2180_v48, %v1966_v54 }
 0x140   : > { %v4420_v60 = vpop.f32.mrf.mxu1 }
 0x142   : > { %v2196_v7 = vpop.f32.mrf.mxu1 }
 0x146   : > { %v4387_v28 = vpop.f32.mrf.mxu0 }
 0x147   : > { %v1971_v39 = vadd.f32 %v4387_v28, %v1500_v61 }
 0x148   : > { %v1918_v22 = vpop.f32.mrf.mxu0 }
 0x149   : > { %v1969_v27 = vadd.f32 %v1918_v22, %v1492_v19  ;;  %v5817_v40 = vadd.f32 %v4419_v10, %v1971_v39  ;;  %v4423_v18 = vpop.f32.mrf.mxu1 }
 0x14a   : > { %v4388_v17 = vpop.f32.mrf.mxu0 }
 0x14b   : > { %v1972_v56 = vadd.f32 %v4388_v17, %v1503_v55  ;;  %v5819_v34 = vadd.f32 %v2193_v38, %v1969_v27  ;;  %v2209_v46 = vpop.f32.mrf.mxu1 }
 0x14c   : > { %v1921_v21 = vpop.f32.mrf.mxu0 }
 0x14d   : > { %v1970_v57 = vadd.f32 %v1921_v21, %v1495_v24  ;;  %v5821_v25 = vadd.f32 %v4420_v60, %v1972_v56  ;;  %v4424_v49 = vpop.f32.mrf.mxu1 }
 0x14f   : > { %v5823_v11 = vadd.f32 %v2196_v7, %v1970_v57  ;;  %v2212_v53 = vpop.f32.mrf.mxu1 }
 0x152   : > { %v4391_v58 = vpop.f32.mrf.mxu0 }
 0x153   : > { %v1975_v16 = vadd.f32 %v4391_v58, %v1516_v35 }
 0x154   : > { %v1934_v61 = vpop.f32.mrf.mxu0 }
 0x155   : > { %v1973_v2 = vadd.f32 %v1934_v61, %v1508_v26  ;;  %v5825_v19 = vadd.f32 %v4423_v18, %v1975_v16 }
 0x156   : > { %v4392_v36 = vpop.f32.mrf.mxu0 }
 0x157   : > { %v1976_v6 = vadd.f32 %v4392_v36, %v1519_v43  ;;  %v5827_v55 = vadd.f32 %v2209_v46, %v1973_v2 }
 0x158   : > { %v1937_v23 = vpop.f32.mrf.mxu0 }
 0x159   : > { %v1974_v59 = vadd.f32 %v1937_v23, %v1511_v5  ;;  %v5829_v24 = vadd.f32 %v4424_v49, %v1976_v6 }
 0x15b   : > { %v5831_v33 = vadd.f32 %v2212_v53, %v1974_v59 }
 0x15d   : > { %v4395_v32 = vpop.f32.mrf.mxu0 }
 0x15e   : > { %v1979_v20 = vadd.f32 %v4395_v32, %v1532_v3 }
 0x15f   : > { %v1950_v35 = vpop.f32.mrf.mxu0 }
 0x160   : > { %v1977_v0 = vadd.f32 %v1950_v35, %v1524_v44 }
 0x161   : > { %v4427_v4 = vpop.f32.mrf.mxu1  ;;  %v4396_v1 = vpop.f32.mrf.mxu0 }
 0x162   : > { %v5833_v52 = vadd.f32 %v4427_v4, %v1979_v20  ;;  %v1980_v31 = vadd.f32 %v4396_v1, %v1535_v30 }
 0x163   : > { %v2225_v26 = vpop.f32.mrf.mxu1  ;;  %v1953_v14 = vpop.f32.mrf.mxu0 }
 0x164   : > { %v5835_v43 = vadd.f32 %v2225_v26, %v1977_v0  ;;  %v1978_v42 = vadd.f32 %v1953_v14, %v1527_v12 }
 0x165   : > { %v4428_v47 = vpop.f32.mrf.mxu1  ;;  %v4447_v8 = vpop.f32.mrf.mxu0 }
 0x166   : > { %v5837_v5 = vadd.f32 %v4428_v47, %v1980_v31 }
 0x167   : > { %v2228_v62 = vpop.f32.mrf.mxu1  ;;  %v2359_v50 = vpop.f32.mrf.mxu0 }
 0x168   : > { %v5839_v45 = vadd.f32 %v2228_v62, %v1978_v42 }
 0x169   : > { %v4479_v3 = vpop.f32.mrf.mxu1  ;;  %v4448_v44 = vpop.f32.mrf.mxu0 }
 0x16b   : > { %v2634_v63 = vpop.f32.mrf.mxu1  ;;  %v2362_v48 = vpop.f32.mrf.mxu0 }
 0x16d   : > { %v4480_v41 = vpop.f32.mrf.mxu1  ;;  %v4451_v9 = vpop.f32.mrf.mxu0 }
 0x16f   : > { %v2637_v15 = vpop.f32.mrf.mxu1  ;;  %v2375_v10 = vpop.f32.mrf.mxu0 }
 0x171   : > { %v4483_v30 = vpop.f32.mrf.mxu1  ;;  %v4452_v38 = vpop.f32.mrf.mxu0 }
 0x173   : > { %v2650_v54 = vpop.f32.mrf.mxu1  ;;  %v2378_v12 = vpop.f32.mrf.mxu0 }
 0x175   : > { %v4484_v60 = vpop.f32.mrf.mxu1  ;;  %v4455_v39 = vpop.f32.mrf.mxu0 }
 0x177   : > { %v2653_v28 = vpop.f32.mrf.mxu1  ;;  %v2391_v7 = vpop.f32.mrf.mxu0 }
 0x179   : > { %v4487_v22 = vpop.f32.mrf.mxu1  ;;  %v4456_v17 = vpop.f32.mrf.mxu0 }
 0x17b   : > { %v5841_v27 = vpop.f32.mrf.mxu1  ;;  %v2394_v21 = vpop.f32.mrf.mxu0 }
 0x17d   : > { %v5843_v56 = vpop.f32.mrf.mxu1  ;;  %v4459_v57 = vpop.f32.mrf.mxu0 }
 0x17f   : > { %v5845_v18 = vpop.f32.mrf.mxu1  ;;  %v2407_v58 = vpop.f32.mrf.mxu0 }
 0x181   : > { %v5847_v46 = vpop.f32.mrf.mxu1  ;;  %v4460_v61 = vpop.f32.mrf.mxu0 }
 0x182   : > { %6046 = vst [vmem:[#allocation2_spill] sm:$0xff] %v5847_v46 }
 0x183   : > { %v5849_v16 = vpop.f32.mrf.mxu1  ;;  %v2410_v2 = vpop.f32.mrf.mxu0 }
 0x184   : > { %6047 = vst [vmem:[#allocation3_spill] sm:$0xff] %v5849_v16 }
 0x185   : > { %v5851_v49 = vpop.f32.mrf.mxu1 }
 0x186   : > { %6048 = vst [vmem:[#allocation4_spill] sm:$0xff] %v5851_v49  ;;  %v4511_v6 = vpop.f32.mrf.mxu0 }
 0x187   : > { %v5853_v36 = vpop.f32.mrf.mxu1 }
 0x188   : > { %6049 = vst [vmem:[#allocation5_spill] sm:$0xff] %v5853_v36  ;;  %v2909_v53 = vpop.f32.mrf.mxu0 }
 0x189   : > { %v5855_v23 = vpop.f32.mrf.mxu1 }
 0x18a   : > { %6050 = vst [vmem:[#allocation6_spill] sm:$0xff] %v5855_v23  ;;  %v4512_v32 = vpop.f32.mrf.mxu0 }
 0x18b   : > { %v5857_v59 = vpop.f32.mrf.mxu1 }
 0x18c   : > { %6051 = vst [vmem:[#allocation7_spill] sm:$0xff] %v5857_v59  ;;  %v2912_v4 = vpop.f32.mrf.mxu0 }
 0x18d   : > { %v5859_v20 = vpop.f32.mrf.mxu1 }
 0x18e   : > { %6052 = vst [vmem:[#allocation8_spill] sm:$0xff] %v5859_v20  ;;  %v4515_v0 = vpop.f32.mrf.mxu0 }
 0x18f   : > { %v5861_v35 = vpop.f32.mrf.mxu1 }
 0x190   : > { %6053 = vst [vmem:[#allocation9_spill] sm:$0xff] %v5861_v35  ;;  %v2925_v1 = vpop.f32.mrf.mxu0 }
 0x191   : > { %v5863_v26 = vpop.f32.mrf.mxu1 }
 0x192   : > { %6054 = vst [vmem:[#allocation10_spill] sm:$0xff] %v5863_v26  ;;  %v4516_v47 = vpop.f32.mrf.mxu0  ;;  %v2424_v26 = vadd.f32 %v4447_v8, %v5809_v13  ;;  %v2429_v13 = vadd.f32 %v4452_v38, %v5821_v25  ;;  %v2427_v8 = vadd.f32 %v2378_v12, %v5823_v11  ;;  %v2436_v25 = vadd.f32 %v4459_v57, %v5833_v52  ;;  %v6064_v38 = vld [vmem:[#allocation2_spill] sm:$0xff] }
 0x193   : > { %v5865_v31 = vpop.f32.mrf.mxu1  ;;  %v2434_v11 = vadd.f32 %v2407_v58, %v5835_v43  ;;  %v6066_v43 = vld [vmem:[#allocation4_spill] sm:$0xff] }
 0x194   : > { %6055 = vst [vmem:[#allocation11_spill] sm:$0xff] %v5865_v31  ;;  %v5869_v42 = vpop.f32.mrf.mxu0  ;;  %v2422_v31 = vadd.f32 %v2359_v50, %v5811_v51  ;;  %v2699_v16 = vadd.f32 %v4479_v3, %v2424_v26  ;;  %v2432_v3 = vadd.f32 %v4455_v39, %v5825_v19 }
 0x195   : > { %v5867_v14 = vpop.f32.mrf.mxu1  ;;  %6057 = vst [vmem:[#allocation13_spill] sm:$0xff] %v5869_v42 }
 0x196   : > { %6056 = vst [vmem:[#allocation12_spill] sm:$0xff] %v5867_v14  ;;  %v4519_v59 = vpop.f32.mrf.mxu0  ;;  %v2425_v14 = vadd.f32 %v4448_v44, %v5813_v29  ;;  %v2974_v52 = vadd.f32 %v4511_v6, %v2699_v16 }
 0x197   : > { %v5871_v62 = vpop.f32.mrf.mxu1 }
 0x198   : > { %6058 = vst [vmem:[#allocation14_spill] sm:$0xff] %v5871_v62  ;;  %v5875_v20 = vpop.f32.mrf.mxu0  ;;  %v2423_v62 = vadd.f32 %v2362_v48, %v5815_v37  ;;  %v2704_v37 = vadd.f32 %v4484_v60, %v2429_v13  ;;  %v2702_v48 = vadd.f32 %v2653_v28, %v2427_v8  ;;  %v2711_v60 = vadd.f32 %v6064_v38, %v2436_v25 }
 0x199   : > { %v5873_v23 = vpop.f32.mrf.mxu1  ;;  %6060 = vst [vmem:[#allocation16_spill] sm:$0xff] %v5875_v20  ;;  %v2426_v20 = vadd.f32 %v2375_v10, %v5819_v34  ;;  %v2433_v34 = vadd.f32 %v4456_v17, %v5829_v24  ;;  %v2437_v10 = vadd.f32 %v4460_v61, %v5837_v5 }
 0x19a   : > { %6059 = vst [vmem:[#allocation15_spill] sm:$0xff] %v5873_v23  ;;  %v5879_v35 = vpop.f32.mrf.mxu0  ;;  %v2428_v23 = vadd.f32 %v4451_v9, %v5817_v40  ;;  %v2698_v51 = vadd.f32 %v2637_v15, %v2423_v62  ;;  %v2430_v40 = vadd.f32 %v2391_v7, %v5827_v55  ;;  %v2435_v55 = vadd.f32 %v2410_v2, %v5839_v45  ;;  %v6072_v62 = vld [vmem:[#allocation10_spill] sm:$0xff] }
 0x19b   : > { %v5877_v36 = vpop.f32.mrf.mxu1  ;;  %6062 = vst [vmem:[#allocation18_spill] sm:$0xff] %v5879_v35  ;;  %v2700_v35 = vadd.f32 %v4480_v41, %v2425_v14  ;;  %v2701_v29 = vadd.f32 %v2650_v54, %v2426_v20  ;;  %v2431_v41 = vadd.f32 %v2394_v21, %v5831_v33  ;;  %v2708_v19 = vadd.f32 %v5843_v56, %v2433_v34  ;;  %v6065_v33 = vld [vmem:[#allocation3_spill] sm:$0xff]  ;;  %v6068_v21 = vld [vmem:[#allocation6_spill] sm:$0xff] }
 0x19c   : > { %6061 = vst [vmem:[#allocation17_spill] sm:$0xff] %v5877_v36  ;;  %v2944_v42 = vpop.f32.mrf.mxu0  ;;  %v2697_v36 = vadd.f32 %v2634_v63, %v2422_v31  ;;  %v2703_v50 = vadd.f32 %v4483_v30, %v2428_v23  ;;  %v2707_v63 = vadd.f32 %v4487_v22, %v2432_v3  ;;  %v2705_v30 = vadd.f32 %v5841_v27, %v2430_v40  ;;  %v6067_v22 = vld [vmem:[#allocation5_spill] sm:$0xff]  ;;  %v6070_v23 = vld [vmem:[#allocation8_spill] sm:$0xff] }
 0x19d   : > { %v5882_v49 = vpop.f32.mrf.mxu1  ;;  %v2706_v24 = vadd.f32 %v5845_v18, %v2431_v41  ;;  %v2709_v12 = vadd.f32 %v6065_v33, %v2434_v11  ;;  %v2712_v39 = vadd.f32 %v6066_v43, %v2437_v10  ;;  %v2710_v7 = vadd.f32 %v6067_v22, %v2435_v55  ;;  %v6069_v18 = vld [vmem:[#allocation7_spill] sm:$0xff]  ;;  %v6071_v31 = vld [vmem:[#allocation9_spill] sm:$0xff] }
 0x19e   : > { %6063 = vst [vmem:[#allocation19_spill] sm:$0xff] %v5882_v49  ;;  %v4523_v49 = vpop.f32.mrf.mxu0  ;;  %v2972_v27 = vadd.f32 %v2909_v53, %v2697_v36  ;;  %v2975_v17 = vadd.f32 %v4512_v32, %v2700_v35  ;;  %v3156_v5 = vadd.f32 %v6068_v21, %v2974_v52  ;;  %v2973_v57 = vadd.f32 %v2912_v4, %v2698_v51  ;;  %v6073_v36 = vld [vmem:[#allocation11_spill] sm:$0xff]  ;;  %v6074_v32 = vld [vmem:[#allocation13_spill] sm:$0xff]  ;;  %v6075_v4 = vld [vmem:[#allocation12_spill] sm:$0xff] }
 0x19f   : > { %v5889_v46 = vpop.f32.mrf.mxu1  ;;  %v2978_v45 = vadd.f32 %v4515_v0, %v2703_v50  ;;  %v2976_v58 = vadd.f32 %v2925_v1, %v2701_v29  ;;  %v2979_v26 = vadd.f32 %v4516_v47, %v2704_v37  ;;  %v2982_v16 = vadd.f32 %v4519_v59, %v2707_v63  ;;  %v6079_v25 = vld [vmem:[#allocation14_spill] sm:$0xff] }
 0x1a0   : > { %v2957_v9 = vpop.f32.mrf.mxu0  ;;  %v3154_v2 = vadd.f32 %v6069_v18, %v2972_v27  ;;  %v3157_v20 = vadd.f32 %v6070_v23, %v2975_v17  ;;  %v3155_v14 = vadd.f32 %v6071_v31, %v2973_v57  ;;  %v2977_v35 = vadd.f32 %v6074_v32, %v2702_v48  ;;  %v6076_v1 = vld [vmem:[#allocation16_spill] sm:$0xff] }
 0x1a1   : > { %v4555_v44 = vpop.f32.mrf.mxu1  ;;  %v3160_v13 = vadd.f32 %v6072_v62, %v2978_v45  ;;  %v3158_v53 = vadd.f32 %v6073_v36, %v2976_v58  ;;  %v5918_v0 = vadd.f32 %v6075_v4, %v2979_v26  ;;  %v2980_v51 = vadd.f32 %v6076_v1, %v2705_v30  ;;  %v6077_v50 = vld [vmem:[#allocation15_spill] sm:$0xff]  ;;  %v5931_v30 = vld [vmem:[%s6004_s4] ss:$0 sm:$0xff] }
 0x1a2   : > { %v4524_v54 = vpop.f32.mrf.mxu0  ;;  %v3164_v29 = vadd.f32 %v6077_v50, %v2982_v16  ;;  %v6078_v3 = vld [vmem:[#allocation18_spill] sm:$0xff]  ;;  %v2981_v37 = vadd.f32 %v2944_v42, %v2706_v24  ;;  %v2986_v40 = vadd.f32 %v4523_v49, %v2711_v60  ;;  %v5924_v11 = vadd.f32 %v6079_v25, %v2977_v35 }
 0x1a3   : > { %v5899_v15 = vpop.f32.mrf.mxu1  ;;  %v2983_v47 = vadd.f32 %v6078_v3, %v2708_v19  ;;  %v6080_v48 = vld [vmem:[#allocation17_spill] sm:$0xff]  ;;  %v2984_v42 = vadd.f32 %v2957_v9, %v2709_v12  ;;  %v2987_v43 = vadd.f32 %v4524_v54, %v2712_v39 }
 0x1a4   : > { %v2960_v56 = vpop.f32.mrf.mxu0  ;;  %v3162_v10 = vadd.f32 %v6080_v48, %v2980_v51  ;;  %v3163_v49 = vadd.f32 %v5889_v46, %v2981_v37  ;;  %v3168_v24 = vadd.f32 %v4555_v44, %v2986_v40 }
 0x1a5   : > { %v4556_v28 = vpop.f32.mrf.mxu1  ;;  %v6081_v55 = vld [vmem:[#allocation19_spill] sm:$0xff]  ;;  %v2985_v22 = vadd.f32 %v2960_v56, %v2710_v7  ;;  %v3166_v46 = vadd.f32 %v5899_v15, %v2984_v42 }
 0x1a6   : > { %v4575_v6 = vpop.f32.mrf.mxu0  ;;  %v3165_v38 = vadd.f32 %v6081_v55, %v2983_v47  ;;  %v3169_v39 = vadd.f32 %v4556_v28, %v2987_v43 }
 0x1a7   : > { %v3142_v61 = vpop.f32.mrf.mxu1  ;;  %v3431_v34 = vadd.f32 %v4575_v6, %v3156_v5 }
 0x1a8   : > { %v3366_v59 = vpop.f32.mrf.mxu0  ;;  %v3167_v7 = vadd.f32 %v3142_v61, %v2985_v22 }
 0x1a9   : > { %v4583_v8 = vpop.f32.mrf.mxu1  ;;  %v3429_v63 = vadd.f32 %v3366_v59, %v3154_v2  ;;  %v3454_v5 = vadd.f32 %v5931_v30, %v3431_v34 }
 0x1aa   : > { %v3439_v33 = vadd.f32 %v4583_v8, %v3164_v29  ;;  %v4576_v19 = vpop.f32.mrf.mxu0 }
 0x1ab   : > { %v3398_v41 = vpop.f32.mrf.mxu1  ;;  %v3432_v60 = vadd.f32 %v4576_v19, %v3157_v20  ;;  %v3452_v57 = vadd.f32 %v5931_v30, %v3429_v63  ;;  %v3571_v36 = vmul.f32 %v3454_v5, %v3454_v5 }
 0x1ac   : > { %v3437_v27 = vadd.f32 %v3398_v41, %v3162_v10  ;;  %v3369_v17 = vpop.f32.mrf.mxu0  ;;  %v5945_v44 = vadd.f32 %v5931_v30, %v3439_v33 }
 0x1ad   : > { %v4584_v52 = vpop.f32.mrf.mxu1  ;;  %v3455_v45 = vadd.f32 %v5931_v30, %v3432_v60  ;;  %v3430_v58 = vadd.f32 %v3369_v17, %v3155_v14  ;;  %v3569_v31 = vmul.f32 %v3452_v57, %v3452_v57 }
 0x1ae   : > { %v3440_v21 = vadd.f32 %v4584_v52, %v3165_v38  ;;  %v4579_v54 = vpop.f32.mrf.mxu0  ;;  %v3460_v20 = vadd.f32 %v5931_v30, %v3437_v27 }
 0x1af   : > { %v3401_v18 = vpop.f32.mrf.mxu1  ;;  %v4111_v56 = vpack.c.bf16 %v3455_v45, %v3454_v5  ;;  %v3453_v2 = vadd.f32 %v5931_v30, %v3430_v58  ;;  %v3435_v26 = vadd.f32 %v4579_v54, %v3160_v13  ;;  %v3572_v1 = vmul.f32 %v3455_v45, %v3455_v45 }
 0x1b0   : > { %v5948_v9 = vadd.f32 %v5931_v30, %v3440_v21  ;;  %v3438_v12 = vadd.f32 %v3401_v18, %v3163_v49  ;;  %v3382_v6 = vpop.f32.mrf.mxu0  ;;  %v3577_v18 = vmul.f32 %v3460_v20, %v3460_v20 }
 0x1b1   : > { %v4587_v23 = vpop.f32.mrf.mxu1  ;;  %4150 = vst [vmem:[%s5941_s15 + $0x8] sm:$0xff] %v4111_v56   ;;  %v4106_v14 = vpack.c.bf16 %v3453_v2, %v3452_v57  ;;  %v3548_v28 = vadd.f32 %v3453_v2, %v3452_v57  ;;  %v3570_v61 = vmul.f32 %v3453_v2, %v3453_v2  ;;  %v3433_v35 = vadd.f32 %v3382_v6, %v3158_v53 }
 0x1b2   : > { %v4131_v15 = vpack.c.bf16 %v5948_v9, %v5945_v44  ;;  %v3461_v16 = vadd.f32 %v5931_v30, %v3438_v12  ;;  %v3443_v8 = vadd.f32 %v4587_v23, %v3168_v24  ;;  %v4580_v4 = vpop.f32.mrf.mxu0  ;;  %v3458_v3 = vadd.f32 %v5931_v30, %v3435_v26 }
 0x1b3   : > { %v3414_v62 = vpop.f32.mrf.mxu1  ;;  %4107 = vst [vmem:[%s5941_s15] sm:$0xff] %v4106_v14   ;;  %v3549_v13 = vadd.f32 %v3548_v28, %v3454_v5  ;;  %v3585_v51 = vadd.f32 %v3570_v61, %v3569_v31  ;;  %v3436_v50 = vadd.f32 %v4580_v4, %v5918_v0  ;;  %v3456_v47 = vadd.f32 %v5931_v30, %v3433_v35 }
 0x1b4   : > { %4154 = vst [vmem:[%s5941_s15 + $0x28] sm:$0xff] %v4131_v15   ;;  %v4126_v32 = vpack.c.bf16 %v3461_v16, %v3460_v20  ;;  %v3441_v59 = vadd.f32 %v3414_v62, %v3166_v46  ;;  %v3385_v37 = vpop.f32.mrf.mxu0  ;;  %v3466_v48 = vadd.f32 %v5931_v30, %v3443_v8  ;;  %v3575_v17 = vmul.f32 %v3458_v3, %v3458_v3 }
 0x1b5   : > { %v4588_v29 = vpop.f32.mrf.mxu1  ;;  %v3586_v34 = vadd.f32 %v3585_v51, %v3571_v36  ;;  %v3550_v53 = vadd.f32 %v3549_v13, %v3455_v45  ;;  %v3459_v63 = vadd.f32 %v5931_v30, %v3436_v50  ;;  %v3434_v41 = vadd.f32 %v3385_v37, %v5924_v11 }
 0x1b6   : > { %4153 = vst [vmem:[%s5941_s15 + $0x20] sm:$0xff] %v4126_v32   ;;  %v3444_v40 = vadd.f32 %v4588_v29, %v3169_v39  ;;  %v3573_v38 = vmul.f32 %v3456_v47, %v3456_v47  ;;  %v3464_v11 = vadd.f32 %v5931_v30, %v3441_v59  ;;  %v3578_v12 = vmul.f32 %v3461_v16, %v3461_v16 }
 0x1b7   : > { %v3417_v25 = vpop.f32.mrf.mxu1  ;;  %v3551_v55 = vadd.f32 %v3550_v53, %v3456_v47  ;;  %v3587_v33 = vadd.f32 %v3586_v34, %v3572_v1  ;;  %v4121_v19 = vpack.c.bf16 %v3459_v63, %v3458_v3  ;;  %v3457_v49 = vadd.f32 %v5931_v30, %v3434_v41 }
 0x1b8   : > { %v3467_v0 = vadd.f32 %v5931_v30, %v3444_v40  ;;  %v3442_v10 = vadd.f32 %v3417_v25, %v3167_v7  ;;  %v3576_v57 = vmul.f32 %v3459_v63, %v3459_v63  ;;  %v3580_v23 = vmul.f32 %v5948_v9, %v5948_v9 }
 0x1b9   : > { %v3588_v24 = vadd.f32 %v3587_v33, %v3573_v38  ;;  %4152 = vst [vmem:[%s5941_s15 + $0x18] sm:$0xff] %v4121_v19   ;;  %v4116_v52 = vpack.c.bf16 %v3457_v49, %v3456_v47  ;;  %v3552_v43 = vadd.f32 %v3551_v55, %v3457_v49  ;;  %v3574_v22 = vmul.f32 %v3457_v49, %v3457_v49 }
 0x1ba   : > { %v4141_v42 = vpack.c.bf16 %v3467_v0, %v3466_v48  ;;  %v3465_v60 = vadd.f32 %v5931_v30, %v3442_v10  ;;  %v3579_v30 = vmul.f32 %v5945_v44, %v5945_v44  ;;  %v3581_v6 = vmul.f32 %v3464_v11, %v3464_v11 }
 0x1bb   : > { %4151 = vst [vmem:[%s5941_s15 + $0x10] sm:$0xff] %v4116_v52   ;;  %v3553_v21 = vadd.f32 %v3552_v43, %v3458_v3  ;;  %v3589_v5 = vadd.f32 %v3588_v24, %v3574_v22  ;;  %v3583_v61 = vmul.f32 %v3466_v48, %v3466_v48  ;;  %v3584_v32 = vmul.f32 %v3467_v0, %v3467_v0 }
 0x1bc   : > { %4156 = vst [vmem:[%s5941_s15 + $0x38] sm:$0xff] %v4141_v42   ;;  %v4136_v27 = vpack.c.bf16 %v3465_v60, %v3464_v11 }
 0x1bd   : > { %v3554_v45 = vadd.f32 %v3553_v21, %v3459_v63  ;;  %v3590_v58 = vadd.f32 %v3589_v5, %v3575_v17 }
 0x1be   : > { %4155 = vst [vmem:[%s5941_s15 + $0x30] sm:$0xff] %v4136_v27  }
 0x1bf   : > { %v3555_v46 = vadd.f32 %v3554_v45, %v3460_v20  ;;  %v3591_v54 = vadd.f32 %v3590_v58, %v3576_v57 }
 0x1c1   : > { %v3592_v39 = vadd.f32 %v3591_v54, %v3577_v18  ;;  %v3556_v7 = vadd.f32 %v3555_v46, %v3461_v16  ;;  %v3582_v16 = vmul.f32 %v3465_v60, %v3465_v60 }
 0x1c3   : > { %v3557_v56 = vadd.f32 %v3556_v7, %v5945_v44  ;;  %v3593_v2 = vadd.f32 %v3592_v39, %v3578_v12 }
 0x1c5   : > { %v3558_v15 = vadd.f32 %v3557_v56, %v5948_v9  ;;  %v3594_v26 = vadd.f32 %v3593_v2, %v3579_v30 }
 0x1c7   : > { %v3559_v20 = vadd.f32 %v3558_v15, %v3464_v11  ;;  %v3595_v31 = vadd.f32 %v3594_v26, %v3580_v23 }
 0x1c9   : > { %v3560_v14 = vadd.f32 %v3559_v20, %v3465_v60  ;;  %v3596_v28 = vadd.f32 %v3595_v31, %v3581_v6 }
 0x1cb   : > { %v3561_v62 = vadd.f32 %v3560_v14, %v3466_v48  ;;  %v3597_v36 = vadd.f32 %v3596_v28, %v3582_v16 }
 0x1cd   : > { %v3562_v44 = vadd.f32 %v3561_v62, %v3467_v0  ;;  %v3598_v35 = vadd.f32 %v3597_v36, %v3583_v61 }
 0x1cf   : > { %v3563_v8 = vrot.slane %v3562_v44, 4  ;;  %v3599_v4 = vadd.f32 %v3598_v35, %v3584_v32 }
 0x1d1   : > { %v3564_v9 = vadd.f32 %v3563_v8, %v3562_v44  ;;  %v3600_v1 = vrot.slane %v3599_v4, 4 }
 0x1d3   : > { %v3565_v13 = vrot.slane %v3564_v9, 2  ;;  %v3601_v51 = vadd.f32 %v3600_v1, %v3599_v4 }
 0x1d5   : > { %v3566_v50 = vadd.f32 %v3565_v13, %v3564_v9  ;;  %v3602_v29 = vrot.slane %v3601_v51, 2 }
 0x1d7   : > { %v3567_v3 = vrot.slane %v3566_v50, 1  ;;  %v3603_v47 = vadd.f32 %v3602_v29, %v3601_v51 }
 0x1d9   : > { %v3604_v59 = vrot.slane %v3603_v47, 1  ;;  %v3568_v37 = vadd.f32 %v3567_v3, %v3566_v50 }
 0x1db   : > { %v3605_v40 = vadd.f32 %v3604_v59, %v3603_v47 }
 0x1dd   : > { %v3607_v34 = vsel %vm3606_vm10, %v3568_v37, %v3605_v40 }
 0x1de   : > { %3608 = vst [vmem:[%s493_s18] sm:$0x3] %v3607_v34 }
 0x1df PF: > { %s19_s9 = sadd.s32 1, %s4759_s9   ;;  %s6082_s27 = smov %s4751_s29 }
 0x1e0   : > { %p16_p0 = scmp.ge.s32.totalorder %s19_s9, 6   ;;  %s6083_s28 = smov %s4755_s30 }
 0x1e1   : > { %s6084_s29 = smov %s6087_s10  ;;  %s6085_s30 = smov %s6091_s11 }
 0x1e2   :  { %18 = sbr.rel (!%p16_p0) target bundleno = 3 (0x3), region = 104 }

</bundles_post_ra>
